<compile_context>
chip_gen: v5e
topology: v5e:2x2
jax: 0.10.0
libtpu: 0.0.40
codegen_flags: <defaults>
</compile_context>

<pallas_src>
import jax
import jax.numpy as jnp
from jax import lax
from jax.experimental import pallas as pl
from jax.experimental.pallas import tpu as pltpu


LANE = 128  # TPU lane width; channel dims are padded to a multiple of this.


def _round_up(v, m):
    return (v + m - 1) // m * m


def _fold_bn(gamma, beta, mean, var, eps=1e-5):
    inv_std = 1.0 / jnp.sqrt(var.astype(jnp.float32) + eps)
    scale = gamma.astype(jnp.float32) * inv_std
    bias = beta.astype(jnp.float32) - mean.astype(jnp.float32) * scale
    return scale, bias


# ----------------------------------------------------------------------------
# Fused kernel: cv1 (1x1 conv + BN + SiLU) -> 3x MaxPool2d(5,1,2) -> cv5.
#   x_ref:        (1, H, W, C1)  bf16
#   w1_ref:       (C1, C3)       bf16
#   s1/b1_ref:    (1, C3)        f32   (folded BN of cv1)
#   w5_ref:       (4, C3, C2)    bf16  (cv5 weight split by concat block)
#   s5/b5_ref:    (1, C2)        f32   (folded BN of cv5)
#   o_ref:        (1, H, W, C2)  f32
#   pad_ref:      VMEM (H+4, W+4, C3) f32 scratch with a -inf-like border,
#                 reused by every pool.  Pool is separable: 5 W-shift maxes
#                 followed by 5 H-shift maxes.
#   cv5 accumulates acc = sum_j y_j @ W5[j], so neither the pooled maps nor
#   the 4*C3 concat ever leave VMEM.
# ----------------------------------------------------------------------------
def _sppelan_fused_kernel(x_ref, w1_ref, s1_ref, b1_ref,
                          w5_ref, s5_ref, b5_ref, o_ref, pad_ref):
    H = o_ref.shape[1]
    W = o_ref.shape[2]
    C1 = x_ref.shape[3]
    C3 = w1_ref.shape[1]
    C2 = o_ref.shape[3]
    NEG = jnp.finfo(jnp.float32).min  # acts as -inf for max pooling

    # ---- cv1: pointwise conv + folded-BN affine + SiLU -------------------
    x2d = x_ref[0].reshape(H * W, C1)                       # bf16
    a1 = jnp.dot(x2d, w1_ref[...], preferred_element_type=jnp.float32)
    a1 = a1 * s1_ref[...] + b1_ref[...]
    y1f = a1 * pl.reciprocal(1.0 + jnp.exp(-a1), approx=True)
    y1 = y1f.astype(jnp.bfloat16)                           # (H*W, C3)

    # ---- cv5 block 0: y1 @ W5[0] ------------------------------------------
    acc = jnp.dot(y1, w5_ref[0], preferred_element_type=jnp.float32)

    # ---- pools + remaining cv5 blocks --------------------------------------
    # Border of the padded scratch reset every grid step (only the center is
    # overwritten by each pool), so this stays correct under megacore grid
    # splitting.
    pad_ref[...] = jnp.full((H + 4, W + 4, C3), NEG, dtype=jnp.float32)

    cur = y1f.reshape(H, W, C3)                             # pool math in f32
    for j in range(1, 4):
        # --- MaxPool2d(k=5, s=1, p=2), separable ---
        pad_ref[2:H + 2, 2:W + 2, :] = cur
        wmax = pad_ref[:, 0:W, :]                           # W-pass: (H+4, W, C3)
        for dx in range(1, 5):
            wmax = jnp.maximum(wmax, pad_ref[:, dx:dx + W, :])
        nxt = wmax[0:H, :, :]                               # H-pass: (H, W, C3)
        for dy in range(1, 5):
            nxt = jnp.maximum(nxt, wmax[dy:dy + H, :, :])
        cur = nxt

        # cv5 block j: y_{j+1} @ W5[j]
        acc = acc + jnp.dot(cur.astype(jnp.bfloat16).reshape(H * W, C3),
                            w5_ref[j], preferred_element_type=jnp.float32)

    y5 = acc * s5_ref[...] + b5_ref[...]
    out = y5 * pl.reciprocal(1.0 + jnp.exp(-y5), approx=True)
    o_ref[0] = out.reshape(H, W, C2).astype(o_ref.dtype)


def fused_sppelan(x_nhwc, w1, s1, b1, w5_blocks, s5, b5, out_dtype):
    N, H, W, C1 = x_nhwc.shape
    C3 = w1.shape[1]
    C2 = w5_blocks.shape[2]
    # TODO(synk): for very large H*W feature maps (e.g. 80x80 heads) add an
    # H-tile grid axis with 6-row halos so this fused kernel stays within
    # v7x's 64 MiB VMEM; SPPELAN's usual 16x16/20x20 maps fit a per-N block.
    return pl.pallas_call(
        _sppelan_fused_kernel,
        out_shape=jax.ShapeDtypeStruct((N, H, W, C2), out_dtype),
        grid=(N,),
        in_specs=[
            pl.BlockSpec((1, H, W, C1), lambda n: (n, 0, 0, 0)),
            pl.BlockSpec((C1, C3), lambda n: (0, 0)),
            pl.BlockSpec((1, C3), lambda n: (0, 0)),
            pl.BlockSpec((1, C3), lambda n: (0, 0)),
            pl.BlockSpec((4, C3, C2), lambda n: (0, 0, 0)),
            pl.BlockSpec((1, C2), lambda n: (0, 0)),
            pl.BlockSpec((1, C2), lambda n: (0, 0)),
        ],
        out_specs=pl.BlockSpec((1, H, W, C2), lambda n: (n, 0, 0, 0)),
        scratch_shapes=[pltpu.VMEM((H + 4, W + 4, C3), jnp.float32)],
        compiler_params=pltpu.CompilerParams(dimension_semantics=("parallel",)),
    )(x_nhwc, w1, s1, b1, w5_blocks, s5, b5)


# ----------------------------------------------------------------------------
# SPPELAN forward (layout plumbing + channel padding in plain JAX)
# ----------------------------------------------------------------------------
def sppelan_forward(x_nchw, params):
    N, c1, H, W = x_nchw.shape
    w1 = params["w1"]                 # (c1, c3)   = torch cv1 weight transposed
    w5 = params["w5"]                 # (4*c3, c2) = torch cv5 weight transposed
    c3 = w1.shape[1]
    c2 = w5.shape[1]

    C1p = _round_up(c1, LANE)
    C3p = _round_up(c3, LANE)
    C2p = _round_up(c2, LANE)

    # NCHW -> NHWC, bf16 activations, lane-dense (zero-padded) channel dims.
    x = jnp.transpose(x_nchw, (0, 2, 3, 1)).astype(jnp.bfloat16)
    x = jnp.pad(x, ((0, 0), (0, 0), (0, 0), (0, C1p - c1)))

    # Folded BN + zero-padded weights (padded channels stay exactly 0 after
    # SiLU since their scale and bias are 0, and their cv5 rows are 0).
    s1, b1 = _fold_bn(*params["bn1"])
    s5, b5 = _fold_bn(*params["bn5"])

    w1p = jnp.zeros((C1p, C3p), jnp.bfloat16).at[:c1, :c3].set(w1.astype(jnp.bfloat16))
    s1p = jnp.zeros((1, C3p), jnp.float32).at[0, :c3].set(s1)
    b1p = jnp.zeros((1, C3p), jnp.float32).at[0, :c3].set(b1)

    # cv5 weight split row-wise into the 4 concat blocks (avoids the concat).
    w5r = w5.reshape(4, c3, c2).astype(jnp.bfloat16)
    w5p = jnp.zeros((4, C3p, C2p), jnp.bfloat16).at[:, :c3, :c2].set(w5r)
    s5p = jnp.zeros((1, C2p), jnp.float32).at[0, :c2].set(s5)
    b5p = jnp.zeros((1, C2p), jnp.float32).at[0, :c2].set(b5)

    out = fused_sppelan(x, w1p, s1p, b1p, w5p, s5p, b5p, jnp.float32)
    out = out[..., :c2]
    return jnp.transpose(out, (0, 3, 1, 2))                 # NHWC -> NCHW


# ----------------------------------------------------------------------------
# Pure-JAX reference (f32 math on the same bf16-rounded operands) for sanity.
# ----------------------------------------------------------------------------
def _reference_forward(x_nchw, params):
    x = jnp.transpose(x_nchw, (0, 2, 3, 1)).astype(jnp.bfloat16).astype(jnp.float32)
    w1 = params["w1"].astype(jnp.bfloat16).astype(jnp.float32)
    w5 = params["w5"].astype(jnp.bfloat16).astype(jnp.float32)
    s1, b1 = _fold_bn(*params["bn1"])
    s5, b5 = _fold_bn(*params["bn5"])

    def silu(v):
        return v * (1.0 / (1.0 + jnp.exp(-v)))

    def pool5(v):
        return lax.reduce_window(v, -jnp.inf, lax.max,
                                 (1, 5, 5, 1), (1, 1, 1, 1), "SAME")

    y1 = silu(jnp.einsum("nhwc,cd->nhwd", x, w1) * s1 + b1)
    y2 = pool5(y1)
    y3 = pool5(y2)
    y4 = pool5(y3)
    ycat = jnp.concatenate([y1, y2, y3, y4], axis=-1)
    out = silu(jnp.einsum("nhwc,cd->nhwd", ycat, w5) * s5 + b5)
    return jnp.transpose(out, (0, 3, 1, 2))


# ----------------------------------------------------------------------------
# Deterministic synthetic parameters (shapes per SPPELAN.__init__)
# ----------------------------------------------------------------------------
def _det(shape, scale):
    n = 1
    for s in shape:
        n *= s
    return ((jnp.arange(n, dtype=jnp.float32) % 7) - 3.0).reshape(shape) * scale


def _bn_params(c):
    gamma = 1.0 + 0.01 * jnp.arange(c, dtype=jnp.float32)
    beta = 0.02 * jnp.arange(c, dtype=jnp.float32)
    mean = 0.01 * jnp.arange(c, dtype=jnp.float32)
    var = 1.0 + 0.1 * jnp.arange(c, dtype=jnp.float32)
    return (gamma, beta, mean, var)


def make_params(c1, c2, c3):
    # torch cv1 weight is (c3, c1, 1, 1); stored here as (c1, c3) for matmul.
    # torch cv5 weight is (c2, 4*c3, 1, 1); stored here as (4*c3, c2).
    return {
        "w1": _det((c1, c3), 0.1),
        "bn1": _bn_params(c3),
        "w5": _det((4 * c3, c2), 0.05),
        "bn5": _bn_params(c2),
    }


if __name__ == "__main__":
    N, c1, H, W = 2, 4, 16, 16
    c2, c3 = 8, 4

    key = jax.random.PRNGKey(0)
    x = jax.random.normal(key, (N, c1, H, W), dtype=jnp.float32)  # NCHW like PyTorch

    params = make_params(c1, c2, c3)
    out = jax.block_until_ready(sppelan_forward(x, params))

    assert out.shape == (N, c2, H, W), out.shape
    assert out.dtype == jnp.float32

    ref = jax.block_until_ready(_reference_forward(x, params))
    assert bool(jnp.allclose(out, ref, atol=5e-2, rtol=5e-2)), float(
        jnp.max(jnp.abs(out - ref)))

    print("KERNEL_OK")
</pallas_src>

<mosaic_0001>
module attributes {stable_mosaic.version = 11 : i64} {
  func.func @_sppelan_fused_kernel(%arg0: i32, %arg1: memref<1x16x16x128xbf16, #tpu.memory_space<vmem>>, %arg2: memref<128x128xbf16, #tpu.memory_space<vmem>>, %arg3: memref<1x128xf32, #tpu.memory_space<vmem>>, %arg4: memref<1x128xf32, #tpu.memory_space<vmem>>, %arg5: memref<4x128x128xbf16, #tpu.memory_space<vmem>>, %arg6: memref<1x128xf32, #tpu.memory_space<vmem>>, %arg7: memref<1x128xf32, #tpu.memory_space<vmem>>, %arg8: memref<1x16x16x128xf32, #tpu.memory_space<vmem>>, %arg9: memref<20x20x128xf32, #tpu.memory_space<vmem>>) attributes {dimension_semantics = [#tpu.dimension_semantics<parallel>], iteration_bounds = array<i64: 2>, scalar_prefetch = 0 : i64, scratch_operands = 1 : i64, tpu.core_type = #tpu.core_type<tc>, window_params = [{transform_indices = @transform_0, window_bounds = array<i64: 1, 16, 16, 128>}, {pipeline_mode = #tpu.pipeline_mode<synchronous>, transform_indices = @transform_1, window_bounds = array<i64: 128, 128>}, {pipeline_mode = #tpu.pipeline_mode<synchronous>, transform_indices = @transform_2, window_bounds = array<i64: 1, 128>}, {pipeline_mode = #tpu.pipeline_mode<synchronous>, transform_indices = @transform_3, window_bounds = array<i64: 1, 128>}, {pipeline_mode = #tpu.pipeline_mode<synchronous>, transform_indices = @transform_4, window_bounds = array<i64: 4, 128, 128>}, {pipeline_mode = #tpu.pipeline_mode<synchronous>, transform_indices = @transform_5, window_bounds = array<i64: 1, 128>}, {pipeline_mode = #tpu.pipeline_mode<synchronous>, transform_indices = @transform_6, window_bounds = array<i64: 1, 128>}, {transform_indices = @transform_7, window_bounds = array<i64: 1, 16, 16, 128>}]} {
    %c0 = arith.constant 0 : index
    %c0_0 = arith.constant 0 : index
    %c0_1 = arith.constant 0 : index
    %c0_2 = arith.constant 0 : index
    %0 = vector.load %arg1[%c0, %c0_0, %c0_1, %c0_2] : memref<1x16x16x128xbf16, #tpu.memory_space<vmem>>, vector<1x16x16x128xbf16>
    %1 = vector.shape_cast %0 : vector<1x16x16x128xbf16> to vector<16x16x128xbf16>
    %2 = vector.shape_cast %1 : vector<16x16x128xbf16> to vector<256x128xbf16>
    %c0_3 = arith.constant 0 : index
    %c0_4 = arith.constant 0 : index
    %3 = vector.load %arg2[%c0_3, %c0_4] : memref<128x128xbf16, #tpu.memory_space<vmem>>, vector<128x128xbf16>
    %cst = arith.constant dense<0.000000e+00> : vector<256x128xf32>
    %4 = tpu.matmul %2, %3, %cst {dimension_numbers = #tpu.dot_dimension_numbers<[1], [0], [0], [1], [0, 0, 1, 1], [], []>} : vector<256x128xbf16>, vector<128x128xbf16>, vector<256x128xf32> -> vector<256x128xf32>
    %c0_5 = arith.constant 0 : index
    %c0_6 = arith.constant 0 : index
    %5 = vector.load %arg3[%c0_5, %c0_6] : memref<1x128xf32, #tpu.memory_space<vmem>>, vector<1x128xf32>
    %6 = vector.broadcast %5 : vector<1x128xf32> to vector<256x128xf32>
    %7 = arith.mulf %4, %6 : vector<256x128xf32>
    %c0_7 = arith.constant 0 : index
    %c0_8 = arith.constant 0 : index
    %8 = vector.load %arg4[%c0_7, %c0_8] : memref<1x128xf32, #tpu.memory_space<vmem>>, vector<1x128xf32>
    %9 = vector.broadcast %8 : vector<1x128xf32> to vector<256x128xf32>
    %10 = arith.addf %7, %9 : vector<256x128xf32>
    %cst_9 = arith.constant 0.000000e+00 : f32
    %11 = vector.broadcast %cst_9 : f32 to vector<256x128xf32>
    %12 = arith.subf %11, %10 : vector<256x128xf32>
    %13 = math.exp %12 : vector<256x128xf32>
    %cst_10 = arith.constant 1.000000e+00 : f32
    %14 = vector.broadcast %cst_10 : f32 to vector<256x128xf32>
    %15 = arith.addf %14, %13 : vector<256x128xf32>
    %16 = tpu.reciprocal %15 {approx = true} : vector<256x128xf32> -> vector<256x128xf32>
    %17 = arith.mulf %10, %16 : vector<256x128xf32>
    %18 = arith.truncf %17 : vector<256x128xf32> to vector<256x128xbf16>
    %c0_11 = arith.constant 0 : index
    %c0_12 = arith.constant 0 : index
    %c0_13 = arith.constant 0 : index
    %19 = vector.load %arg5[%c0_11, %c0_12, %c0_13] : memref<4x128x128xbf16, #tpu.memory_space<vmem>>, vector<1x128x128xbf16>
    %20 = vector.shape_cast %19 : vector<1x128x128xbf16> to vector<128x128xbf16>
    %cst_14 = arith.constant dense<0.000000e+00> : vector<256x128xf32>
    %21 = tpu.matmul %18, %20, %cst_14 {dimension_numbers = #tpu.dot_dimension_numbers<[1], [0], [0], [1], [0, 0, 1, 1], [], []>} : vector<256x128xbf16>, vector<128x128xbf16>, vector<256x128xf32> -> vector<256x128xf32>
    %cst_15 = arith.constant -3.40282347E+38 : f32
    %22 = vector.broadcast %cst_15 : f32 to vector<20x20x128xf32>
    %c0_16 = arith.constant 0 : index
    %c0_17 = arith.constant 0 : index
    %c0_18 = arith.constant 0 : index
    %23 = vector.load %arg9[%c0_16, %c0_17, %c0_18] : memref<20x20x128xf32, #tpu.memory_space<vmem>>, vector<20x20x128xf32>
    tpu.vector_store %arg9[%c0_16, %c0_17, %c0_18], %22 {strides = array<i32>} : memref<20x20x128xf32, #tpu.memory_space<vmem>>, vector<20x20x128xf32>,
    %24 = vector.shape_cast %17 : vector<256x128xf32> to vector<16x16x128xf32>
    %c2 = arith.constant 2 : index
    %c2_19 = arith.constant 2 : index
    %c0_20 = arith.constant 0 : index
    %25 = vector.load %arg9[%c2, %c2_19, %c0_20] : memref<20x20x128xf32, #tpu.memory_space<vmem>>, vector<16x16x128xf32>
    tpu.vector_store %arg9[%c2, %c2_19, %c0_20], %24 {strides = array<i32>} : memref<20x20x128xf32, #tpu.memory_space<vmem>>, vector<16x16x128xf32>,
    %c0_21 = arith.constant 0 : index
    %c0_22 = arith.constant 0 : index
    %c0_23 = arith.constant 0 : index
    %26 = vector.load %arg9[%c0_21, %c0_22, %c0_23] : memref<20x20x128xf32, #tpu.memory_space<vmem>>, vector<20x16x128xf32>
    %c0_24 = arith.constant 0 : index
    %c1 = arith.constant 1 : index
    %c0_25 = arith.constant 0 : index
    %27 = vector.load %arg9[%c0_24, %c1, %c0_25] : memref<20x20x128xf32, #tpu.memory_space<vmem>>, vector<20x16x128xf32>
    %28 = arith.maximumf %26, %27 : vector<20x16x128xf32>
    %c0_26 = arith.constant 0 : index
    %c2_27 = arith.constant 2 : index
    %c0_28 = arith.constant 0 : index
    %29 = vector.load %arg9[%c0_26, %c2_27, %c0_28] : memref<20x20x128xf32, #tpu.memory_space<vmem>>, vector<20x16x128xf32>
    %30 = arith.maximumf %28, %29 : vector<20x16x128xf32>
    %c0_29 = arith.constant 0 : index
    %c3 = arith.constant 3 : index
    %c0_30 = arith.constant 0 : index
    %31 = vector.load %arg9[%c0_29, %c3, %c0_30] : memref<20x20x128xf32, #tpu.memory_space<vmem>>, vector<20x16x128xf32>
    %32 = arith.maximumf %30, %31 : vector<20x16x128xf32>
    %c0_31 = arith.constant 0 : index
    %c4 = arith.constant 4 : index
    %c0_32 = arith.constant 0 : index
    %33 = vector.load %arg9[%c0_31, %c4, %c0_32] : memref<20x20x128xf32, #tpu.memory_space<vmem>>, vector<20x16x128xf32>
    %34 = arith.maximumf %32, %33 : vector<20x16x128xf32>
    %35 = vector.extract_strided_slice %34 {offsets = [0, 0, 0], sizes = [16, 16, 128], strides = [1, 1, 1]} : vector<20x16x128xf32> to vector<16x16x128xf32>
    %36 = vector.extract_strided_slice %34 {offsets = [1, 0, 0], sizes = [16, 16, 128], strides = [1, 1, 1]} : vector<20x16x128xf32> to vector<16x16x128xf32>
    %37 = arith.maximumf %35, %36 : vector<16x16x128xf32>
    %38 = vector.extract_strided_slice %34 {offsets = [2, 0, 0], sizes = [16, 16, 128], strides = [1, 1, 1]} : vector<20x16x128xf32> to vector<16x16x128xf32>
    %39 = arith.maximumf %37, %38 : vector<16x16x128xf32>
    %40 = vector.extract_strided_slice %34 {offsets = [3, 0, 0], sizes = [16, 16, 128], strides = [1, 1, 1]} : vector<20x16x128xf32> to vector<16x16x128xf32>
    %41 = arith.maximumf %39, %40 : vector<16x16x128xf32>
    %42 = vector.extract_strided_slice %34 {offsets = [4, 0, 0], sizes = [16, 16, 128], strides = [1, 1, 1]} : vector<20x16x128xf32> to vector<16x16x128xf32>
    %43 = arith.maximumf %41, %42 : vector<16x16x128xf32>
    %44 = arith.truncf %43 : vector<16x16x128xf32> to vector<16x16x128xbf16>
    %45 = vector.shape_cast %44 : vector<16x16x128xbf16> to vector<256x128xbf16>
    %c1_33 = arith.constant 1 : index
    %c0_34 = arith.constant 0 : index
    %c0_35 = arith.constant 0 : index
    %46 = vector.load %arg5[%c1_33, %c0_34, %c0_35] : memref<4x128x128xbf16, #tpu.memory_space<vmem>>, vector<1x128x128xbf16>
    %47 = vector.shape_cast %46 : vector<1x128x128xbf16> to vector<128x128xbf16>
    %cst_36 = arith.constant dense<0.000000e+00> : vector<256x128xf32>
    %48 = tpu.matmul %45, %47, %cst_36 {dimension_numbers = #tpu.dot_dimension_numbers<[1], [0], [0], [1], [0, 0, 1, 1], [], []>} : vector<256x128xbf16>, vector<128x128xbf16>, vector<256x128xf32> -> vector<256x128xf32>
    %49 = arith.addf %21, %48 : vector<256x128xf32>
    %c2_37 = arith.constant 2 : index
    %c2_38 = arith.constant 2 : index
    %c0_39 = arith.constant 0 : index
    %50 = vector.load %arg9[%c2_37, %c2_38, %c0_39] : memref<20x20x128xf32, #tpu.memory_space<vmem>>, vector<16x16x128xf32>
    tpu.vector_store %arg9[%c2_37, %c2_38, %c0_39], %43 {strides = array<i32>} : memref<20x20x128xf32, #tpu.memory_space<vmem>>, vector<16x16x128xf32>,
    %c0_40 = arith.constant 0 : index
    %c0_41 = arith.constant 0 : index
    %c0_42 = arith.constant 0 : index
    %51 = vector.load %arg9[%c0_40, %c0_41, %c0_42] : memref<20x20x128xf32, #tpu.memory_space<vmem>>, vector<20x16x128xf32>
    %c0_43 = arith.constant 0 : index
    %c1_44 = arith.constant 1 : index
    %c0_45 = arith.constant 0 : index
    %52 = vector.load %arg9[%c0_43, %c1_44, %c0_45] : memref<20x20x128xf32, #tpu.memory_space<vmem>>, vector<20x16x128xf32>
    %53 = arith.maximumf %51, %52 : vector<20x16x128xf32>
    %c0_46 = arith.constant 0 : index
    %c2_47 = arith.constant 2 : index
    %c0_48 = arith.constant 0 : index
    %54 = vector.load %arg9[%c0_46, %c2_47, %c0_48] : memref<20x20x128xf32, #tpu.memory_space<vmem>>, vector<20x16x128xf32>
    %55 = arith.maximumf %53, %54 : vector<20x16x128xf32>
    %c0_49 = arith.constant 0 : index
    %c3_50 = arith.constant 3 : index
    %c0_51 = arith.constant 0 : index
    %56 = vector.load %arg9[%c0_49, %c3_50, %c0_51] : memref<20x20x128xf32, #tpu.memory_space<vmem>>, vector<20x16x128xf32>
    %57 = arith.maximumf %55, %56 : vector<20x16x128xf32>
    %c0_52 = arith.constant 0 : index
    %c4_53 = arith.constant 4 : index
    %c0_54 = arith.constant 0 : index
    %58 = vector.load %arg9[%c0_52, %c4_53, %c0_54] : memref<20x20x128xf32, #tpu.memory_space<vmem>>, vector<20x16x128xf32>
    %59 = arith.maximumf %57, %58 : vector<20x16x128xf32>
    %60 = vector.extract_strided_slice %59 {offsets = [0, 0, 0], sizes = [16, 16, 128], strides = [1, 1, 1]} : vector<20x16x128xf32> to vector<16x16x128xf32>
    %61 = vector.extract_strided_slice %59 {offsets = [1, 0, 0], sizes = [16, 16, 128], strides = [1, 1, 1]} : vector<20x16x128xf32> to vector<16x16x128xf32>
    %62 = arith.maximumf %60, %61 : vector<16x16x128xf32>
    %63 = vector.extract_strided_slice %59 {offsets = [2, 0, 0], sizes = [16, 16, 128], strides = [1, 1, 1]} : vector<20x16x128xf32> to vector<16x16x128xf32>
    %64 = arith.maximumf %62, %63 : vector<16x16x128xf32>
    %65 = vector.extract_strided_slice %59 {offsets = [3, 0, 0], sizes = [16, 16, 128], strides = [1, 1, 1]} : vector<20x16x128xf32> to vector<16x16x128xf32>
    %66 = arith.maximumf %64, %65 : vector<16x16x128xf32>
    %67 = vector.extract_strided_slice %59 {offsets = [4, 0, 0], sizes = [16, 16, 128], strides = [1, 1, 1]} : vector<20x16x128xf32> to vector<16x16x128xf32>
    %68 = arith.maximumf %66, %67 : vector<16x16x128xf32>
    %69 = arith.truncf %68 : vector<16x16x128xf32> to vector<16x16x128xbf16>
    %70 = vector.shape_cast %69 : vector<16x16x128xbf16> to vector<256x128xbf16>
    %c2_55 = arith.constant 2 : index
    %c0_56 = arith.constant 0 : index
    %c0_57 = arith.constant 0 : index
    %71 = vector.load %arg5[%c2_55, %c0_56, %c0_57] : memref<4x128x128xbf16, #tpu.memory_space<vmem>>, vector<1x128x128xbf16>
    %72 = vector.shape_cast %71 : vector<1x128x128xbf16> to vector<128x128xbf16>
    %cst_58 = arith.constant dense<0.000000e+00> : vector<256x128xf32>
    %73 = tpu.matmul %70, %72, %cst_58 {dimension_numbers = #tpu.dot_dimension_numbers<[1], [0], [0], [1], [0, 0, 1, 1], [], []>} : vector<256x128xbf16>, vector<128x128xbf16>, vector<256x128xf32> -> vector<256x128xf32>
    %74 = arith.addf %49, %73 : vector<256x128xf32>
    %c2_59 = arith.constant 2 : index
    %c2_60 = arith.constant 2 : index
    %c0_61 = arith.constant 0 : index
    %75 = vector.load %arg9[%c2_59, %c2_60, %c0_61] : memref<20x20x128xf32, #tpu.memory_space<vmem>>, vector<16x16x128xf32>
    tpu.vector_store %arg9[%c2_59, %c2_60, %c0_61], %68 {strides = array<i32>} : memref<20x20x128xf32, #tpu.memory_space<vmem>>, vector<16x16x128xf32>,
    %c0_62 = arith.constant 0 : index
    %c0_63 = arith.constant 0 : index
    %c0_64 = arith.constant 0 : index
    %76 = vector.load %arg9[%c0_62, %c0_63, %c0_64] : memref<20x20x128xf32, #tpu.memory_space<vmem>>, vector<20x16x128xf32>
    %c0_65 = arith.constant 0 : index
    %c1_66 = arith.constant 1 : index
    %c0_67 = arith.constant 0 : index
    %77 = vector.load %arg9[%c0_65, %c1_66, %c0_67] : memref<20x20x128xf32, #tpu.memory_space<vmem>>, vector<20x16x128xf32>
    %78 = arith.maximumf %76, %77 : vector<20x16x128xf32>
    %c0_68 = arith.constant 0 : index
    %c2_69 = arith.constant 2 : index
    %c0_70 = arith.constant 0 : index
    %79 = vector.load %arg9[%c0_68, %c2_69, %c0_70] : memref<20x20x128xf32, #tpu.memory_space<vmem>>, vector<20x16x128xf32>
    %80 = arith.maximumf %78, %79 : vector<20x16x128xf32>
    %c0_71 = arith.constant 0 : index
    %c3_72 = arith.constant 3 : index
    %c0_73 = arith.constant 0 : index
    %81 = vector.load %arg9[%c0_71, %c3_72, %c0_73] : memref<20x20x128xf32, #tpu.memory_space<vmem>>, vector<20x16x128xf32>
    %82 = arith.maximumf %80, %81 : vector<20x16x128xf32>
    %c0_74 = arith.constant 0 : index
    %c4_75 = arith.constant 4 : index
    %c0_76 = arith.constant 0 : index
    %83 = vector.load %arg9[%c0_74, %c4_75, %c0_76] : memref<20x20x128xf32, #tpu.memory_space<vmem>>, vector<20x16x128xf32>
    %84 = arith.maximumf %82, %83 : vector<20x16x128xf32>
    %85 = vector.extract_strided_slice %84 {offsets = [0, 0, 0], sizes = [16, 16, 128], strides = [1, 1, 1]} : vector<20x16x128xf32> to vector<16x16x128xf32>
    %86 = vector.extract_strided_slice %84 {offsets = [1, 0, 0], sizes = [16, 16, 128], strides = [1, 1, 1]} : vector<20x16x128xf32> to vector<16x16x128xf32>
    %87 = arith.maximumf %85, %86 : vector<16x16x128xf32>
    %88 = vector.extract_strided_slice %84 {offsets = [2, 0, 0], sizes = [16, 16, 128], strides = [1, 1, 1]} : vector<20x16x128xf32> to vector<16x16x128xf32>
    %89 = arith.maximumf %87, %88 : vector<16x16x128xf32>
    %90 = vector.extract_strided_slice %84 {offsets = [3, 0, 0], sizes = [16, 16, 128], strides = [1, 1, 1]} : vector<20x16x128xf32> to vector<16x16x128xf32>
    %91 = arith.maximumf %89, %90 : vector<16x16x128xf32>
    %92 = vector.extract_strided_slice %84 {offsets = [4, 0, 0], sizes = [16, 16, 128], strides = [1, 1, 1]} : vector<20x16x128xf32> to vector<16x16x128xf32>
    %93 = arith.maximumf %91, %92 : vector<16x16x128xf32>
    %94 = arith.truncf %93 : vector<16x16x128xf32> to vector<16x16x128xbf16>
    %95 = vector.shape_cast %94 : vector<16x16x128xbf16> to vector<256x128xbf16>
    %c3_77 = arith.constant 3 : index
    %c0_78 = arith.constant 0 : index
    %c0_79 = arith.constant 0 : index
    %96 = vector.load %arg5[%c3_77, %c0_78, %c0_79] : memref<4x128x128xbf16, #tpu.memory_space<vmem>>, vector<1x128x128xbf16>
    %97 = vector.shape_cast %96 : vector<1x128x128xbf16> to vector<128x128xbf16>
    %cst_80 = arith.constant dense<0.000000e+00> : vector<256x128xf32>
    %98 = tpu.matmul %95, %97, %cst_80 {dimension_numbers = #tpu.dot_dimension_numbers<[1], [0], [0], [1], [0, 0, 1, 1], [], []>} : vector<256x128xbf16>, vector<128x128xbf16>, vector<256x128xf32> -> vector<256x128xf32>
    %99 = arith.addf %74, %98 : vector<256x128xf32>
    %c0_81 = arith.constant 0 : index
    %c0_82 = arith.constant 0 : index
    %100 = vector.load %arg6[%c0_81, %c0_82] : memref<1x128xf32, #tpu.memory_space<vmem>>, vector<1x128xf32>
    %101 = vector.broadcast %100 : vector<1x128xf32> to vector<256x128xf32>
    %102 = arith.mulf %99, %101 : vector<256x128xf32>
    %c0_83 = arith.constant 0 : index
    %c0_84 = arith.constant 0 : index
    %103 = vector.load %arg7[%c0_83, %c0_84] : memref<1x128xf32, #tpu.memory_space<vmem>>, vector<1x128xf32>
    %104 = vector.broadcast %103 : vector<1x128xf32> to vector<256x128xf32>
    %105 = arith.addf %102, %104 : vector<256x128xf32>
    %cst_85 = arith.constant 0.000000e+00 : f32
    %106 = vector.broadcast %cst_85 : f32 to vector<256x128xf32>
    %107 = arith.subf %106, %105 : vector<256x128xf32>
    %108 = math.exp %107 : vector<256x128xf32>
    %cst_86 = arith.constant 1.000000e+00 : f32
    %109 = vector.broadcast %cst_86 : f32 to vector<256x128xf32>
    %110 = arith.addf %109, %108 : vector<256x128xf32>
    %111 = tpu.reciprocal %110 {approx = true} : vector<256x128xf32> -> vector<256x128xf32>
    %112 = arith.mulf %105, %111 : vector<256x128xf32>
    %113 = vector.shape_cast %112 : vector<256x128xf32> to vector<16x16x128xf32>
    %c0_87 = arith.constant 0 : index
    %c0_88 = arith.constant 0 : index
    %c0_89 = arith.constant 0 : index
    %c0_90 = arith.constant 0 : index
    %114 = vector.load %arg8[%c0_87, %c0_88, %c0_89, %c0_90] : memref<1x16x16x128xf32, #tpu.memory_space<vmem>>, vector<1x16x16x128xf32>
    %115 = vector.shape_cast %114 : vector<1x16x16x128xf32> to vector<16x16x128xf32>
    %116 = vector.shape_cast %113 : vector<16x16x128xf32> to vector<1x16x16x128xf32>
    tpu.vector_store %arg8[%c0_87, %c0_88, %c0_89, %c0_90], %116 {strides = array<i32>} : memref<1x16x16x128xf32, #tpu.memory_space<vmem>>, vector<1x16x16x128xf32>,
    return
  }
  func.func @transform_0(%arg0: i32) -> (i32, i32, i32, i32) {
    %c0_i32 = arith.constant 0 : i32
    %c0_i32_0 = arith.constant 0 : i32
    %c0_i32_1 = arith.constant 0 : i32
    %c0_i32_2 = arith.constant 0 : i32
    return %arg0, %c0_i32, %c0_i32_0, %c0_i32_1 : i32, i32, i32, i32
  }
  func.func @transform_1(%arg0: i32) -> (i32, i32) {
    %c0_i32 = arith.constant 0 : i32
    %c0_i32_0 = arith.constant 0 : i32
    %c0_i32_1 = arith.constant 0 : i32
    return %c0_i32, %c0_i32_0 : i32, i32
  }
  func.func @transform_2(%arg0: i32) -> (i32, i32) {
    %c0_i32 = arith.constant 0 : i32
    %c0_i32_0 = arith.constant 0 : i32
    %c0_i32_1 = arith.constant 0 : i32
    return %c0_i32, %c0_i32_0 : i32, i32
  }
  func.func @transform_3(%arg0: i32) -> (i32, i32) {
    %c0_i32 = arith.constant 0 : i32
    %c0_i32_0 = arith.constant 0 : i32
    %c0_i32_1 = arith.constant 0 : i32
    return %c0_i32, %c0_i32_0 : i32, i32
  }
  func.func @transform_4(%arg0: i32) -> (i32, i32, i32) {
    %c0_i32 = arith.constant 0 : i32
    %c0_i32_0 = arith.constant 0 : i32
    %c0_i32_1 = arith.constant 0 : i32
    %c0_i32_2 = arith.constant 0 : i32
    return %c0_i32, %c0_i32_0, %c0_i32_1 : i32, i32, i32
  }
  func.func @transform_5(%arg0: i32) -> (i32, i32) {
    %c0_i32 = arith.constant 0 : i32
    %c0_i32_0 = arith.constant 0 : i32
    %c0_i32_1 = arith.constant 0 : i32
    return %c0_i32, %c0_i32_0 : i32, i32
  }
  func.func @transform_6(%arg0: i32) -> (i32, i32) {
    %c0_i32 = arith.constant 0 : i32
    %c0_i32_0 = arith.constant 0 : i32
    %c0_i32_1 = arith.constant 0 : i32
    return %c0_i32, %c0_i32_0 : i32, i32
  }
  func.func @transform_7(%arg0: i32) -> (i32, i32, i32, i32) {
    %c0_i32 = arith.constant 0 : i32
    %c0_i32_0 = arith.constant 0 : i32
    %c0_i32_1 = arith.constant 0 : i32
    %c0_i32_2 = arith.constant 0 : i32
    return %arg0, %c0_i32, %c0_i32_0, %c0_i32_1 : i32, i32, i32, i32
  }
}

</mosaic_0001>

<bundles_post_ra>
// kernel: tpu_custom_call.1
= control target key start
LH: loop header
LB: loop body
LE: loop exit
PB: predicated region body
PF: predicated region fallthrough
CT: control target
= control target key end

     0   :  { %s7215_s0 = inlined_call_operand.hbm [shape: bf16[2,16,16,128], index: 0, kind: input, shape index: {}]   ;;  %s7216_s1 = inlined_call_operand.hbm [shape: bf16[128,128], index: 1, kind: input, shape index: {}]   ;;  %s7217_s2 = inlined_call_operand.vmem [shape: f32[1,128], index: 2, kind: input, shape index: {}]   ;;  %s7218_s3 = inlined_call_operand.vmem [shape: f32[1,128], index: 3, kind: input, shape index: {}]   ;;  %s7219_s4 = inlined_call_operand.hbm [shape: bf16[4,128,128], index: 4, kind: input, shape index: {}]   ;;  %s7220_s5 = inlined_call_operand.vmem [shape: f32[1,128], index: 5, kind: input, shape index: {}]   ;;  %s7221_s6 = inlined_call_operand.vmem [shape: f32[1,128], index: 6, kind: input, shape index: {}]   ;;  %s7222_s7 = inlined_call_operand.hbm [shape: f32[2,16,16,128], index: 7, kind: output, shape index: {}]  }
   0x1   :  { %7290 = sst [smem:[#allocation61_spill]] %s7216_s1 }
   0x2   :  { %12 = vsyncpa [#allocation4], 0 }
   0x3   :  { %14 = vsyncpa [#allocation4 + $0x1], 0 }
   0x4   :  { %15 = vsyncpa [#allocation7], 0 }
   0x5   :  { %16 = vsyncpa [#allocation5], 0 }
   0x6   :  { %18 = vsyncpa [#allocation5 + $0x1], 0  ;;  %s4863_s24 = smov 0   ;;  %s4865_s25 = smov 0  }
   0x7   :  { %s4867_s26 = smov 0   ;;  %s4869_s27 = smov 0  }
   0x8 LB: > { %s4884_s28 = sadd.s32 4294967295, %s4814_s27   ;;  %s3981_s29 = sadd.s32 4294967294, %s4814_s27   ;;  %s4814_s27 = sphi %s4869_s27, %s7460_s27   ;;  %s4810_s26 = sphi %s4867_s26, %s7459_s26   ;;  %s4806_s25 = sphi %s4865_s25, %s7458_s25   ;;  %s4802_s24 = sphi %s4863_s24, %s7457_s24  }
   0x9   : > { %p44_p0 = scmp.ne.s32.totalorder %s4806_s25, %s4802_s24  ;;  %p45_p1 = scmp.eq.s32.totalorder %s4884_s28, 0 }
   0xa   : > { %p194_p2 = scmp.eq.s32.totalorder %s4884_s28, 1  ;;  %p200_p3 = scmp.eq.s32.totalorder %s3981_s29, 1 }
   0xb   : > { %p4893_p4 = por %p45_p1, %p44_p0  ;;  %p3982_p5 = scmp.ge.s32.totalorder %s4814_s27, 1 }
   0xc   : > { %p4898_p6 = por %p200_p3, %p44_p0  ;;  %p207_p7 = scmp.lt.s32.totalorder %s4814_s27, 3 }
   0xd   : > { %s7293_s1 = sld [smem:[#allocation61_spill]]  ;;  %s4816_s13 = smov [#allocation6]  }
   0xe   : > { %p4906_p8 = pnand %p3982_p5, %p207_p7  ;;  %s220_s14 = sshll.u32 %s4816_s13, 4  ;;  %s221_s14 = int_to_ptr.vmem [resolvable:$true] %s220_s14 }
   0xf   : > { %s238_s17 = sshll.u32 %s7219_s4, 4  ;;  %s7223_s18 = smov 64   ;;  %s239_s17 = int_to_ptr.hbm [resolvable:$true] %s238_s17 }
  0x10   : > { %p4317_p9 = pneg %p4906_p8  ;;  %s7224_s19 = smov 4  }
  0x11   : > { %s4819_s20 = smov [#allocation8]   ;;  %s4925_s22 = sadd.s32 1, %s4814_s27  }
  0x12   : > { %p4318_p10 = pnand %p4317_p9, %p45_p1  ;;  %s240_s21 = sshll.u32 %s4819_s20, 4  ;;  %s241_s21 = int_to_ptr.vmem [resolvable:$true] %s240_s21 }
  0x13   : > { %s218_s11 = sshll.u32 %s7293_s1, 4  ;;  %s31_s23 = sadd.s32 1, %s4810_s26  ;;  %s219_s11 = int_to_ptr.hbm [resolvable:$true] %s218_s11 }
  0x14   : > { %4320 = dma.hbm_to_vmem [thread:$0]  (!%p4318_p10), %s219_s11, 1024, %s221_s14, [#allocation7], %s7223_s18, %s7223_s18, %s7224_s19  }
  0x15   : > { %4323 = dma.hbm_to_vmem [thread:$0]  (!%p4318_p10), %s239_s17, 4096, %s241_s21, [#allocation7], %s7223_s18, %s7223_s18, %s7224_s19  }
  0x16   : > { %s28_s29 = ssub.s32 %s4814_s27, %s4925_s22  ;;  %p38_p12 = scmp.ne.s32.totalorder %s4810_s26, %s4806_s25 }
  0x17   : > { %p29_p13 = scmp.eq.s32.totalorder %s28_s29, 0  ;;  %p39_p0 = scmp.eq.s32.totalorder %s4814_s27, 0 }
  0x18   : > { %p4935_p3 = por %p194_p2, %p38_p12  ;;  %p4334_p5 = scmp.lt.s32.totalorder %s4814_s27, 2 }
  0x19   : > { %s4941_s10 = scalar_select %p29_p13, %s4810_s26, %s31_s23  }
  0x1a   : > { %p40_p7 = por %p39_p0, %p38_p12  ;;  %s260_s11 = sand.u32 1, %s4810_s26  }
  0x1b   : > { %s3986_s13 = sshll.u32 %s260_s11, 7  ;;  %s4223_s14 = sshll.u32 %s4814_s27, 7 }
  0x1c   : > { %s269_s17 = scalar_lea.hbm %s7215_s0, %s4223_s14  ;;  %s264_s20 = scalar_lea.vmem [#allocation3], %s3986_s13 }
  0x1d   : > { %s272_s21 = sshll.u32 %s264_s20, 4  ;;  %s270_s29 = sshll.u32 %s269_s17, 4  ;;  %s273_s21 = int_to_ptr.vmem [resolvable:$true] %s272_s21  ;;  %s271_s29 = int_to_ptr.hbm [resolvable:$true] %s270_s29 }
  0x1e   : > { %p4948_p2 = pnand %p4334_p5, %p40_p7  ;;  %s261_s23 = scalar_lea.sflag [#allocation4], %s260_s11 }
  0x1f   : > { %s4714_s19 = sshra.s32 %s271_s29, 4  ;;  %s4721_s15 = scalar_lea.hbm %s7215_s0, 256  ;;  %s4715_s19 = int_to_ptr.hbm [resolvable:$true] %s4714_s19 }
  0x20   : > { %s4716_s1 = scalar_lea.hbm %s4715_s19, 128  ;;  %p4718_p10 = pneg %p4948_p2 }
  0x21   : > { %p4717_p9 = scmp.ne.s32.totalorder %s4715_s19, %s4716_s1  ;;  %p4722_p0 = scmp.lt.s32.totalorder %s4715_s19, %s7215_s0 }
  0x22   : > { %p4723_p5 = scmp.lt.s32.totalorder %s4721_s15, %s4716_s1 }
  0x23   : > { %p4719_p12 = pnand %p4718_p10, %p4717_p9 }
  0x24   : > { %p4724_p7 = por %p4723_p5, %p4722_p0 }
  0x25   : > { %p4720_p13 = pneg %p4719_p12 }
  0x27   : > { %p4725_p11 = pnand %p4724_p7, %p4720_p13 }
  0x29   : > { %4728 = shalt.err (!%p4725_p11)
}
  0x2a   : > { %s7297_s11 = smov 4   ;;  %s7298_s20 = smov 64  }
  0x2b   : > { %4327 = dma.hbm_to_vmem [thread:$0]  (!%p4948_p2), %s271_s29, 2048, %s273_s21, %s261_s23, %s7298_s20, %s7298_s20, %s7297_s11  }
  0x2c   : > { %284 = sbr.rel (%p4906_p8) target bundleno = 920 (0x398), region = 48 }
  0x31   : > { %s4968_s14 = sand.u32 1, %s4806_s25  }
  0x32   : > { %s3990_s19 = sshll.u32 %s4968_s14, 7  ;;  %s287_s1 = scalar_lea.sflag [#allocation4], %s4968_s14 }
  0x33   : > { %s4972_s13 = scalar_lea.vmem [#allocation3], %s3990_s19 }
  0x34   : > { %4789 = dma.done.wait (%p4893_p4), %s287_s1, 2048  }
  0x35   : > { %4791 = vsyncadd (%p4893_p4), %s287_s1, 4294965248 }
  0x36   : > { %4793 = dma.done.wait (%p45_p1), [#allocation7], 5120  }
  0x37   : > { %4795 = vsyncadd (%p45_p1), [#allocation7], 4294962176  ;;  %v4247_v0 = vld [vmem:[#allocation6 + $0x38] sm:$0xff]  ;;  %v4246_v1 = vld [vmem:[#allocation6 + $0x30] sm:$0xff]  ;;  %v4820_v25 = vmov -3.4028235e+38  }
  0x38   : > { %524 = vmatpush.bf16.msra.mxu0 %v4247_v0  ;;  %4281 = vmatpush.bf16.msra.mxu1 %v4247_v0  ;;  %v4245_v2 = vld [vmem:[#allocation6 + $0x28] sm:$0xff]  ;;  %v4244_v3 = vld [vmem:[#allocation6 + $0x20] sm:$0xff]  ;;  %v4243_v4 = vld [vmem:[#allocation6 + $0x18] sm:$0xff]  ;;  %915 = vst [vmem:[#allocation2 + $0x30] sm:$0xff] %v4820_v25  ;;  %s3993_s17 = sshll.u32 %s4968_s14, 8  ;;  %s4280_s30 = sshll.u32 %s4884_s28, 8 }
  0x39   : > { %4282 = vmatpush.bf16.msra.mxu2 %v4247_v0  ;;  %4283 = vmatpush.bf16.msra.mxu3 %v4247_v0  ;;  %v4242_v5 = vld [vmem:[#allocation6 + $0x10] sm:$0xff]  ;;  %v4241_v6 = vld [vmem:[#allocation6 + $0x8] sm:$0xff]  ;;  %v4240_v7 = vld [vmem:[#allocation6] sm:$0xff]  ;;  %916 = vst [vmem:[#allocation2 + $0x38] sm:$0xff] %v4820_v25  ;;  %s6904_s11 = scalar_lea.vmem [#allocation9], %s3993_s17  ;;  %s3885_s21 = scalar_lea.hbm %s7222_s7, %s4280_s30 }
  0x3a   : > { %v4224_v8 = vld [vmem:[%s4972_s13] sm:$0xff]  ;;  %v4225_v12 = vld [vmem:[%s4972_s13 + $0x8] sm:$0xff]  ;;  %v4226_v16 = vld [vmem:[%s4972_s13 + $0x10] sm:$0xff]  ;;  %909 = vst [vmem:[#allocation2] sm:$0xff] %v4820_v25  ;;  %s3886_s29 = sshll.u32 %s6904_s11, 4  ;;  %s3888_s23 = sshll.u32 %s3885_s21, 4  ;;  %s3887_s29 = int_to_ptr.vmem [resolvable:$true] %s3886_s29  ;;  %s3889_s23 = int_to_ptr.hbm [resolvable:$true] %s3888_s23 }
  0x3b   : > { %v4228_v9 = vld [vmem:[%s4972_s13 + $0x20] sm:$0xff]  ;;  %v4229_v13 = vld [vmem:[%s4972_s13 + $0x28] sm:$0xff]  ;;  %v4230_v17 = vld [vmem:[%s4972_s13 + $0x30] sm:$0xff]  ;;  %910 = vst [vmem:[#allocation2 + $0x8] sm:$0xff] %v4820_v25  ;;  %s3874_s15 = scalar_lea.sflag [#allocation5], %s4968_s14  ;;  %s4758_s16 = sshra.s32 %s3889_s23, 4  ;;  %s4759_s16 = int_to_ptr.hbm [resolvable:$true] %s4758_s16 }
  0x3c   : > { %525 = vmatpush.bf16.msra.mxu0 %v4246_v1  ;;  %4284 = vmatpush.bf16.msra.mxu1 %v4246_v1  ;;  %v4232_v10 = vld [vmem:[%s4972_s13 + $0x40] sm:$0xff]  ;;  %v4233_v14 = vld [vmem:[%s4972_s13 + $0x48] sm:$0xff]  ;;  %v4234_v18 = vld [vmem:[%s4972_s13 + $0x50] sm:$0xff]  ;;  %911 = vst [vmem:[#allocation2 + $0x10] sm:$0xf] %v4820_v25  ;;  %s4760_s28 = scalar_lea.hbm %s4759_s16, 256  ;;  %p4765_p11 = scmp.lt.s32.totalorder %s4759_s16, %s7222_s7 }
  0x3d   : > { %4285 = vmatpush.bf16.msra.mxu2 %v4246_v1  ;;  %4286 = vmatpush.bf16.msra.mxu3 %v4246_v1  ;;  %v4236_v11 = vld [vmem:[%s4972_s13 + $0x60] sm:$0xff]  ;;  %v4237_v15 = vld [vmem:[%s4972_s13 + $0x68] sm:$0xff]  ;;  %v4238_v19 = vld [vmem:[%s4972_s13 + $0x70] sm:$0xff]  ;;  %912 = vst [vmem:[#allocation2 + $0x18] sm:$0xff] %v4820_v25  ;;  %p4761_p1 = scmp.ne.s32.totalorder %s4759_s16, %s4760_s28  ;;  %s4764_s19 = scalar_lea.hbm %s7222_s7, 512 }
  0x3e   : > { %v4227_v20 = vld [vmem:[%s4972_s13 + $0x18] sm:$0xff]  ;;  %v5004_v26 = vld [vmem:[%s7217_s2] ss:$0 sm:$0xff]  ;;  %v4254_v27 = vld [vmem:[#allocation8 + $0x30] sm:$0xff]  ;;  %913 = vst [vmem:[#allocation2 + $0x20] sm:$0xff] %v4820_v25  ;;  %p4766_p2 = scmp.lt.s32.totalorder %s4764_s19, %s4760_s28 }
  0x3f   : > { %v4231_v21 = vld [vmem:[%s4972_s13 + $0x38] sm:$0xff]  ;;  %v5011_v28 = vld [vmem:[%s7218_s3] ss:$0 sm:$0xff]  ;;  %914 = vst [vmem:[#allocation2 + $0x28] sm:$0xf] %v4820_v25  ;;  %v4253_v32 = vld [vmem:[#allocation8 + $0x28] sm:$0xff]  ;;  %p4762_p4 = pnand %p4761_p1, %p4935_p3 }
  0x40   : > { %526 = vmatpush.bf16.msra.mxu0 %v4245_v2  ;;  %4287 = vmatpush.bf16.msra.mxu1 %v4245_v2  ;;  %v4235_v22 = vld [vmem:[%s4972_s13 + $0x58] sm:$0xff]  ;;  %917 = vst [vmem:[#allocation2 + $0x40] sm:$0xf] %v4820_v25  ;;  %v4252_v35 = vld [vmem:[#allocation8 + $0x20] sm:$0xff]  ;;  %v4250_v49 = vld [vmem:[#allocation8 + $0x10] sm:$0xff]  ;;  %p4767_p9 = por %p4766_p2, %p4765_p11 }
  0x41   : > { %4288 = vmatpush.bf16.msra.mxu2 %v4245_v2  ;;  %4289 = vmatpush.bf16.msra.mxu3 %v4245_v2  ;;  %v4239_v23 = vld [vmem:[%s4972_s13 + $0x78] sm:$0xff]  ;;  %918 = vst [vmem:[#allocation2 + $0x48] sm:$0xff] %v4820_v25  ;;  %v4249_v60 = vld [vmem:[#allocation8 + $0x8] sm:$0xff]  ;;  %p4763_p8 = pneg %p4762_p4 }
  0x42   : > { %v4255_v24 = vld [vmem:[#allocation8 + $0x38] sm:$0xff]  ;;  %919 = vst [vmem:[#allocation2 + $0x50] sm:$0xff] %v4820_v25 }
  0x43   : > { %920 = vst [vmem:[#allocation2 + $0x58] sm:$0xf] %v4820_v25  ;;  %v4251_v43 = vld [vmem:[#allocation8 + $0x18] sm:$0xff]  ;;  %p4768_p10 = pnand %p4767_p9, %p4763_p8 }
  0x44   : > { %527 = vmatpush.bf16.msra.mxu0 %v4244_v3  ;;  %4290 = vmatpush.bf16.msra.mxu1 %v4244_v3  ;;  %921 = vst [vmem:[#allocation2 + $0x60] sm:$0xff] %v4820_v25 }
  0x45   : > { %4291 = vmatpush.bf16.msra.mxu2 %v4244_v3  ;;  %4292 = vmatpush.bf16.msra.mxu3 %v4244_v3  ;;  %922 = vst [vmem:[#allocation2 + $0x68] sm:$0xff] %v4820_v25 }
  0x46   : > { %923 = vst [vmem:[#allocation2 + $0x70] sm:$0xf] %v4820_v25 }
  0x47   : > { %924 = vst [vmem:[#allocation2 + $0x78] sm:$0xff] %v4820_v25 }
  0x48   : > { %528 = vmatpush.bf16.msra.mxu0 %v4243_v4  ;;  %4293 = vmatpush.bf16.msra.mxu1 %v4243_v4  ;;  %925 = vst [vmem:[#allocation2 + $0x80] sm:$0xff] %v4820_v25 }
  0x49   : > { %4294 = vmatpush.bf16.msra.mxu2 %v4243_v4  ;;  %4295 = vmatpush.bf16.msra.mxu3 %v4243_v4  ;;  %926 = vst [vmem:[#allocation2 + $0x88] sm:$0xf] %v4820_v25  ;;  %v4248_v4 = vld [vmem:[#allocation8] sm:$0xff] }
  0x4a   : > { %927 = vst [vmem:[#allocation2 + $0x90] sm:$0xff] %v4820_v25 }
  0x4b   : > { %928 = vst [vmem:[#allocation2 + $0x98] sm:$0xff] %v4820_v25 }
  0x4c   : > { %529 = vmatpush.bf16.msra.mxu0 %v4242_v5  ;;  %4296 = vmatpush.bf16.msra.mxu1 %v4242_v5  ;;  %929 = vst [vmem:[#allocation2 + $0xa0] sm:$0xf] %v4820_v25 }
  0x4d   : > { %4297 = vmatpush.bf16.msra.mxu2 %v4242_v5  ;;  %4298 = vmatpush.bf16.msra.mxu3 %v4242_v5  ;;  %930 = vst [vmem:[#allocation2 + $0xa8] sm:$0xff] %v4820_v25 }
  0x4e   : > { %931 = vst [vmem:[#allocation2 + $0xb0] sm:$0xff] %v4820_v25 }
  0x4f   : > { %932 = vst [vmem:[#allocation2 + $0xb8] sm:$0xf] %v4820_v25 }
  0x50   : > { %530 = vmatpush.bf16.msra.mxu0 %v4241_v6  ;;  %4299 = vmatpush.bf16.msra.mxu1 %v4241_v6  ;;  %933 = vst [vmem:[#allocation2 + $0xc0] sm:$0xff] %v4820_v25 }
  0x51   : > { %4300 = vmatpush.bf16.msra.mxu2 %v4241_v6  ;;  %4301 = vmatpush.bf16.msra.mxu3 %v4241_v6  ;;  %934 = vst [vmem:[#allocation2 + $0xc8] sm:$0xff] %v4820_v25 }
  0x52   : > { %935 = vst [vmem:[#allocation2 + $0xd0] sm:$0xf] %v4820_v25 }
  0x53   : > { %936 = vst [vmem:[#allocation2 + $0xd8] sm:$0xff] %v4820_v25 }
  0x54   : > { %531 = vmatpush.bf16.msra.mxu0 %v4240_v7  ;;  %4302 = vmatpush.bf16.msra.mxu1 %v4240_v7  ;;  %937 = vst [vmem:[#allocation2 + $0xe0] sm:$0xff] %v4820_v25 }
  0x55   : > { %4303 = vmatpush.bf16.msra.mxu2 %v4240_v7  ;;  %4304 = vmatpush.bf16.msra.mxu3 %v4240_v7  ;;  %938 = vst [vmem:[#allocation2 + $0xe8] sm:$0xf] %v4820_v25 }
  0x56   : > { %939 = vst [vmem:[#allocation2 + $0xf0] sm:$0xff] %v4820_v25 }
  0x57   : > { %532 = vmatmul.bf16.vlgmr.msra.gmra.mxu0 %v4224_v8  ;;  %552 = vmatmul.bf16.vlgmr.msra.gmra.mxu1 %v4228_v9  ;;  %940 = vst [vmem:[#allocation2 + $0xf8] sm:$0xff] %v4820_v25 }
  0x58   : > { %572 = vmatmul.bf16.vlgmr.msra.gmra.mxu2 %v4232_v10  ;;  %592 = vmatmul.bf16.vlgmr.msra.gmra.mxu3 %v4236_v11  ;;  %941 = vst [vmem:[#allocation2 + $0x100] sm:$0xf] %v4820_v25 }
  0x59   : > { %1820 = vmatpush.bf16.msrb.mxu2 %v4255_v24  ;;  %942 = vst [vmem:[#allocation2 + $0x108] sm:$0xff] %v4820_v25 }
  0x5a   : > { %943 = vst [vmem:[#allocation2 + $0x110] sm:$0xff] %v4820_v25 }
  0x5b   : > { %944 = vst [vmem:[#allocation2 + $0x118] sm:$0xf] %v4820_v25 }
  0x5c   : > { %945 = vst [vmem:[#allocation2 + $0x120] sm:$0xff] %v4820_v25 }
  0x5d   : > { %1821 = vmatpush.bf16.msrb.mxu2 %v4254_v27  ;;  %946 = vst [vmem:[#allocation2 + $0x128] sm:$0xff] %v4820_v25 }
  0x5e   : > { %947 = vst [vmem:[#allocation2 + $0x130] sm:$0xf] %v4820_v25 }
  0x5f   : > { %948 = vst [vmem:[#allocation2 + $0x138] sm:$0xff] %v4820_v25 }
  0x60   : > { %949 = vst [vmem:[#allocation2 + $0x140] sm:$0xff] %v4820_v25 }
  0x61   : > { %1822 = vmatpush.bf16.msrb.mxu2 %v4253_v32  ;;  %950 = vst [vmem:[#allocation2 + $0x148] sm:$0xf] %v4820_v25 }
  0x62   : > { %951 = vst [vmem:[#allocation2 + $0x150] sm:$0xff] %v4820_v25 }
  0x63   : > { %952 = vst [vmem:[#allocation2 + $0x158] sm:$0xff] %v4820_v25 }
  0x64   : > { %953 = vst [vmem:[#allocation2 + $0x160] sm:$0xf] %v4820_v25 }
  0x65   : > { %1823 = vmatpush.bf16.msrb.mxu2 %v4252_v35  ;;  %954 = vst [vmem:[#allocation2 + $0x168] sm:$0xff] %v4820_v25 }
  0x66   : > { %955 = vst [vmem:[#allocation2 + $0x170] sm:$0xff] %v4820_v25 }
  0x67   : > { %537 = vmatmul.bf16.gmra.mxu0 %v4225_v12  ;;  %557 = vmatmul.bf16.gmra.mxu1 %v4229_v13  ;;  %956 = vst [vmem:[#allocation2 + $0x178] sm:$0xf] %v4820_v25 }
  0x68   : > { %577 = vmatmul.bf16.gmra.mxu2 %v4233_v14  ;;  %597 = vmatmul.bf16.gmra.mxu3 %v4237_v15  ;;  %957 = vst [vmem:[#allocation2 + $0x180] sm:$0xff] %v4820_v25 }
  0x69   : > { %1824 = vmatpush.bf16.msrb.mxu2 %v4251_v43  ;;  %958 = vst [vmem:[#allocation2 + $0x188] sm:$0xff] %v4820_v25 }
  0x6a   : > { %959 = vst [vmem:[#allocation2 + $0x190] sm:$0xf] %v4820_v25 }
  0x6b   : > { %960 = vst [vmem:[#allocation2 + $0x198] sm:$0xff] %v4820_v25 }
  0x6c   : > { %961 = vst [vmem:[#allocation2 + $0x1a0] sm:$0xff] %v4820_v25 }
  0x6d   : > { %1825 = vmatpush.bf16.msrb.mxu2 %v4250_v49  ;;  %962 = vst [vmem:[#allocation2 + $0x1a8] sm:$0xf] %v4820_v25 }
  0x6e   : > { %963 = vst [vmem:[#allocation2 + $0x1b0] sm:$0xff] %v4820_v25 }
  0x6f   : > { %964 = vst [vmem:[#allocation2 + $0x1b8] sm:$0xff] %v4820_v25 }
  0x70   : > { %965 = vst [vmem:[#allocation2 + $0x1c0] sm:$0xf] %v4820_v25 }
  0x71   : > { %1826 = vmatpush.bf16.msrb.mxu2 %v4249_v60  ;;  %966 = vst [vmem:[#allocation2 + $0x1c8] sm:$0xff] %v4820_v25 }
  0x72   : > { %967 = vst [vmem:[#allocation2 + $0x1d0] sm:$0xff] %v4820_v25 }
  0x73   : > { %968 = vst [vmem:[#allocation2 + $0x1d8] sm:$0xf] %v4820_v25 }
  0x75   : > { %1827 = vmatpush.bf16.msrb.mxu2 %v4248_v4 }
  0x77   : > { %542 = vmatmul.bf16.gmra.mxu0 %v4226_v16  ;;  %562 = vmatmul.bf16.gmra.mxu1 %v4230_v17 }
  0x78   : > { %582 = vmatmul.bf16.gmra.mxu2 %v4234_v18  ;;  %602 = vmatmul.bf16.gmra.mxu3 %v4238_v19 }
  0x87   : > { %547 = vmatmul.bf16.gmra.mxu0 %v4227_v20  ;;  %567 = vmatmul.bf16.gmra.mxu1 %v4231_v21 }
  0x88   : > { %587 = vmatmul.bf16.gmra.mxu2 %v4235_v22  ;;  %607 = vmatmul.bf16.gmra.mxu3 %v4239_v23 }
  0xd4   : > { %v533_v29 = vpop.f32.mrf.mxu0  ;;  %v553_v30 = vpop.f32.mrf.mxu1 }
  0xd5   : > { %v617_v31 = vmul.f32 %v5004_v26, %v533_v29  ;;  %v625_v37 = vmul.f32 %v5004_v26, %v553_v30 }
  0xd7   : > { %v5019_v33 = vadd.f32 %v5011_v28, %v617_v31  ;;  %v5035_v44 = vadd.f32 %v5011_v28, %v625_v37 }
  0xd9   : > { %v685_v34 = vsub.f32 0.0, %v5019_v33  ;;  %7299 = vst [vmem:[#allocation13_spill] sm:$0xff] %v5035_v44  ;;  %v693_v51 = vsub.f32 0.0, %v5035_v44  ;;  %v1238_v44 = vld [vmem:[#allocation2 + $0x1b3] sm:$0xff] }
  0xdb   : > { %v717_v36 = vmul.f32 1.442695, %v685_v34  ;;  %v573_v38 = vpop.f32.mrf.mxu2  ;;  %v5040_v46 = vpop.f32.mrf.mxu3  ;;  %v733_v61 = vmul.f32 1.442695, %v693_v51 }
  0xdc   : > { %v535_v39 = vpop.f32.mrf.mxu0  ;;  %v555_v40 = vpop.f32.mrf.mxu1  ;;  %v633_v5 = vmul.f32 %v5004_v26, %v573_v38 }
  0xdd   : > { %4381 = vpow2.f32 %v717_v36  ;;  %v618_v41 = vmul.f32 %v5004_v26, %v535_v39  ;;  %v626_v42 = vmul.f32 %v5004_v26, %v555_v40 }
  0xde   : > { %v5079_v10 = vadd.f32 %v5011_v28, %v633_v5 }
  0xdf   : > { %v5038_v45 = vadd.f32 %v5011_v28, %v618_v41  ;;  %v5044_v47 = vadd.f32 %v5011_v28, %v626_v42 }
  0xe0   : > { %v701_v18 = vsub.f32 0.0, %v5079_v10 }
  0xe1   : > { %7300 = vst [vmem:[#allocation14_spill] sm:$0xff] %v5044_v47  ;;  %v686_v48 = vsub.f32 0.0, %v5038_v45  ;;  %v694_v55 = vsub.f32 0.0, %v5044_v47 }
  0xe2   : > { %v749_v21 = vmul.f32 1.442695, %v701_v18 }
  0xe3   : > { %v4382_v50 = vpop.eup %4381  ;;  %v719_v52 = vmul.f32 1.442695, %v686_v48  ;;  %v5051_v53 = vpop.f32.mrf.mxu2  ;;  %v735_v0 = vmul.f32 1.442695, %v694_v55 }
  0xe4   : > { %v781_v54 = vadd.f32 1.0, %v4382_v50  ;;  %v538_v56 = vpop.f32.mrf.mxu0  ;;  %v558_v57 = vpop.f32.mrf.mxu1  ;;  %v634_v38 = vmul.f32 %v5004_v26, %v5051_v53 }
  0xe5   : > { %4383 = vpow2.f32 %v719_v52  ;;  %v619_v58 = vmul.f32 %v5004_v26, %v538_v56  ;;  %v627_v59 = vmul.f32 %v5004_v26, %v558_v57  ;;  %v5070_v3 = vpop.f32.mrf.mxu3 }
  0xe6   : > { %4385 = vrcp.f32 %v781_v54  ;;  %v5115_v48 = vadd.f32 %v5011_v28, %v634_v38 }
  0xe7   : > { %v5061_v62 = vadd.f32 %v5011_v28, %v619_v58  ;;  %v5064_v63 = vadd.f32 %v5011_v28, %v627_v59  ;;  %4387 = vpow2.f32 %v733_v61 }
  0xe8   : > { %4389 = vpow2.f32 %v735_v0  ;;  %v702_v53 = vsub.f32 0.0, %v5115_v48 }
  0xe9   : > { %7301 = vst [vmem:[#allocation15_spill] sm:$0xff] %v5064_v63  ;;  %v687_v1 = vsub.f32 0.0, %v5061_v62  ;;  %v695_v2 = vsub.f32 0.0, %v5064_v63  ;;  %v1080_v63 = vld [vmem:[#allocation2 + $0x1c9] sm:$0xff] }
  0xea   : > { %v751_v57 = vmul.f32 1.442695, %v702_v53 }
  0xeb   : > { %v4384_v6 = vpop.eup %4383  ;;  %v721_v7 = vmul.f32 1.442695, %v687_v1  ;;  %v5075_v8 = vpop.f32.mrf.mxu2  ;;  %v737_v15 = vmul.f32 1.442695, %v695_v2  ;;  %v641_v2 = vmul.f32 %v5004_v26, %v5040_v46 }
  0xec   : > { %v4386_v9 = vpop.eup %4385  ;;  %v782_v11 = vadd.f32 1.0, %v4384_v6  ;;  %v540_v12 = vpop.f32.mrf.mxu0 }
  0xed   : > { %v560_v13 = vpop.f32.mrf.mxu1  ;;  %v845_v14 = vmul.f32 %v4386_v9, %v5019_v33  ;;  %v620_v16 = vmul.f32 %v5004_v26, %v540_v12  ;;  %v4388_v22 = vpop.eup %4387 }
  0xee   : > { %v628_v17 = vmul.f32 %v5004_v26, %v560_v13  ;;  %4391 = vrcp.f32 %v782_v11  ;;  %v4390_v27 = vpop.eup %4389  ;;  %v5101_v32 = vpop.f32.mrf.mxu3  ;;  %v789_v40 = vadd.f32 1.0, %v4388_v22  ;;  %v5141_v11 = vadd.f32 %v5011_v28, %v641_v2 }
  0xef   : > { %970 = vst [vmem:[#allocation2 + $0x32] sm:$0xff] %v845_v14  ;;  %4393 = vpow2.f32 %v721_v7  ;;  %v5088_v19 = vadd.f32 %v5011_v28, %v620_v16  ;;  %v790_v41 = vadd.f32 1.0, %v4390_v27  ;;  %v5153_v16 = vld [vmem:[#allocation2 + $0x19] sm:$0xff] }
  0xf0   : > { %v5091_v20 = vadd.f32 %v5011_v28, %v628_v17  ;;  %4395 = vpow2.f32 %v737_v15  ;;  %v5151_v15 = vld [vmem:[#allocation2 + $0x1] sm:$0xff]  ;;  %v709_v18 = vsub.f32 0.0, %v5141_v11 }
  0xf1   : > { %v688_v23 = vsub.f32 0.0, %v5088_v19  ;;  %4397 = vpow2.f32 %v749_v21 }
  0xf2   : > { %7302 = vst [vmem:[#allocation16_spill] sm:$0xff] %v5091_v20  ;;  %v696_v24 = vsub.f32 0.0, %v5091_v20  ;;  %v1079_v20 = vld [vmem:[#allocation2 + $0x1b9] sm:$0xff] }
  0xf3   : > { %v723_v29 = vmul.f32 1.442695, %v688_v23  ;;  %v5099_v31 = vpop.f32.mrf.mxu2 }
  0xf4   : > { %v739_v30 = vmul.f32 1.442695, %v696_v24  ;;  %v4392_v33 = vpop.eup %4391  ;;  %v543_v34 = vpop.f32.mrf.mxu0  ;;  %v636_v24 = vmul.f32 %v5004_v26, %v5099_v31  ;;  %v642_v31 = vmul.f32 %v5004_v26, %v5070_v3 }
  0xf5   : > { %v563_v35 = vpop.f32.mrf.mxu1  ;;  %v4394_v36 = vpop.eup %4393  ;;  %v5106_v37 = vmul.f32 %v4392_v33, %v5038_v45  ;;  %4399 = vpow2.f32 %v723_v29  ;;  %v621_v39 = vmul.f32 %v5004_v26, %v543_v34  ;;  %v4263_v33 = vld [vmem:[#allocation8 + $0x78] sm:$0xff] }
  0xf6   : > { %v629_v42 = vmul.f32 %v5004_v26, %v563_v35  ;;  %v4396_v43 = vpop.eup %4395  ;;  %4401 = vpow2.f32 %v739_v30  ;;  %v783_v51 = vadd.f32 1.0, %v4394_v36  ;;  %v5135_v5 = vpop.f32.mrf.mxu3  ;;  %v765_v30 = vmul.f32 1.442695, %v709_v18  ;;  %1683 = vmatpush.bf16.msrb.mxu1 %v4263_v33  ;;  %v5220_v18 = vld [vmem:[#allocation2 + $0x9] sm:$0xff] }
  0xf7   : > { %v5118_v45 = vadd.f32 %v5011_v28, %v621_v39  ;;  %v877_v49 = vpack.c.bf16 %v5106_v37, %v845_v14  ;;  %v4398_v50 = vpop.eup %4397  ;;  %4403 = vrcp.f32 %v789_v40  ;;  %v791_v58 = vadd.f32 1.0, %v4396_v43  ;;  %971 = vst [vmem:[#allocation2 + $0x3a] sm:$0xff] %v5106_v37 }
  0xf8   : > { %v5123_v52 = vadd.f32 %v5011_v28, %v629_v42  ;;  %v797_v55 = vadd.f32 1.0, %v4398_v50  ;;  %4405 = vrcp.f32 %v790_v41  ;;  %v635_v14 = vmul.f32 %v5004_v26, %v5075_v8 }
  0xf9   : > { %v689_v54 = vsub.f32 0.0, %v5118_v45  ;;  %1828 = vmatmul.bf16.vlgmr.msrb.gmra.mxu2 %v877_v49  ;;  %4407 = vrcp.f32 %v783_v51  ;;  %v5176_v40 = vadd.f32 %v5011_v28, %v636_v24  ;;  %v5191_v53 = vadd.f32 %v5011_v28, %v642_v31 }
  0xfa   : > { %7303 = vst [vmem:[#allocation17_spill] sm:$0xff] %v5123_v52  ;;  %v697_v59 = vsub.f32 0.0, %v5123_v52  ;;  %4409 = vpow2.f32 %v751_v57  ;;  %v5163_v8 = vadd.f32 %v5011_v28, %v635_v14  ;;  %v643_v57 = vmul.f32 %v5004_v26, %v5101_v32 }
  0xfb   : > { %v4400_v56 = vpop.eup %4399  ;;  %v583_v60 = vpop.f32.mrf.mxu2  ;;  %v725_v4 = vmul.f32 1.442695, %v689_v54  ;;  %4411 = vrcp.f32 %v797_v55  ;;  %v704_v54 = vsub.f32 0.0, %v5176_v40 }
  0xfc   : > { %v784_v61 = vadd.f32 1.0, %v4400_v56  ;;  %v545_v0 = vpop.f32.mrf.mxu0  ;;  %v4402_v1 = vpop.eup %4401  ;;  %4413 = vrcp.f32 %v791_v58  ;;  %v741_v12 = vmul.f32 1.442695, %v697_v59  ;;  %v637_v27 = vmul.f32 %v5004_v26, %v583_v60 }
  0xfd   : > { %v622_v6 = vmul.f32 %v5004_v26, %v545_v0  ;;  %v792_v7 = vadd.f32 1.0, %v4402_v1  ;;  %v565_v9 = vpop.f32.mrf.mxu1  ;;  %v5146_v46 = vpop.eup %4403  ;;  %v703_v39 = vsub.f32 0.0, %v5163_v8  ;;  %v710_v1 = vsub.f32 0.0, %v5191_v53 }
  0xfe   : > { %7304 = vst [vmem:[#allocation18_spill] sm:$0xff] %v5146_v46  ;;  %4415 = vrcp.f32 %v784_v61  ;;  %v5155_v17 = vpop.eup %4405  ;;  %v630_v22 = vmul.f32 %v5004_v26, %v565_v9  ;;  %v5182_v42 = vadd.f32 %v5011_v28, %v637_v27  ;;  %v603_v60 = vpop.f32.mrf.mxu3  ;;  %v4262_v61 = vld [vmem:[#allocation8 + $0x70] sm:$0xff]  ;;  %v755_v2 = vmul.f32 1.442695, %v704_v54  ;;  %v4261_v27 = vld [vmem:[#allocation8 + $0x68] sm:$0xff]  ;;  %v1159_v46 = vld [vmem:[#allocation2 + $0x1ba] sm:$0xff] }
  0xff   : > { %v5144_v13 = vadd.f32 %v5011_v28, %v622_v6  ;;  %7305 = vst [vmem:[#allocation19_spill] sm:$0xff] %v5155_v17  ;;  %4417 = vpow2.f32 %v725_v4  ;;  %v4408_v23 = vpop.eup %4407  ;;  %v753_v3 = vmul.f32 1.442695, %v703_v39  ;;  %v5213_v32 = vadd.f32 %v5011_v28, %v643_v57  ;;  %1684 = vmatpush.bf16.msrb.mxu1 %v4262_v61  ;;  %v4258_v54 = vld [vmem:[#allocation8 + $0x50] sm:$0xff] }
 0x100   : > { %4419 = vrcp.f32 %v792_v7  ;;  %v4410_v29 = vpop.eup %4409  ;;  %v5185_v49 = vadd.f32 %v5011_v28, %v630_v22  ;;  %v705_v58 = vsub.f32 0.0, %v5182_v42  ;;  %v645_v14 = vmul.f32 %v5004_v26, %v603_v60  ;;  %v1081_v17 = vld [vmem:[#allocation2 + $0x1d1] sm:$0xff] }
 0x101   : > { %v690_v21 = vsub.f32 0.0, %v5144_v13  ;;  %4421 = vpow2.f32 %v741_v12  ;;  %v4412_v36 = vpop.eup %4411  ;;  %v798_v38 = vadd.f32 1.0, %v4410_v29  ;;  %v767_v12 = vmul.f32 1.442695, %v710_v1  ;;  %v5228_v29 = vld [vmem:[#allocation2 + $0x21] sm:$0xff] }
 0x102   : > { %v5178_v41 = vpop.eup %4413  ;;  %4423 = vpow2.f32 %v765_v30  ;;  %7307 = vst [vmem:[#allocation21_spill] sm:$0xff] %v5185_v49  ;;  %v5196_v56 = vmul.f32 %v4412_v36, %v5079_v10  ;;  %v5207_v10 = vmul.f32 %v4408_v23, %v5061_v62  ;;  %v757_v7 = vmul.f32 1.442695, %v705_v58 }
 0x103   : > { %7306 = vst [vmem:[#allocation20_spill] sm:$0xff] %v5178_v41  ;;  %v727_v43 = vmul.f32 1.442695, %v690_v21  ;;  %v585_v50 = vpop.f32.mrf.mxu2  ;;  %4425 = vrcp.f32 %v798_v38  ;;  %v698_v9 = vsub.f32 0.0, %v5185_v49  ;;  %v644_v62 = vmul.f32 %v5004_v26, %v5135_v5  ;;  %1685 = vmatpush.bf16.msrb.mxu1 %v4261_v27 }
 0x104   : > { %v5187_v51 = vpop.eup %4415  ;;  %v638_v59 = vmul.f32 %v5004_v26, %v585_v50  ;;  %4427 = vpow2.f32 %v753_v3  ;;  %v548_v4 = vpop.f32.mrf.mxu0  ;;  %986 = vst [vmem:[#allocation2 + $0xf2] sm:$0xff] %v5196_v56  ;;  %v711_v22 = vsub.f32 0.0, %v5213_v32  ;;  %v5235_v36 = vadd.f32 %v5011_v28, %v645_v14 }
 0x105   : > { %v4418_v55 = vpop.eup %4417  ;;  %4429 = vpow2.f32 %v727_v43  ;;  %v623_v25 = vmul.f32 %v5004_v26, %v548_v4  ;;  %v5232_v33 = vadd.f32 %v5011_v28, %v644_v62  ;;  %972 = vst [vmem:[#allocation2 + $0x4a] sm:$0xff] %v5207_v10  ;;  %v743_v50 = vmul.f32 1.442695, %v698_v9  ;;  %v568_v3 = vpop.f32.mrf.mxu1 }
 0x106   : > { %v5202_v0 = vpop.eup %4419  ;;  %4431 = vpow2.f32 %v755_v2  ;;  %v785_v23 = vadd.f32 1.0, %v4418_v55  ;;  %v5225_v24 = vadd.f32 %v5011_v28, %v638_v59  ;;  %v769_v39 = vmul.f32 1.442695, %v711_v22 }
 0x107   : > { %7308 = vst [vmem:[#allocation22_spill] sm:$0xff] %v5202_v0  ;;  %v5209_v6 = vpop.eup %4421  ;;  %4433 = vpow2.f32 %v767_v12  ;;  %v712_v37 = vsub.f32 0.0, %v5232_v33  ;;  %v5247_v58 = vadd.f32 %v5011_v28, %v623_v25  ;;  %v713_v1 = vsub.f32 0.0, %v5235_v36  ;;  %v605_v12 = vpop.f32.mrf.mxu3 }
 0x108   : > { %v4424_v21 = vpop.eup %4423  ;;  %4435 = vpow2.f32 %v757_v7  ;;  %v706_v57 = vsub.f32 0.0, %v5225_v24  ;;  %v5252_v2 = vmul.f32 %v5187_v51, %v5088_v19  ;;  %v631_v9 = vmul.f32 %v5004_v26, %v568_v3 }
 0x109   : > { %v4426_v30 = vpop.eup %4425  ;;  %v805_v5 = vadd.f32 1.0, %v4424_v21  ;;  %v771_v61 = vmul.f32 1.442695, %v712_v37  ;;  %v691_v7 = vsub.f32 0.0, %v5247_v58  ;;  %v646_v22 = vmul.f32 %v5004_v26, %v605_v12 }
 0x10a   : > { %v5238_v38 = vmul.f32 %v4426_v30, %v5115_v48  ;;  %v4428_v43 = vpop.eup %4427  ;;  %v878_v14 = vpack.c.bf16 %v5252_v2, %v5207_v10  ;;  %973 = vst [vmem:[#allocation2 + $0x52] sm:$0xff] %v5252_v2  ;;  %v759_v25 = vmul.f32 1.442695, %v706_v57  ;;  %v4260_v30 = vld [vmem:[#allocation8 + $0x60] sm:$0xff]  ;;  %v773_v3 = vmul.f32 1.442695, %v713_v1 }
 0x10b   : > { %4437 = vrcp.f32 %v805_v5  ;;  %v4430_v55 = vpop.eup %4429  ;;  %v799_v48 = vadd.f32 1.0, %v4428_v43  ;;  %v588_v59 = vpop.f32.mrf.mxu2  ;;  %v1062_v43 = vld [vmem:[#allocation2 + $0xf1] sm:$0xff]  ;;  %v5273_v57 = vadd.f32 %v5011_v28, %v646_v22  ;;  %1686 = vmatpush.bf16.msrb.mxu1 %v4260_v30 }
 0x10c   : > { %987 = vst [vmem:[#allocation2 + $0xfa] sm:$0xff] %v5238_v38  ;;  %4439 = vpow2.f32 %v769_v39  ;;  %v4432_v60 = vpop.eup %4431  ;;  %v639_v21 = vmul.f32 %v5004_v26, %v588_v59  ;;  %v550_v27 = vpop.f32.mrf.mxu0  ;;  %v1022_v39 = vld [vmem:[#allocation2 + $0xf0] sm:$0xff]  ;;  %1833 = vmatmul.bf16.gmra.mxu2 %v878_v14 }
 0x10d   : > { %4441 = vrcp.f32 %v785_v23  ;;  %v800_v4 = vadd.f32 1.0, %v4432_v60  ;;  %v4434_v62 = vpop.eup %4433  ;;  %v5261_v23 = vadd.f32 1.0, %v4430_v55  ;;  %v5270_v55 = vadd.f32 %v5011_v28, %v631_v9  ;;  %v5280_v14 = vld [vmem:[#allocation2 + $0x31] sm:$0xff] }
 0x10e   : > { %4443 = vrcp.f32 %v799_v48  ;;  %v4436_v19 = vpop.eup %4435  ;;  %v806_v51 = vadd.f32 1.0, %v4434_v62  ;;  %v5264_v48 = vadd.f32 %v5011_v28, %v639_v21  ;;  %v729_v62 = vmul.f32 1.442695, %v691_v7 }
 0x10f   : > { %4445 = vpow2.f32 %v771_v61  ;;  %v801_v37 = vadd.f32 1.0, %v4436_v19  ;;  %7310 = vst [vmem:[#allocation24_spill] sm:$0xff] %v5270_v55  ;;  %v5275_v61 = vld [vmem:[#allocation2 + $0x30] sm:$0xff]  ;;  %v1102_v9 = vmax.f32 %v1022_v39, %v1062_v43  ;;  %v793_v39 = vadd.f32 1.0, %v5209_v6 }
 0x110   : > { %4447 = vrcp.f32 %v800_v4  ;;  %v707_v22 = vsub.f32 0.0, %v5264_v48 }
 0x111   : > { %v4438_v5 = vpop.eup %4437  ;;  %4449 = vpow2.f32 %v743_v50 }
 0x112   : > { %v4440_v59 = vpop.eup %4439  ;;  %v5267_v60 = vmul.f32 %v4438_v5, %v5141_v11  ;;  %4451 = vrcp.f32 %v806_v51  ;;  %v624_v11 = vmul.f32 %v5004_v26, %v550_v27  ;;  %v714_v5 = vsub.f32 0.0, %v5273_v57  ;;  %v4259_v27 = vld [vmem:[#allocation8 + $0x58] sm:$0xff] }
 0x113   : > { %v5277_v50 = vpop.eup %4441  ;;  %v1023_v1 = vld [vmem:[#allocation2 + $0xf8] sm:$0xff]  ;;  %v807_v12 = vadd.f32 1.0, %v4440_v59  ;;  %4453 = vrcp.f32 %v801_v37  ;;  %v590_v59 = vpop.f32.mrf.mxu2  ;;  %1687 = vmatpush.bf16.msrb.mxu1 %v4259_v27 }
 0x114   : > { %7309 = vst [vmem:[#allocation23_spill] sm:$0xff] %v5267_v60  ;;  %v1063_v4 = vld [vmem:[#allocation2 + $0xf9] sm:$0xff]  ;;  %v4444_v21 = vpop.eup %4443  ;;  %4455 = vpow2.f32 %v759_v25  ;;  %v5289_v7 = vadd.f32 %v5011_v28, %v624_v11  ;;  %v570_v11 = vpop.f32.mrf.mxu1 }
 0x115   : > { %v1103_v19 = vmax.f32 %v1023_v1, %v1063_v4  ;;  %994 = vst [vmem:[#allocation2 + $0x152] sm:$0xff] %v5267_v60  ;;  %v4446_v51 = vpop.eup %4445  ;;  %v5285_v30 = vmul.f32 %v4444_v21, %v5163_v8  ;;  %4457 = vrcp.f32 %v807_v12  ;;  %v699_v4 = vsub.f32 0.0, %v5270_v55  ;;  %v608_v25 = vpop.f32.mrf.mxu3  ;;  %v1303_v55 = vld [vmem:[#allocation2 + $0xfc] sm:$0xff] }
 0x116   : > { %v4448_v37 = vpop.eup %4447  ;;  %v808_v43 = vadd.f32 1.0, %v4446_v51  ;;  %4459 = vpow2.f32 %v773_v3  ;;  %v761_v12 = vmul.f32 1.442695, %v707_v22  ;;  %v1182_v3 = vmax.f32 %v1102_v9, %v5196_v56  ;;  %v1223_v9 = vld [vmem:[#allocation2 + $0xfb] sm:$0xff] }
 0x117   : > { %v5294_v1 = vpop.eup %4449  ;;  %988 = vst [vmem:[#allocation2 + $0x10a] sm:$0xff] %v5285_v30  ;;  %v5298_v8 = vmul.f32 %v4448_v37, %v5176_v40  ;;  %4461 = vpow2.f32 %v729_v62  ;;  %v775_v21 = vmul.f32 1.442695, %v714_v5  ;;  %v692_v51 = vsub.f32 0.0, %v5289_v7  ;;  %v1222_v40 = vld [vmem:[#allocation2 + $0xf3] sm:$0xff]  ;;  %1688 = vmatpush.bf16.msrb.mxu1 %v4258_v54 }
 0x118   : > { %v4452_v6 = vpop.eup %4451  ;;  %4463 = vrcp.f32 %v808_v43  ;;  %v1183_v31 = vmax.f32 %v1103_v19, %v5238_v38  ;;  %v640_v22 = vmul.f32 %v5004_v26, %v590_v59  ;;  %v632_v37 = vmul.f32 %v5004_v26, %v570_v11  ;;  %v4257_v11 = vld [vmem:[#allocation8 + $0x48] sm:$0xff] }
 0x119   : > { %v4454_v35 = vpop.eup %4453  ;;  %v5305_v62 = vmul.f32 %v4452_v6, %v5191_v53  ;;  %989 = vst [vmem:[#allocation2 + $0x112] sm:$0xff] %v5298_v8  ;;  %4465 = vrcp.f32 %v5261_v23  ;;  %v731_v27 = vmul.f32 1.442695, %v692_v51  ;;  %v745_v6 = vmul.f32 1.442695, %v699_v4 }
 0x11a   : > { %v4456_v56 = vpop.eup %4455  ;;  %4467 = vrcp.f32 %v793_v39  ;;  %v5311_v5 = vmul.f32 %v4454_v35, %v5182_v42  ;;  %v5316_v23 = vadd.f32 %v5011_v28, %v640_v22  ;;  %v1262_v39 = vmax.f32 %v1182_v3, %v1222_v40 }
 0x11b   : > { %7311 = vst [vmem:[#allocation25_spill] sm:$0xff] %v5305_v62  ;;  %v4458_v38 = vpop.eup %4457  ;;  %v802_v53 = vadd.f32 1.0, %v4456_v56  ;;  %4469 = vpow2.f32 %v761_v12  ;;  %v647_v42 = vmul.f32 %v5004_v26, %v608_v25  ;;  %v1263_v34 = vmax.f32 %v1183_v31, %v1223_v9  ;;  %v1302_v56 = vld [vmem:[#allocation2 + $0xf4] sm:$0xff]  ;;  %1689 = vmatpush.bf16.msrb.mxu1 %v4257_v11 }
 0x11c   : > { %7312 = vst [vmem:[#allocation26_spill] sm:$0xff] %v5311_v5  ;;  %v1030_v19 = vld [vmem:[#allocation2 + $0x150] sm:$0xff]  ;;  %v4460_v59 = vpop.eup %4459  ;;  %v5319_v35 = vmul.f32 %v4458_v38, %v5213_v32  ;;  %4471 = vpow2.f32 %v775_v21  ;;  %v5325_v3 = vadd.f32 %v5011_v28, %v632_v37  ;;  %v708_v25 = vsub.f32 0.0, %v5316_v23 }
 0x11d   : > { %v1070_v43 = vld [vmem:[#allocation2 + $0x151] sm:$0xff]  ;;  %995 = vst [vmem:[#allocation2 + $0x15a] sm:$0xff] %v5305_v62  ;;  %v4462_v51 = vpop.eup %4461  ;;  %4473 = vrcp.f32 %v802_v53  ;;  %v809_v12 = vadd.f32 1.0, %v4460_v59  ;;  %v5332_v9 = vadd.f32 %v5011_v28, %v647_v42  ;;  %v794_v37 = vadd.f32 1.0, %v5294_v1 }
 0x11e   : > { %7313 = vst [vmem:[#allocation27_spill] sm:$0xff] %v5319_v35  ;;  %v1110_v4 = vmax.f32 %v1030_v19, %v1070_v43  ;;  %v4464_v22 = vpop.eup %4463  ;;  %v1024_v54 = vld [vmem:[#allocation2 + $0x108] sm:$0xff]  ;;  %v787_v32 = vadd.f32 1.0, %v4462_v51  ;;  %4475 = vpow2.f32 %v731_v27  ;;  %v5336_v19 = vmax.f32 %v1262_v39, %v1302_v56 }
 0x11f   : > { %990 = vst [vmem:[#allocation2 + $0x122] sm:$0xff] %v5311_v5  ;;  %v1064_v49 = vld [vmem:[#allocation2 + $0x109] sm:$0xff]  ;;  %v4466_v21 = vpop.eup %4465  ;;  %v5329_v31 = vmul.f32 %v4464_v22, %v5232_v33  ;;  %4477 = vrcp.f32 %v809_v12  ;;  %v5343_v53 = vmax.f32 %v1263_v34, %v1303_v55  ;;  %v610_v55 = vpop.f32.mrf.mxu3 }
 0x120   : > { %996 = vst [vmem:[#allocation2 + $0x16a] sm:$0xff] %v5319_v35  ;;  %v1104_v40 = vmax.f32 %v1024_v54, %v1064_v49  ;;  %v5334_v38 = vpop.eup %4467  ;;  %v1025_v27 = vld [vmem:[#allocation2 + $0x110] sm:$0xff]  ;;  %4479 = vpow2.f32 %v745_v6  ;;  %v5341_v49 = vmul.f32 %v5277_v50, %v5118_v45  ;;  %v5346_v59 = vmax.f32 %v1110_v4, %v5267_v60 }
 0x121   : > { %7314 = vst [vmem:[#allocation28_spill] sm:$0xff] %v5325_v3  ;;  %v1065_v43 = vld [vmem:[#allocation2 + $0x111] sm:$0xff]  ;;  %v4470_v33 = vpop.eup %4469  ;;  %4481 = vrcp.f32 %v787_v32  ;;  %v700_v50 = vsub.f32 0.0, %v5325_v3  ;;  %v5352_v34 = vmul.f32 %v4466_v21, %v5144_v13  ;;  %v648_v52 = vmul.f32 %v5004_v26, %v610_v55 }
 0x122   : > { %7315 = vst [vmem:[#allocation29_spill] sm:$0xff] %v5329_v31  ;;  %v1184_v42 = vmax.f32 %v1104_v40, %v5285_v30  ;;  %v1105_v11 = vmax.f32 %v1025_v27, %v1065_v43  ;;  %v1224_v39 = vld [vmem:[#allocation2 + $0x10b] sm:$0xff]  ;;  %v1225_v51 = vld [vmem:[#allocation2 + $0x113] sm:$0xff]  ;;  %v4472_v56 = vpop.eup %4471  ;;  %v803_v45 = vadd.f32 1.0, %v4470_v33  ;;  %v763_v40 = vmul.f32 1.442695, %v708_v25 }
 0x123   : > { %7316 = vst [vmem:[#allocation30_spill] sm:$0xff] %v5334_v38  ;;  %v4474_v30 = vpop.eup %4473  ;;  %v1304_v54 = vld [vmem:[#allocation2 + $0x10c] sm:$0xff]  ;;  %v715_v27 = vsub.f32 0.0, %v5332_v9  ;;  %v810_v13 = vadd.f32 1.0, %v4472_v56 }
 0x124   : > { %7317 = vst [vmem:[#allocation31_spill] sm:$0xff] %v5336_v19  ;;  %v1031_v1 = vld [vmem:[#allocation2 + $0x158] sm:$0xff]  ;;  %v1185_v22 = vmax.f32 %v1105_v11, %v5298_v8  ;;  %v4476_v43 = vpop.eup %4475  ;;  %v1264_v32 = vmax.f32 %v1184_v42, %v1224_v39  ;;  %v5358_v3 = vmul.f32 %v4474_v30, %v5225_v24  ;;  %4483 = vrcp.f32 %v803_v45  ;;  %v4256_v42 = vld [vmem:[#allocation8 + $0x40] sm:$0xff] }
 0x125   : > { %7318 = vst [vmem:[#allocation32_spill] sm:$0xff] %v5343_v53  ;;  %v1071_v6 = vld [vmem:[#allocation2 + $0x159] sm:$0xff]  ;;  %v4478_v21 = vpop.eup %4477  ;;  %4485 = vrcp.f32 %v810_v13  ;;  %1690 = vmatpush.bf16.msrb.mxu1 %v4256_v42 }
 0x126   : > { %997 = vst [vmem:[#allocation2 + $0x172] sm:$0xff] %v5329_v31  ;;  %v1230_v12 = vld [vmem:[#allocation2 + $0x153] sm:$0xff]  ;;  %v1111_v4 = vmax.f32 %v1031_v1, %v1071_v6  ;;  %v1231_v60 = vld [vmem:[#allocation2 + $0x15b] sm:$0xff]  ;;  %v1265_v25 = vmax.f32 %v1185_v22, %v1225_v51  ;;  %v5364_v39 = vpop.eup %4479  ;;  %v5368_v56 = vmul.f32 %v4478_v21, %v5235_v36  ;;  %4487 = vrcp.f32 %v794_v37 }
 0x127   : > { %7319 = vst [vmem:[#allocation33_spill] sm:$0xff] %v5352_v34  ;;  %v1026_v33 = vld [vmem:[#allocation2 + $0x120] sm:$0xff]  ;;  %v1270_v8 = vmax.f32 %v5346_v59, %v1230_v12  ;;  %v1032_v11 = vld [vmem:[#allocation2 + $0x168] sm:$0xff]  ;;  %v1310_v0 = vld [vmem:[#allocation2 + $0x154] sm:$0xff]  ;;  %v788_v59 = vadd.f32 1.0, %v4476_v43  ;;  %v4482_v26 = vpop.eup %4481  ;;  %4489 = vpow2.f32 %v763_v40  ;;  %v879_v21 = vpack.c.bf16 %v5352_v34, %v5341_v49 }
 0x128   : > { %974 = vst [vmem:[#allocation2 + $0x62] sm:$0xff] %v5341_v49  ;;  %v1066_v38 = vld [vmem:[#allocation2 + $0x121] sm:$0xff]  ;;  %v1191_v1 = vmax.f32 %v1111_v4, %v5305_v62  ;;  %v1072_v6 = vld [vmem:[#allocation2 + $0x169] sm:$0xff]  ;;  %v1305_v24 = vld [vmem:[#allocation2 + $0x114] sm:$0xff]  ;;  %v5370_v51 = vmul.f32 1.442695, %v700_v50  ;;  %v5372_v4 = vmax.f32 %v1264_v32, %v1304_v54  ;;  %v5388_v40 = vadd.f32 %v5011_v28, %v648_v52 }
 0x129   : > { %7320 = vst [vmem:[#allocation34_spill] sm:$0xff] %v5358_v3  ;;  %v1112_v30 = vmax.f32 %v1032_v11, %v1072_v6  ;;  %v1106_v45 = vmax.f32 %v1026_v33, %v1066_v38  ;;  %v777_v12 = vmul.f32 1.442695, %v715_v27  ;;  %v1311_v36 = vld [vmem:[#allocation2 + $0x15c] sm:$0xff]  ;;  %v5376_v13 = vmax.f32 %v1270_v8, %v1310_v0  ;;  %v5405_v28 = vld [vmem:[#allocation2 + $0x49] sm:$0xff]  ;;  %1838 = vmatmul.bf16.gmra.mxu2 %v879_v21 }
 0x12a   : > { %975 = vst [vmem:[#allocation2 + $0x6a] sm:$0xff] %v5352_v34  ;;  %v1271_v55 = vmax.f32 %v1191_v1, %v1231_v60  ;;  %v5378_v37 = vmax.f32 %v1265_v25, %v1305_v24  ;;  %v5383_v54 = vld [vmem:[#allocation2 + $0x38] sm:$0xff]  ;;  %v4484_v43 = vpop.eup %4483  ;;  %4491 = vrcp.f32 %v788_v59  ;;  %v5390_v1 = vld [vmem:[#allocation2 + $0x48] sm:$0xff] }
 0x12b   : > { %7321 = vst [vmem:[#allocation35_spill] sm:$0xff] %v5364_v39  ;;  %v1192_v22 = vmax.f32 %v1112_v30, %v5319_v35  ;;  %v5381_v50 = vmax.f32 %v1106_v45, %v5311_v5  ;;  %v4271_v0 = vld [vmem:[#allocation8 + $0xb8] sm:$0xff]  ;;  %v5400_v42 = vmul.f32 %v4484_v43, %v5264_v48  ;;  %4493 = vpow2.f32 %v777_v12  ;;  %v4486_v52 = vpop.eup %4485  ;;  %v4270_v48 = vld [vmem:[#allocation8 + $0xb0] sm:$0xff]  ;;  %v5426_v43 = vld [vmem:[#allocation2] sm:$0xff] }
 0x12c   : > { %991 = vst [vmem:[#allocation2 + $0x12a] sm:$0xff] %v5358_v3  ;;  %v5392_v8 = vld [vmem:[#allocation2 + $0x39] sm:$0xff]  ;;  %v1078_v24 = vld [vmem:[#allocation2 + $0x1b1] sm:$0xff]  ;;  %v5403_v30 = vmul.f32 %v4482_v26, %v5247_v58  ;;  %v5407_v45 = vmax.f32 %v1271_v55, %v1311_v36  ;;  %2622 = vmatpush.bf16.msrb.mxu3 %v4271_v0  ;;  %v5418_v58 = vpop.eup %4487  ;;  %v1119_v47 = vmax.f32 %v5426_v43, %v1079_v20 }
 0x12d   : > { %7322 = vst [vmem:[#allocation36_spill] sm:$0xff] %v5368_v56  ;;  %v1033_v11 = vld [vmem:[#allocation2 + $0x170] sm:$0xff]  ;;  %v4490_v59 = vpop.eup %4489 }
 0x12e   : > { %7323 = vst [vmem:[#allocation37_spill] sm:$0xff] %v5370_v51  ;;  %v1073_v38 = vld [vmem:[#allocation2 + $0x171] sm:$0xff]  ;;  %v804_v0 = vadd.f32 1.0, %v4490_v59 }
 0x12f   : > { %7324 = vst [vmem:[#allocation38_spill] sm:$0xff] %v5372_v4  ;;  %v1232_v33 = vld [vmem:[#allocation2 + $0x16b] sm:$0xff]  ;;  %v1113_v27 = vmax.f32 %v1033_v11, %v1073_v38  ;;  %v5397_v6 = vld [vmem:[#allocation2 + $0x173] sm:$0xff]  ;;  %v716_v11 = vsub.f32 0.0, %v5388_v40  ;;  %v5429_v21 = vld [vmem:[#allocation2 + $0x60] sm:$0xff] }
 0x130   : > { %998 = vst [vmem:[#allocation2 + $0x182] sm:$0xff] %v5368_v56  ;;  %v1312_v60 = vld [vmem:[#allocation2 + $0x16c] sm:$0xff]  ;;  %v1272_v32 = vmax.f32 %v1192_v22, %v1232_v33  ;;  %v1313_v55 = vld [vmem:[#allocation2 + $0x174] sm:$0xff]  ;;  %2623 = vmatpush.bf16.msrb.mxu3 %v4270_v48  ;;  %v1121_v48 = vmax.f32 %v5426_v43, %v1081_v17 }
 0x131   : > { %7325 = vst [vmem:[#allocation39_spill] sm:$0xff] %v5378_v37  ;;  %v5395_v25 = vmax.f32 %v1113_v27, %v5329_v31  ;;  %v5414_v12 = vld [vmem:[#allocation2 + $0x50] sm:$0xff] }
 0x132   : > { %7326 = vst [vmem:[#allocation40_spill] sm:$0xff] %v5388_v40  ;;  %v5411_v22 = vmax.f32 %v1272_v32, %v1312_v60  ;;  %v5416_v38 = vld [vmem:[#allocation2 + $0x51] sm:$0xff]  ;;  %v5424_v60 = vmul.f32 %v4486_v52, %v5273_v57  ;;  %v1118_v32 = vmax.f32 %v5426_v43, %v1078_v24  ;;  %v779_v57 = vmul.f32 1.442695, %v716_v11  ;;  %v5437_v52 = vld [vmem:[#allocation2 + $0x61] sm:$0xff] }
 0x133   : > { %7327 = vst [vmem:[#allocation41_spill] sm:$0xff] %v5400_v42  ;;  %v1027_v33 = vld [vmem:[#allocation2 + $0x128] sm:$0xff]  ;;  %v1273_v26 = vmax.f32 %v5395_v25, %v5397_v6  ;;  %v1158_v51 = vld [vmem:[#allocation2 + $0x1b2] sm:$0xff] }
 0x134   : > { %7328 = vst [vmem:[#allocation42_spill] sm:$0xff] %v5403_v30  ;;  %v1067_v36 = vld [vmem:[#allocation2 + $0x129] sm:$0xff]  ;;  %4495 = vpow2.f32 %v779_v57  ;;  %v1198_v11 = vmax.f32 %v1118_v32, %v1158_v51  ;;  %v5463_v57 = vld [vmem:[#allocation2 + $0x1bb] sm:$0xff] }
 0x135   : > { %7329 = vst [vmem:[#allocation43_spill] sm:$0xff] %v5418_v58  ;;  %v1226_v27 = vld [vmem:[#allocation2 + $0x123] sm:$0xff]  ;;  %v1107_v31 = vmax.f32 %v1027_v33, %v1067_v36  ;;  %v1227_v35 = vld [vmem:[#allocation2 + $0x12b] sm:$0xff]  ;;  %v4492_v36 = vpop.eup %4491  ;;  %4497 = vrcp.f32 %v804_v0  ;;  %v5455_v40 = vmax.f32 %v1273_v26, %v1313_v55  ;;  %v5461_v0 = vmax.f32 %v1119_v47, %v1159_v46 }
 0x136   : > { %992 = vst [vmem:[#allocation2 + $0x13a] sm:$0xff] %v5400_v42  ;;  %v1266_v62 = vmax.f32 %v5381_v50, %v1226_v27  ;;  %v1306_v5 = vld [vmem:[#allocation2 + $0x124] sm:$0xff]  ;;  %v1307_v24 = vld [vmem:[#allocation2 + $0x12c] sm:$0xff]  ;;  %v4494_v34 = vpop.eup %4493  ;;  %v1120_v50 = vmax.f32 %v5426_v43, %v1080_v63  ;;  %v5468_v32 = vmul.f32 %v4492_v36, %v5289_v7  ;;  %v7334_v47 = vmax.f32 %v5336_v19, %v5372_v4 }
 0x137   : > { %7330 = vst [vmem:[#allocation44_spill] sm:$0xff] %v5424_v60  ;;  %v1034_v58 = vld [vmem:[#allocation2 + $0x180] sm:$0xff]  ;;  %v5442_v6 = vld [vmem:[#allocation2 + $0x68] sm:$0xff]  ;;  %v1187_v27 = vmax.f32 %v1107_v31, %v5358_v3  ;;  %v5489_v31 = vld [vmem:[#allocation2 + $0x1d3] sm:$0xff] }
 0x138   : > { %976 = vst [vmem:[#allocation2 + $0x7a] sm:$0xff] %v5403_v30  ;;  %v1074_v39 = vld [vmem:[#allocation2 + $0x181] sm:$0xff]  ;;  %v5444_v33 = vld [vmem:[#allocation2 + $0x69] sm:$0xff]  ;;  %v5451_v41 = vmax.f32 %v1266_v62, %v1306_v5 }
 0x139   : > { %999 = vst [vmem:[#allocation2 + $0x18a] sm:$0xff] %v5424_v60  ;;  %v1114_v59 = vmax.f32 %v1034_v58, %v1074_v39  ;;  %v1160_v25 = vld [vmem:[#allocation2 + $0x1ca] sm:$0xff]  ;;  %v1267_v62 = vmax.f32 %v1187_v27, %v1227_v35  ;;  %v811_v39 = vadd.f32 1.0, %v4494_v34  ;;  %v1161_v58 = vld [vmem:[#allocation2 + $0x1d2] sm:$0xff]  ;;  %v1278_v35 = vmax.f32 %v1198_v11, %v1238_v44  ;;  %v1124_v44 = vld [vmem:[#allocation2 + $0x1a] sm:$0xff] }
 0x13a   : > { %7331 = vst [vmem:[#allocation45_spill] sm:$0xff] %v5451_v41  ;;  %v1200_v20 = vmax.f32 %v1120_v50, %v1160_v25  ;;  %v1240_v55 = vld [vmem:[#allocation2 + $0x1cb] sm:$0xff]  ;;  %v5478_v46 = vmax.f32 %v7334_v47, %v5451_v41  ;;  %v1122_v25 = vld [vmem:[#allocation2 + $0x2] sm:$0xff]  ;;  %v4496_v50 = vpop.eup %4495 }
 0x13b   : > { %v1194_v5 = vmax.f32 %v1114_v59, %v5368_v56  ;;  %v5465_v63 = vmax.f32 %v1267_v62, %v1307_v24  ;;  %7333 = vst [vmem:[#allocation47_spill] sm:$0xff] %v5468_v32  ;;  %4499 = vrcp.f32 %v811_v39  ;;  %v1318_v24 = vld [vmem:[#allocation2 + $0x1b4] sm:$0xff]  ;;  %v5482_v59 = vmax.f32 %v1121_v48, %v1161_v58  ;;  %v4498_v39 = vpop.eup %4497  ;;  %v1123_v56 = vld [vmem:[#allocation2 + $0xa] sm:$0xff] }
 0x13c   : > { %977 = vst [vmem:[#allocation2 + $0x82] sm:$0xff] %v5468_v32  ;;  %v812_v34 = vadd.f32 1.0, %v4496_v50  ;;  %v1280_v7 = vmax.f32 %v1200_v20, %v1240_v55  ;;  %v7335_v48 = vmax.f32 %v5343_v53, %v5378_v37  ;;  %v5501_v3 = vmul.f32 %v4498_v39, %v5316_v23  ;;  %v1125_v50 = vld [vmem:[#allocation2 + $0x22] sm:$0xff] }
 0x13d   : > { %7332 = vst [vmem:[#allocation46_spill] sm:$0xff] %v5465_v63  ;;  %v1028_v51 = vld [vmem:[#allocation2 + $0x138] sm:$0xff]  ;;  %v7338_v39 = vmax.f32 %v5220_v18, -3.4028235e+38  ;;  %v7340_v23 = vmax.f32 %v5228_v29, -3.4028235e+38  ;;  %v7344_v29 = vmax.f32 %v5383_v54, %v5392_v8 }
 0x13e   : > { %v1068_v26 = vld [vmem:[#allocation2 + $0x139] sm:$0xff]  ;;  %v5495_v58 = vmax.f32 %v7335_v48, %v5465_v63  ;;  %7336 = vst [vmem:[#allocation48_spill] sm:$0xff] %v5501_v3  ;;  %4501 = vrcp.f32 %v812_v34 }
 0x13f   : > { %v1108_v43 = vmax.f32 %v1028_v51, %v1068_v26  ;;  %v1127_v48 = vld [vmem:[#allocation2 + $0x3a] sm:$0xff]  ;;  %993 = vst [vmem:[#allocation2 + $0x142] sm:$0xff] %v5501_v3 }
 0x140   : > { %v1035_v11 = vld [vmem:[#allocation2 + $0x188] sm:$0xff]  ;;  %v4279_v54 = vld [vmem:[#allocation8 + $0xf8] sm:$0xff] }
 0x141   : > { %v1075_v36 = vld [vmem:[#allocation2 + $0x189] sm:$0xff]  ;;  %v5498_v62 = vmax.f32 %v1108_v43, %v5400_v42  ;;  %v4500_v42 = vpop.eup %4499  ;;  %3456 = vmatpush.bf16.msrb.mxu0 %v4279_v54 }
 0x142   : > { %v1234_v27 = vld [vmem:[#allocation2 + $0x183] sm:$0xff]  ;;  %v1115_v51 = vmax.f32 %v1035_v11, %v1075_v36  ;;  %v1235_v47 = vld [vmem:[#allocation2 + $0x18b] sm:$0xff]  ;;  %v5503_v11 = vmax.f32 %v1278_v35, %v1318_v24  ;;  %v880_v36 = vpack.c.bf16 %v5468_v32, %v5403_v30  ;;  %v7337_v35 = vmax.f32 %v5151_v15, -3.4028235e+38 }
 0x143   : > { %v1274_v26 = vmax.f32 %v1194_v5, %v1234_v27  ;;  %v1314_v17 = vld [vmem:[#allocation2 + $0x184] sm:$0xff]  ;;  %v1320_v5 = vld [vmem:[#allocation2 + $0x1cc] sm:$0xff]  ;;  %v1165_v30 = vmax.f32 %v7340_v23, %v1125_v50  ;;  %v5526_v18 = vmul.f32 %v4500_v42, %v5332_v9  ;;  %v7345_v9 = vmax.f32 %v5390_v1, %v5405_v28  ;;  %v1207_v23 = vld [vmem:[#allocation2 + $0x3b] sm:$0xff] }
 0x144   : > { %v1195_v20 = vmax.f32 %v1115_v51, %v5424_v60  ;;  %v1126_v27 = vld [vmem:[#allocation2 + $0x32] sm:$0xff]  ;;  %v1162_v24 = vmax.f32 %v7337_v35, %v1122_v25  ;;  %v1163_v51 = vmax.f32 %v7338_v39, %v1123_v56  ;;  %v1204_v60 = vld [vmem:[#allocation2 + $0x1b] sm:$0xff]  ;;  %v5519_v19 = vmax.f32 %v1280_v7, %v1320_v5  ;;  %v1205_v25 = vld [vmem:[#allocation2 + $0x23] sm:$0xff]  ;;  %1843 = vmatmul.bf16.gmra.mxu2 %v880_v36  ;;  %v4502_v1 = vpop.eup %4501 }
 0x145   : > { %v5506_v55 = vmax.f32 %v1274_v26, %v1314_v17  ;;  %v1315_v43 = vld [vmem:[#allocation2 + $0x18c] sm:$0xff]  ;;  %v7339_v17 = vmax.f32 %v5153_v16, -3.4028235e+38  ;;  %v1202_v26 = vld [vmem:[#allocation2 + $0x3] sm:$0xff]  ;;  %7341 = vst [vmem:[#allocation49_spill] sm:$0xff] %v5526_v18  ;;  %v7342_v16 = vmax.f32 %v5376_v13, %v5411_v22  ;;  %v1168_v42 = vmax.f32 %v7345_v9, %v5207_v10 }
 0x146   : > { %v1275_v53 = vmax.f32 %v1195_v20, %v1235_v47  ;;  %v1203_v15 = vld [vmem:[#allocation2 + $0xb] sm:$0xff]  ;;  %v1206_v35 = vld [vmem:[#allocation2 + $0x33] sm:$0xff]  ;;  %v1167_v47 = vmax.f32 %v7344_v29, %v1127_v48  ;;  %v7346_v20 = vmax.f32 %v5414_v12, %v5416_v38  ;;  %1000 = vst [vmem:[#allocation2 + $0x19a] sm:$0xff] %v5526_v18  ;;  %v1245_v48 = vmax.f32 %v1165_v30, %v1205_v25  ;;  %v1284_v39 = vld [vmem:[#allocation2 + $0x1c] sm:$0xff] }
 0x147   : > { %v1164_v34 = vmax.f32 %v7339_v17, %v1124_v44  ;;  %v1392_v32 = vmax.f32 %v5411_v22, %v5506_v55  ;;  %v5532_v56 = vmax.f32 %v7342_v16, %v5506_v55  ;;  %v7343_v44 = vmax.f32 %v5275_v61, %v5280_v14  ;;  %v1208_v5 = vld [vmem:[#allocation2 + $0x4b] sm:$0xff]  ;;  %v1209_v12 = vld [vmem:[#allocation2 + $0x53] sm:$0xff]  ;;  %v1308_v9 = vld [vmem:[#allocation2 + $0x13c] sm:$0xff] }
 0x148   : > { %v5540_v50 = vmax.f32 %v1275_v53, %v1315_v43  ;;  %v1169_v36 = vmax.f32 %v7346_v20, %v5252_v2  ;;  %v1242_v61 = vmax.f32 %v1162_v24, %v1202_v26  ;;  %v1282_v14 = vld [vmem:[#allocation2 + $0x4] sm:$0xff]  ;;  %v1243_v8 = vmax.f32 %v1163_v51, %v1203_v15  ;;  %v7348_v26 = vld [vmem:[#allocation40_spill] sm:$0xff] }
 0x149   : > { %v1166_v7 = vmax.f32 %v7343_v44, %v1126_v27  ;;  %v1283_v27 = vld [vmem:[#allocation2 + $0xc] sm:$0xff]  ;;  %v1244_v53 = vmax.f32 %v1164_v34, %v1204_v60  ;;  %v1285_v17 = vld [vmem:[#allocation2 + $0x24] sm:$0xff]  ;;  %v7347_v2 = vmax.f32 %v5429_v21, %v5437_v52  ;;  %v1247_v38 = vmax.f32 %v1167_v47, %v1207_v23  ;;  %v1286_v60 = vld [vmem:[#allocation2 + $0x34] sm:$0xff] }
 0x14a   : > { %v1393_v10 = vmax.f32 %v5455_v40, %v5540_v50  ;;  %v1248_v24 = vmax.f32 %v1168_v42, %v1208_v5  ;;  %v5558_v16 = vmul.f32 %v4502_v1, %v7348_v26  ;;  %v1249_v30 = vmax.f32 %v1169_v36, %v1209_v12  ;;  %v1287_v51 = vld [vmem:[#allocation2 + $0x3c] sm:$0xff]  ;;  %v1288_v34 = vld [vmem:[#allocation2 + $0x4c] sm:$0xff]  ;;  %v1309_v26 = vld [vmem:[#allocation2 + $0x144] sm:$0xff] }
 0x14b   : > { %v1246_v43 = vmax.f32 %v1166_v7, %v1206_v35  ;;  %v1170_v28 = vmax.f32 %v7347_v2, %v5341_v49  ;;  %v1322_v15 = vmax.f32 %v1242_v61, %v1282_v14  ;;  %v1323_v25 = vmax.f32 %v1243_v8, %v1283_v27  ;;  %v1029_v35 = vld [vmem:[#allocation2 + $0x140] sm:$0xff]  ;;  %v7354_v54 = vld [vmem:[#allocation18_spill] sm:$0xff] }
 0x14c   : > { %7349 = vst [vmem:[#allocation40_spill] sm:$0xff] %v5558_v16  ;;  %v1069_v44 = vld [vmem:[#allocation2 + $0x141] sm:$0xff]  ;;  %v5560_v29 = vmax.f32 %v1244_v53, %v1284_v39  ;;  %v5562_v21 = vmax.f32 %v1245_v48, %v1285_v17  ;;  %v5566_v52 = vmax.f32 %v1247_v38, %v1287_v51  ;;  %v7352_v42 = vmax.f32 %v5407_v45, %v5455_v40  ;;  %v7356_v48 = vld [vmem:[#allocation19_spill] sm:$0xff] }
 0x14d   : > { %v1228_v7 = vld [vmem:[#allocation2 + $0x13b] sm:$0xff]  ;;  %v5564_v49 = vmax.f32 %v1246_v43, %v1286_v60  ;;  %v1109_v47 = vmax.f32 %v1029_v35, %v1069_v44  ;;  %1001 = vst [vmem:[#allocation2 + $0x1a2] sm:$0xff] %v5558_v16  ;;  %v5576_v36 = vmax.f32 %v1248_v24, %v1288_v34  ;;  %v1229_v23 = vld [vmem:[#allocation2 + $0x143] sm:$0xff]  ;;  %v7359_v2 = vmax.f32 %v5442_v6, %v5444_v33 }
 0x14e   : > { %7350 = vst [vmem:[#allocation50_spill] sm:$0xff] %v5560_v29  ;;  %v1268_v5 = vmax.f32 %v5498_v62, %v1228_v7  ;;  %v5574_v20 = vmax.f32 %v7352_v42, %v5540_v50  ;;  %v1210_v61 = vld [vmem:[#allocation2 + $0x63] sm:$0xff]  ;;  %v5579_v14 = vmax.f32 %v1322_v15, %v5560_v29  ;;  %v5582_v27 = vmax.f32 %v1323_v25, %v5562_v21  ;;  %v1289_v24 = vld [vmem:[#allocation2 + $0x54] sm:$0xff]  ;;  %v1211_v7 = vld [vmem:[#allocation2 + $0x6b] sm:$0xff] }
 0x14f   : > { %7351 = vst [vmem:[#allocation51_spill] sm:$0xff] %v5562_v21  ;;  %v7353_v62 = vld [vmem:[#allocation13_spill] sm:$0xff]  ;;  %v7355_v53 = vld [vmem:[#allocation14_spill] sm:$0xff]  ;;  %v1189_v39 = vmax.f32 %v1109_v47, %v5501_v3  ;;  %v1250_v38 = vmax.f32 %v1170_v28, %v1210_v61  ;;  %v1036_v60 = vld [vmem:[#allocation2 + $0x198] sm:$0xff]  ;;  %v5599_v34 = vmax.f32 %v1249_v30, %v1289_v24  ;;  %v7360_v28 = vmax.f32 %v5372_v4, %v5451_v41 }
 0x150   : > { %v5586_v8 = vmul.f32 %v7354_v54, %v7353_v62  ;;  %v5590_v43 = vmul.f32 %v7356_v48, %v7355_v53  ;;  %v5593_v17 = vmax.f32 %v1268_v5, %v1308_v9  ;;  %v7358_v1 = vld [vmem:[#allocation33_spill] sm:$0xff]  ;;  %v1394_v15 = vmax.f32 %v5579_v14, %v5564_v49 }
 0x151   : > { %v1171_v12 = vmax.f32 %v7359_v2, %v7358_v1  ;;  %v1076_v51 = vld [vmem:[#allocation2 + $0x199] sm:$0xff]  ;;  %v1395_v25 = vmax.f32 %v5582_v27, %v5566_v52  ;;  %v1269_v6 = vmax.f32 %v1189_v39, %v1229_v23  ;;  %v1290_v47 = vld [vmem:[#allocation2 + $0x64] sm:$0xff] }
 0x152   : > { %7357 = vst [vmem:[#allocation13_spill] sm:$0xff] %v5593_v17  ;;  %v881_v35 = vpack.c.bf16 %v5590_v43, %v5586_v8  ;;  %v1386_v33 = vmax.f32 %v5451_v41, %v5593_v17  ;;  %v1416_v30 = vmax.f32 %v7360_v28, %v5593_v17  ;;  %v1446_v44 = vmax.f32 %v5478_v46, %v5593_v17  ;;  %v1291_v46 = vld [vmem:[#allocation2 + $0x6c] sm:$0xff] }
 0x153   : > { %978 = vst [vmem:[#allocation2 + $0x92] sm:$0xff] %v5586_v8  ;;  %v1116_v5 = vmax.f32 %v1036_v60, %v1076_v51  ;;  %v1388_v9 = vmax.f32 %v5593_v17, %v5376_v13  ;;  %v1251_v42 = vmax.f32 %v1171_v12, %v1211_v7  ;;  %v5619_v23 = vmax.f32 %v1250_v38, %v1290_v47 }
 0x154   : > { %979 = vst [vmem:[#allocation2 + $0x9a] sm:$0xff] %v5590_v43  ;;  %v5621_v61 = vmax.f32 %v1269_v6, %v1309_v26  ;;  %v1418_v62 = vmax.f32 %v1386_v33, %v5376_v13  ;;  %v1448_v54 = vmax.f32 %v1416_v30, %v5376_v13  ;;  %v5626_v53 = vmax.f32 %v1446_v44, %v5376_v13  ;;  %v1037_v39 = vld [vmem:[#allocation2 + $0x1a0] sm:$0xff] }
 0x155   : > { %v1196_v48 = vmax.f32 %v1116_v5, %v5526_v18  ;;  %v1077_v1 = vld [vmem:[#allocation2 + $0x1a1] sm:$0xff]  ;;  %v1420_v24 = vmax.f32 %v1388_v9, %v5411_v22  ;;  %v5630_v12 = vmax.f32 %v1251_v42, %v1291_v46  ;;  %v1426_v38 = vmax.f32 %v1394_v15, %v5576_v36  ;;  %1848 = vmatmul.bf16.gmra.mxu2 %v881_v35 }
 0x156   : > { %7361 = vst [vmem:[#allocation18_spill] sm:$0xff] %v5621_v61  ;;  %v1236_v2 = vld [vmem:[#allocation2 + $0x19b] sm:$0xff]  ;;  %v1387_v26 = vmax.f32 %v5465_v63, %v5621_v61  ;;  %v7363_v13 = vmax.f32 %v5378_v37, %v5465_v63  ;;  %v1447_v51 = vmax.f32 %v5495_v58, %v5621_v61  ;;  %v1450_v6 = vmax.f32 %v1418_v62, %v5411_v22  ;;  %v1237_v9 = vld [vmem:[#allocation2 + $0x1a3] sm:$0xff] }
 0x157   : > { %7362 = vst [vmem:[#allocation14_spill] sm:$0xff] %v5626_v53  ;;  %v1316_v33 = vld [vmem:[#allocation2 + $0x19c] sm:$0xff]  ;;  %v5644_v28 = vmax.f32 %v1448_v54, %v5411_v22  ;;  %v1117_v15 = vmax.f32 %v1037_v39, %v1077_v1  ;;  %v1276_v30 = vmax.f32 %v1196_v48, %v1236_v2  ;;  %v1389_v44 = vmax.f32 %v5621_v61, %v5407_v45  ;;  %v7383_v63 = vld [vmem:[#allocation22_spill] sm:$0xff] }
 0x158   : > { %v1417_v60 = vmax.f32 %v7363_v13, %v5621_v61  ;;  %1929 = vst [vmem:[#allocation2 + $0x122] sm:$0xff] %v5626_v53  ;;  %v1419_v7 = vmax.f32 %v1387_v26, %v5407_v45  ;;  %v5651_v5 = vmax.f32 %v1447_v51, %v5407_v45  ;;  %v5654_v58 = vmax.f32 %v1450_v6, %v5506_v55  ;;  %v1319_v1 = vld [vmem:[#allocation2 + $0x1bc] sm:$0xff]  ;;  %v1321_v13 = vld [vmem:[#allocation2 + $0x1d4] sm:$0xff] }
 0x159   : > { %7364 = vst [vmem:[#allocation19_spill] sm:$0xff] %v5644_v28  ;;  %v1197_v42 = vmax.f32 %v1117_v15, %v5558_v16  ;;  %v1356_v62 = vmax.f32 %v1276_v30, %v1316_v33  ;;  %v1421_v54 = vmax.f32 %v1389_v44, %v5455_v40  ;;  %v1452_v46 = vmax.f32 %v1420_v24, %v5506_v55  ;;  %v7381_v61 = vld [vmem:[#allocation20_spill] sm:$0xff] }
 0x15a   : > { %v1449_v47 = vmax.f32 %v1417_v60, %v5407_v45  ;;  %7365 = vst [vmem:[#allocation33_spill] sm:$0xff] %v5651_v5  ;;  %v1451_v48 = vmax.f32 %v1419_v7, %v5455_v40  ;;  %v1317_v45 = vld [vmem:[#allocation2 + $0x1a4] sm:$0xff]  ;;  %v1427_v35 = vmax.f32 %v1395_v25, %v5599_v34  ;;  %v5667_v2 = vmax.f32 %v1426_v38, %v5619_v23 }
 0x15b   : > { %7366 = vst [vmem:[#allocation52_spill] sm:$0xff] %v5654_v58  ;;  %v1277_v26 = vmax.f32 %v1197_v42, %v1237_v9  ;;  %v1424_v24 = vmax.f32 %v1392_v32, %v1356_v62  ;;  %v1453_v60 = vmax.f32 %v1421_v54, %v5540_v50  ;;  %v1454_v51 = vmax.f32 %v5532_v56, %v1356_v62  ;;  %v4278_v42 = vld [vmem:[#allocation8 + $0xf0] sm:$0xff] }
 0x15c   : > { %1931 = vst [vmem:[#allocation2 + $0x13a] sm:$0xff] %v5644_v28  ;;  %v5662_v39 = vmax.f32 %v1449_v47, %v5455_v40  ;;  %v5676_v6 = vmax.f32 %v1451_v48, %v5540_v50  ;;  %v5679_v25 = vmax.f32 %v1452_v46, %v1356_v62  ;;  %v5682_v38 = vmax.f32 %v1427_v35, %v5630_v12 }
 0x15d   : > { %1930 = vst [vmem:[#allocation2 + $0x12a] sm:$0xff] %v5651_v5  ;;  %v1490_v33 = vpack.c.bf16 %v5667_v2, %v5667_v2  ;;  %v1357_v32 = vmax.f32 %v1277_v26, %v1317_v45  ;;  %v7370_v55 = vmax.f32 %v5461_v0, %v5463_v57  ;;  %v1456_v30 = vmax.f32 %v1424_v24, %v5503_v11  ;;  %v4269_v57 = vld [vmem:[#allocation8 + $0xa8] sm:$0xff] }
 0x15e   : > { %7367 = vst [vmem:[#allocation53_spill] sm:$0xff] %v5662_v39  ;;  %v5693_v44 = vmax.f32 %v1454_v51, %v5503_v11  ;;  %v7372_v47 = vmax.f32 %v5482_v59, %v5489_v31  ;;  %v1491_v0 = vpack.c.bf16 %v5682_v38, %v5682_v38  ;;  %v1364_v62 = vmax.f32 %v5560_v29, %v5564_v49  ;;  %v4268_v59 = vld [vmem:[#allocation8 + $0xa0] sm:$0xff]  ;;  %v4277_v45 = vld [vmem:[#allocation8 + $0xe8] sm:$0xff] }
 0x15f   : > { %1933 = vst [vmem:[#allocation2 + $0x152] sm:$0xff] %v5654_v58  ;;  %v1965_v15 = vld [vmem:[#allocation2 + $0x120] sm:$0xff]  ;;  %v5689_v56 = vmax.f32 %v7370_v55, %v1319_v1  ;;  %v1425_v54 = vmax.f32 %v1393_v10, %v1357_v32  ;;  %v1455_v46 = vmax.f32 %v5574_v20, %v1357_v32  ;;  %v5710_v48 = vmax.f32 %v1453_v60, %v1357_v32  ;;  %v1012_v1 = vld [vmem:[#allocation2 + $0x78] sm:$0xff] }
 0x160   : > { %7368 = vst [vmem:[#allocation54_spill] sm:$0xff] %v5676_v6  ;;  %v2005_v22 = vld [vmem:[#allocation2 + $0x121] sm:$0xff]  ;;  %v5700_v9 = vmax.f32 %v7372_v47, %v1321_v13  ;;  %v5713_v31 = vmax.f32 %v1456_v30, %v5519_v19  ;;  %v1571_v40 = vunpack.c.l.b16 %v1490_v33  ;;  %v1572_v50 = vunpack.c.l.b16 %v1491_v0  ;;  %2624 = vmatpush.bf16.msrb.mxu3 %v4269_v57  ;;  %3457 = vmatpush.bf16.msrb.mxu0 %v4278_v42  ;;  %v1052_v10 = vld [vmem:[#allocation2 + $0x79] sm:$0xff]  ;;  %v5729_v42 = vld [vmem:[#allocation2 + $0x90] sm:$0xff] }
 0x161   : > { %1932 = vst [vmem:[#allocation2 + $0x142] sm:$0xff] %v5662_v39  ;;  %v2045_v7 = vmax.f32 %v1965_v15, %v2005_v22  ;;  %v1365_v20 = vmax.f32 %v5562_v21, %v5566_v52  ;;  %v1457_v22 = vmax.f32 %v1425_v54, %v5689_v56  ;;  %v5722_v32 = vmax.f32 %v1455_v46, %v5689_v56 }
 0x162   : > { %7369 = vst [vmem:[#allocation55_spill] sm:$0xff] %v5679_v25  ;;  %v1092_v55 = vmax.f32 %v1012_v1, %v1052_v10  ;;  %v1603_v0 = vpack.c.b16 %v1572_v50, %v1571_v40  ;;  %v5727_v57 = vmax.f32 %v1364_v62, %v5576_v36  ;;  %v5741_v62 = vld [vmem:[#allocation2 + $0x98] sm:$0xff] }
 0x163   : > { %7371 = vst [vmem:[#allocation56_spill] sm:$0xff] %v5693_v44  ;;  %v1967_v35 = vld [vmem:[#allocation2 + $0x138] sm:$0xff]  ;;  %v2125_v13 = vmax.f32 %v2045_v7, %v5626_v53  ;;  %v5735_v10 = vmax.f32 %v1457_v22, %v5700_v9 }
 0x164   : > { %1909 = vst [vmem:[#allocation2 + $0x32] sm:$0xff] %v5667_v2  ;;  %v2007_v26 = vld [vmem:[#allocation2 + $0x139] sm:$0xff]  ;;  %v1966_v24 = vld [vmem:[#allocation2 + $0x128] sm:$0xff]  ;;  %1691 = vmatmul.bf16.vlgmr.msrb.gmra.mxu1 %v1603_v0  ;;  %2625 = vmatpush.bf16.msrb.mxu3 %v4268_v59 }
 0x165   : > { %1934 = vst [vmem:[#allocation2 + $0x15a] sm:$0xff] %v5676_v6  ;;  %v2006_v60 = vld [vmem:[#allocation2 + $0x129] sm:$0xff]  ;;  %v2047_v51 = vmax.f32 %v1967_v35, %v2007_v26  ;;  %v5731_v35 = vld [vmem:[#allocation2 + $0x91] sm:$0xff]  ;;  %v5743_v40 = vld [vmem:[#allocation2 + $0x99] sm:$0xff]  ;;  %3458 = vmatpush.bf16.msrb.mxu0 %v4277_v45 }
 0x166   : > { %7373 = vst [vmem:[#allocation57_spill] sm:$0xff] %v5710_v48  ;;  %v2165_v15 = vld [vmem:[#allocation2 + $0x123] sm:$0xff]  ;;  %v1969_v33 = vld [vmem:[#allocation2 + $0x150] sm:$0xff]  ;;  %v2046_v7 = vmax.f32 %v1966_v24, %v2006_v60 }
 0x167   : > { %7374 = vst [vmem:[#allocation58_spill] sm:$0xff] %v5713_v31  ;;  %v2009_v30 = vld [vmem:[#allocation2 + $0x151] sm:$0xff]  ;;  %v2205_v47 = vmax.f32 %v2125_v13, %v2165_v15  ;;  %v2127_v16 = vmax.f32 %v2047_v51, %v5644_v28  ;;  %v5739_v13 = vmax.f32 %v1365_v20, %v5599_v34  ;;  %v7377_v51 = vld [vmem:[#allocation42_spill] sm:$0xff] }
 0x168   : > { %1935 = vst [vmem:[#allocation2 + $0x16a] sm:$0xff] %v5679_v25  ;;  %v1968_v54 = vld [vmem:[#allocation2 + $0x140] sm:$0xff]  ;;  %v2049_v26 = vmax.f32 %v1969_v33, %v2009_v30  ;;  %v2126_v24 = vmax.f32 %v2046_v7, %v5651_v5  ;;  %v2166_v60 = vld [vmem:[#allocation2 + $0x12b] sm:$0xff]  ;;  %v5748_v22 = vmax.f32 %v1092_v55, %v7377_v51 }
 0x169   : > { %1937 = vst [vmem:[#allocation2 + $0x182] sm:$0xff] %v5693_v44  ;;  %v2008_v46 = vld [vmem:[#allocation2 + $0x141] sm:$0xff] }
 0x16a   : > { %7375 = vst [vmem:[#allocation59_spill] sm:$0xff] %v5722_v32  ;;  %v2167_v1 = vld [vmem:[#allocation2 + $0x13b] sm:$0xff]  ;;  %v2048_v50 = vmax.f32 %v1968_v54, %v2008_v46  ;;  %v2168_v15 = vld [vmem:[#allocation2 + $0x143] sm:$0xff]  ;;  %v2129_v28 = vmax.f32 %v2049_v26, %v5654_v58  ;;  %v2246_v46 = vld [vmem:[#allocation2 + $0x12c] sm:$0xff]  ;;  %v2206_v55 = vmax.f32 %v2126_v24, %v2166_v60 }
 0x16b   : > { %1936 = vst [vmem:[#allocation2 + $0x172] sm:$0xff] %v5710_v48  ;;  %v2245_v33 = vld [vmem:[#allocation2 + $0x124] sm:$0xff]  ;;  %v2207_v54 = vmax.f32 %v2127_v16, %v2167_v1  ;;  %v2247_v51 = vld [vmem:[#allocation2 + $0x13c] sm:$0xff] }
 0x16c   : > { %1939 = vst [vmem:[#allocation2 + $0x19a] sm:$0xff] %v5713_v31  ;;  %v7378_v30 = vld [vmem:[#allocation37_spill] sm:$0xff]  ;;  %v1970_v20 = vld [vmem:[#allocation2 + $0x158] sm:$0xff]  ;;  %v5752_v7 = vmax.f32 %v2205_v47, %v2245_v33  ;;  %v2128_v59 = vmax.f32 %v2048_v50, %v5662_v39  ;;  %v5769_v60 = vmax.f32 %v2206_v55, %v2246_v46 }
 0x16d   : > { %7376 = vst [vmem:[#allocation60_spill] sm:$0xff] %v5735_v10  ;;  %4503 = vpow2.f32 %v7378_v30  ;;  %v2010_v18 = vld [vmem:[#allocation2 + $0x159] sm:$0xff]  ;;  %v2248_v3 = vld [vmem:[#allocation2 + $0x144] sm:$0xff]  ;;  %v7380_v30 = vld [vmem:[#allocation15_spill] sm:$0xff]  ;;  %v5760_v1 = vmax.f32 %v2207_v54, %v2247_v51 }
 0x16e   : > { %1938 = vst [vmem:[#allocation2 + $0x18a] sm:$0xff] %v5722_v32  ;;  %v2169_v53 = vld [vmem:[#allocation2 + $0x153] sm:$0xff]  ;;  %v2050_v0 = vmax.f32 %v1970_v20, %v2010_v18  ;;  %v2170_v5 = vld [vmem:[#allocation2 + $0x15b] sm:$0xff]  ;;  %v5758_v17 = vmul.f32 %v7381_v61, %v7380_v30  ;;  %v2208_v24 = vmax.f32 %v2128_v59, %v2168_v15 }
 0x16f   : > { %1910 = vst [vmem:[#allocation2 + $0x3a] sm:$0xff] %v5682_v38  ;;  %v2209_v26 = vmax.f32 %v2129_v28, %v2169_v53  ;;  %v2249_v58 = vld [vmem:[#allocation2 + $0x154] sm:$0xff]  ;;  %v2250_v16 = vld [vmem:[#allocation2 + $0x15c] sm:$0xff]  ;;  %v1971_v47 = vld [vmem:[#allocation2 + $0x168] sm:$0xff] }
 0x170   : > { %7379 = vst [vmem:[#allocation42_spill] sm:$0xff] %v5752_v7  ;;  %v7382_v33 = vld [vmem:[#allocation16_spill] sm:$0xff]  ;;  %v2130_v50 = vmax.f32 %v2050_v0, %v5676_v6  ;;  %v1973_v20 = vld [vmem:[#allocation2 + $0x180] sm:$0xff]  ;;  %v2011_v53 = vld [vmem:[#allocation2 + $0x169] sm:$0xff]  ;;  %v5781_v59 = vmax.f32 %v2208_v24, %v2248_v3 }
 0x171   : > { %1940 = vst [vmem:[#allocation2 + $0x1a2] sm:$0xff] %v5735_v10  ;;  %v5764_v45 = vmul.f32 %v7383_v63, %v7382_v33  ;;  %v5774_v54 = vmax.f32 %v2209_v26, %v2249_v58  ;;  %v2325_v63 = vmax.f32 %v5752_v7, %v5760_v1  ;;  %v2013_v33 = vld [vmem:[#allocation2 + $0x181] sm:$0xff]  ;;  %v2051_v0 = vmax.f32 %v1971_v47, %v2011_v53 }
 0x172   : > { %7384 = vst [vmem:[#allocation37_spill] sm:$0xff] %v5769_v60  ;;  %v1972_v61 = vld [vmem:[#allocation2 + $0x170] sm:$0xff]  ;;  %v2210_v46 = vmax.f32 %v2130_v50, %v2170_v5  ;;  %v2053_v26 = vmax.f32 %v1973_v20, %v2013_v33  ;;  %v5789_v5 = vld [vmem:[#allocation2 + $0x80] sm:$0xff]  ;;  %v2326_v50 = vmax.f32 %v5769_v60, %v5781_v59 }
 0x173   : > { %980 = vst [vmem:[#allocation2 + $0xaa] sm:$0xff] %v5758_v17  ;;  %v1975_v51 = vld [vmem:[#allocation2 + $0x198] sm:$0xff]  ;;  %v882_v15 = vpack.c.bf16 %v5764_v45, %v5758_v17  ;;  %v5783_v6 = vpop.eup %4503  ;;  %v5786_v39 = vmax.f32 %v2325_v63, %v5774_v54  ;;  %v2131_v53 = vmax.f32 %v2051_v0, %v5679_v25  ;;  %v2171_v41 = vld [vmem:[#allocation2 + $0x16b] sm:$0xff] }
 0x174   : > { %v2012_v30 = vld [vmem:[#allocation2 + $0x171] sm:$0xff]  ;;  %981 = vst [vmem:[#allocation2 + $0xb2] sm:$0xff] %v5764_v45  ;;  %v2015_v28 = vld [vmem:[#allocation2 + $0x199] sm:$0xff]  ;;  %v5791_v3 = vmax.f32 %v2210_v46, %v2250_v16 }
 0x175   : > { %v1974_v55 = vld [vmem:[#allocation2 + $0x188] sm:$0xff]  ;;  %v2052_v58 = vmax.f32 %v1972_v61, %v2012_v30  ;;  %v2055_v47 = vmax.f32 %v1975_v51, %v2015_v28  ;;  %v2172_v37 = vld [vmem:[#allocation2 + $0x173] sm:$0xff]  ;;  %1853 = vmatmul.bf16.gmra.mxu2 %v882_v15  ;;  %v2211_v15 = vmax.f32 %v2131_v53, %v2171_v41 }
 0x176   : > { %v2014_v18 = vld [vmem:[#allocation2 + $0x189] sm:$0xff]  ;;  %v2358_v46 = vmax.f32 %v2326_v50, %v5791_v3  ;;  %v2252_v60 = vld [vmem:[#allocation2 + $0x174] sm:$0xff] }
 0x177   : > { %v2054_v7 = vmax.f32 %v1974_v55, %v2014_v18  ;;  %v2173_v4 = vld [vmem:[#allocation2 + $0x183] sm:$0xff]  ;;  %v2132_v20 = vmax.f32 %v2052_v58, %v5710_v48  ;;  %v2133_v18 = vmax.f32 %v2053_v26, %v5693_v44  ;;  %v2174_v28 = vld [vmem:[#allocation2 + $0x18b] sm:$0xff]  ;;  %v2135_v30 = vmax.f32 %v2055_v47, %v5713_v31 }
 0x178   : > { %v1976_v24 = vld [vmem:[#allocation2 + $0x1a0] sm:$0xff]  ;;  %v2251_v16 = vld [vmem:[#allocation2 + $0x16c] sm:$0xff]  ;;  %v2327_v58 = vmax.f32 %v5760_v1, %v5774_v54 }
 0x179   : > { %v2016_v61 = vld [vmem:[#allocation2 + $0x1a1] sm:$0xff]  ;;  %v2134_v51 = vmax.f32 %v2054_v7, %v5722_v32  ;;  %v2212_v55 = vmax.f32 %v2132_v20, %v2172_v37  ;;  %v2213_v25 = vmax.f32 %v2133_v18, %v2173_v4  ;;  %v2254_v29 = vld [vmem:[#allocation2 + $0x18c] sm:$0xff]  ;;  %v5803_v47 = vmax.f32 %v2211_v15, %v2251_v16 }
 0x17a   : > { %v2056_v63 = vmax.f32 %v1976_v24, %v2016_v61  ;;  %v2175_v33 = vld [vmem:[#allocation2 + $0x19b] sm:$0xff]  ;;  %v2176_v0 = vld [vmem:[#allocation2 + $0x1a3] sm:$0xff]  ;;  %v2328_v4 = vmax.f32 %v5781_v59, %v5791_v3 }
 0x17b   : > { %v2253_v21 = vld [vmem:[#allocation2 + $0x184] sm:$0xff]  ;;  %v2214_v24 = vmax.f32 %v2134_v51, %v2174_v28  ;;  %v2215_v7 = vmax.f32 %v2135_v30, %v2175_v33  ;;  %v2255_v61 = vld [vmem:[#allocation2 + $0x19c] sm:$0xff]  ;;  %v5805_v53 = vmax.f32 %v2212_v55, %v2252_v60  ;;  %v2329_v28 = vmax.f32 %v5774_v54, %v5803_v47 }
 0x17c   : > { %v2136_v26 = vmax.f32 %v2056_v63, %v5735_v10  ;;  %v1053_v31 = vld [vmem:[#allocation2 + $0x81] sm:$0xff]  ;;  %v2293_v50 = vmax.f32 %v2213_v25, %v2253_v21  ;;  %v4267_v63 = vld [vmem:[#allocation8 + $0x98] sm:$0xff]  ;;  %v2359_v21 = vmax.f32 %v2327_v58, %v5803_v47 }
 0x17d   : > { %v2256_v41 = vld [vmem:[#allocation2 + $0x1a4] sm:$0xff]  ;;  %v1093_v37 = vmax.f32 %v5789_v5, %v1053_v31  ;;  %v2294_v18 = vmax.f32 %v2214_v24, %v2254_v29  ;;  %v2295_v32 = vmax.f32 %v2215_v7, %v2255_v61  ;;  %v2330_v30 = vmax.f32 %v5791_v3, %v5805_v53  ;;  %2626 = vmatpush.bf16.msrb.mxu3 %v4267_v63  ;;  %v4275_v24 = vld [vmem:[#allocation8 + $0xd8] sm:$0xff] }
 0x17e   : > { %v2216_v20 = vmax.f32 %v2136_v26, %v2176_v0  ;;  %v4276_v51 = vld [vmem:[#allocation8 + $0xe0] sm:$0xff]  ;;  %v2331_v60 = vmax.f32 %v5803_v47, %v2293_v50  ;;  %v2360_v25 = vmax.f32 %v2328_v4, %v5805_v53  ;;  %v2361_v5 = vmax.f32 %v2329_v28, %v2293_v50  ;;  %v4266_v26 = vld [vmem:[#allocation8 + $0x90] sm:$0xff] }
 0x17f   : > { %v2332_v31 = vmax.f32 %v5805_v53, %v2294_v18  ;;  %v2389_v29 = vmax.f32 %v5786_v39, %v5803_v47  ;;  %v2362_v0 = vmax.f32 %v2330_v30, %v2294_v18  ;;  %v2390_v16 = vmax.f32 %v2358_v46, %v5805_v53  ;;  %3459 = vmatpush.bf16.msrb.mxu0 %v4276_v51  ;;  %v7385_v46 = vld [vmem:[#allocation47_spill] sm:$0xff] }
 0x180   : > { %v2296_v33 = vmax.f32 %v2216_v20, %v2256_v41  ;;  %v2363_v15 = vmax.f32 %v2331_v60, %v2295_v32  ;;  %v2391_v55 = vmax.f32 %v2359_v21, %v2293_v50  ;;  %v2392_v58 = vmax.f32 %v2360_v25, %v2294_v18  ;;  %v1212_v41 = vld [vmem:[#allocation2 + $0x7b] sm:$0xff]  ;;  %v1213_v60 = vld [vmem:[#allocation2 + $0x83] sm:$0xff]  ;;  %v1945_v21 = vld [vmem:[#allocation2 + $0x30] sm:$0xff] }
 0x181   : > { %v2393_v61 = vmax.f32 %v2361_v5, %v2295_v32  ;;  %v2421_v4 = vmax.f32 %v2389_v29, %v2293_v50  ;;  %v2422_v10 = vmax.f32 %v2390_v16, %v2294_v18  ;;  %v1173_v51 = vmax.f32 %v1093_v37, %v7385_v46  ;;  %2627 = vmatpush.bf16.msrb.mxu3 %v4266_v26  ;;  %v4274_v5 = vld [vmem:[#allocation8 + $0xd0] sm:$0xff]  ;;  %v1292_v29 = vld [vmem:[#allocation2 + $0x7c] sm:$0xff] }
 0x182   : > { %v2364_v7 = vmax.f32 %v2332_v31, %v2296_v33  ;;  %v2394_v20 = vmax.f32 %v2362_v0, %v2296_v33  ;;  %v2395_v28 = vmax.f32 %v2363_v15, %v5503_v11  ;;  %v2423_v44 = vmax.f32 %v2391_v55, %v2295_v32  ;;  %v1985_v31 = vld [vmem:[#allocation2 + $0x31] sm:$0xff]  ;;  %v4265_v32 = vld [vmem:[#allocation8 + $0x88] sm:$0xff]  ;;  %v1986_v55 = vld [vmem:[#allocation2 + $0x39] sm:$0xff] }
 0x183   : > { %v2424_v63 = vmax.f32 %v2392_v58, %v2296_v33  ;;  %v2425_v30 = vmax.f32 %v2393_v61, %v5503_v11  ;;  %2767 = vst [vmem:[#allocation2 + $0x152] sm:$0xff] %v2421_v4  ;;  %v1252_v50 = vmax.f32 %v5748_v22, %v1212_v41  ;;  %v1428_v18 = vmax.f32 %v5727_v57, %v5619_v23  ;;  %v1214_v33 = vld [vmem:[#allocation2 + $0x93] sm:$0xff]  ;;  %v1293_v15 = vld [vmem:[#allocation2 + $0x84] sm:$0xff] }
 0x184   : > { %v2396_v39 = vmax.f32 %v2364_v7, %v5689_v56  ;;  %v2426_v25 = vmax.f32 %v2394_v20, %v5689_v56  ;;  %2768 = vst [vmem:[#allocation2 + $0x15a] sm:$0xff] %v2422_v10  ;;  %3460 = vmatpush.bf16.msrb.mxu0 %v4275_v24  ;;  %v2427_v11 = vmax.f32 %v2395_v28, %v5519_v19  ;;  %v4264_v7 = vld [vmem:[#allocation8 + $0x80] sm:$0xff]  ;;  %v4273_v4 = vld [vmem:[#allocation8 + $0xc8] sm:$0xff]  ;;  %v7388_v46 = vld [vmem:[#allocation35_spill] sm:$0xff] }
 0x185   : > { %2769 = vst [vmem:[#allocation2 + $0x16a] sm:$0xff] %v2423_v44  ;;  %v1253_v37 = vmax.f32 %v1173_v51, %v1213_v60  ;;  %v7386_v56 = vmax.f32 %v5729_v42, %v5731_v35  ;;  %v7387_v22 = vmax.f32 %v5741_v62, %v5743_v40  ;;  %v5839_v16 = vmax.f32 %v1252_v50, %v1292_v29  ;;  %v1946_v44 = vld [vmem:[#allocation2 + $0x38] sm:$0xff] }
 0x186   : > { %v2428_v0 = vmax.f32 %v2396_v39, %v5700_v9  ;;  %2770 = vst [vmem:[#allocation2 + $0x172] sm:$0xff] %v2424_v63  ;;  %v1366_v19 = vmax.f32 %v5564_v49, %v5576_v36  ;;  %v2025_v26 = vmax.f32 %v1945_v21, %v1985_v31  ;;  %v1215_v35 = vld [vmem:[#allocation2 + $0x9b] sm:$0xff]  ;;  %v1367_v9 = vmax.f32 %v5566_v52, %v5599_v34 }
 0x187   : > { %v1174_v10 = vmax.f32 %v7386_v56, %v5586_v8  ;;  %v1175_v57 = vmax.f32 %v7387_v22, %v5590_v43  ;;  %2771 = vst [vmem:[#allocation2 + $0x182] sm:$0xff] %v2425_v30  ;;  %v5843_v42 = vmax.f32 %v1253_v37, %v1293_v15  ;;  %v1429_v8 = vmax.f32 %v5739_v13, %v5630_v12  ;;  %v1294_v40 = vld [vmem:[#allocation2 + $0x94] sm:$0xff]  ;;  %v1295_v63 = vld [vmem:[#allocation2 + $0x9c] sm:$0xff] }
 0x188   : > { %2772 = vst [vmem:[#allocation2 + $0x18a] sm:$0xff] %v2426_v25  ;;  %v5850_v62 = vmax.f32 %v1428_v18, %v5839_v16  ;;  %2628 = vmatpush.bf16.msrb.mxu3 %v4265_v32  ;;  %v1398_v24 = vmax.f32 %v1366_v19, %v5619_v23  ;;  %3461 = vmatpush.bf16.msrb.mxu0 %v4274_v5  ;;  %v2145_v30 = vld [vmem:[#allocation2 + $0x33] sm:$0xff]  ;;  %v795_v51 = vadd.f32 1.0, %v7388_v46  ;;  %v7389_v18 = vld [vmem:[#allocation17_spill] sm:$0xff]  ;;  %v7390_v32 = vld [vmem:[#allocation30_spill] sm:$0xff]  ;;  %v796_v37 = vadd.f32 1.0, %v5783_v6 }
 0x189   : > { %v1254_v43 = vmax.f32 %v1174_v10, %v1214_v33  ;;  %v1255_v49 = vmax.f32 %v1175_v57, %v1215_v35  ;;  %2773 = vst [vmem:[#allocation2 + $0x19a] sm:$0xff] %v2427_v11  ;;  %v5854_v58 = vmax.f32 %v1429_v8, %v5843_v42  ;;  %v2026_v61 = vmax.f32 %v1946_v44, %v1986_v55  ;;  %v1016_v5 = vld [vmem:[#allocation2 + $0xa8] sm:$0xff]  ;;  %v7391_v10 = vld [vmem:[#allocation21_spill] sm:$0xff]  ;;  %v7392_v22 = vld [vmem:[#allocation43_spill] sm:$0xff] }
 0x18a   : > { %2774 = vst [vmem:[#allocation2 + $0x1a2] sm:$0xff] %v2428_v0  ;;  %v1492_v52 = vpack.c.bf16 %v5850_v62, %v5850_v62  ;;  %v1399_v41 = vmax.f32 %v1367_v9, %v5630_v12  ;;  %v1430_v20 = vmax.f32 %v1398_v24, %v5839_v16  ;;  %v2105_v28 = vmax.f32 %v2025_v26, %v5667_v2  ;;  %v1056_v11 = vld [vmem:[#allocation2 + $0xa9] sm:$0xff]  ;;  %v1057_v0 = vld [vmem:[#allocation2 + $0xb1] sm:$0xff]  ;;  %v2146_v6 = vld [vmem:[#allocation2 + $0x3b] sm:$0xff] }
 0x18b   : > { %v5856_v13 = vmax.f32 %v1254_v43, %v1294_v40  ;;  %v1493_v39 = vpack.c.bf16 %v5854_v58, %v5854_v58  ;;  %1911 = vst [vmem:[#allocation2 + $0x4a] sm:$0xff] %v5850_v62  ;;  %v5868_v60 = vmax.f32 %v1255_v49, %v1295_v63  ;;  %v2106_v50 = vmax.f32 %v2026_v61, %v5682_v38  ;;  %v1017_v38 = vld [vmem:[#allocation2 + $0xb0] sm:$0xff]  ;;  %v4272_v9 = vld [vmem:[#allocation8 + $0xc0] sm:$0xff] }
 0x18c   : > { %1912 = vst [vmem:[#allocation2 + $0x52] sm:$0xff] %v5854_v58  ;;  %v1431_v21 = vmax.f32 %v1399_v41, %v5843_v42  ;;  %2629 = vmatpush.bf16.msrb.mxu3 %v4264_v7  ;;  %v1573_v2 = vunpack.c.l.b16 %v1492_v52  ;;  %v5877_v33 = vmul.f32 %v7390_v32, %v7389_v18  ;;  %3462 = vmatpush.bf16.msrb.mxu0 %v4273_v4  ;;  %4505 = vrcp.f32 %v795_v51  ;;  %v2225_v35 = vld [vmem:[#allocation2 + $0x34] sm:$0xff] }
 0x18d   : > { %v5872_v31 = vmax.f32 %v1430_v20, %v5856_v13  ;;  %v1574_v25 = vunpack.c.l.b16 %v1493_v39  ;;  %v2185_v56 = vmax.f32 %v2105_v28, %v2145_v30  ;;  %v5886_v57 = vmul.f32 %v7392_v22, %v7391_v10  ;;  %v2226_v28 = vld [vmem:[#allocation2 + $0x3c] sm:$0xff] }
 0x18e   : > { %v5881_v29 = vmax.f32 %v1431_v21, %v5868_v60  ;;  %v1370_v15 = vmax.f32 %v5619_v23, %v5839_v16  ;;  %v1371_v19 = vmax.f32 %v5630_v12, %v5843_v42  ;;  %982 = vst [vmem:[#allocation2 + $0xc2] sm:$0xff] %v5877_v33  ;;  %v2186_v55 = vmax.f32 %v2106_v50, %v2146_v6 }
 0x18f   : > { %1913 = vst [vmem:[#allocation2 + $0x62] sm:$0xff] %v5872_v31  ;;  %v1604_v44 = vpack.c.b16 %v1574_v25, %v1573_v2  ;;  %v883_v26 = vpack.c.bf16 %v5886_v57, %v5877_v33  ;;  %v1096_v8 = vmax.f32 %v1016_v5, %v1056_v11  ;;  %v1097_v43 = vmax.f32 %v1017_v38, %v1057_v0  ;;  %v1216_v2 = vld [vmem:[#allocation2 + $0xab] sm:$0xff] }
 0x190   : > { %1914 = vst [vmem:[#allocation2 + $0x6a] sm:$0xff] %v5881_v29  ;;  %4507 = vrcp.f32 %v796_v37  ;;  %v1495_v49 = vpack.c.bf16 %v5881_v29, %v5881_v29  ;;  %v5899_v7 = vmax.f32 %v2185_v56, %v2225_v35  ;;  %v5902_v61 = vmax.f32 %v1370_v15, %v5856_v13  ;;  %3463 = vmatpush.bf16.msrb.mxu0 %v4272_v9  ;;  %v1217_v35 = vld [vmem:[#allocation2 + $0xb3] sm:$0xff] }
 0x191   : > { %1696 = vmatmul.bf16.gmra.mxu1 %v1604_v44  ;;  %983 = vst [vmem:[#allocation2 + $0xca] sm:$0xff] %v5886_v57  ;;  %1858 = vmatmul.bf16.gmra.mxu2 %v883_v26  ;;  %v5905_v4 = vmax.f32 %v1371_v19, %v5868_v60  ;;  %v1368_v39 = vmax.f32 %v5576_v36, %v5619_v23 }
 0x192   : > { %v1947_v40 = vld [vmem:[#allocation2 + $0x48] sm:$0xff]  ;;  %v1494_v63 = vpack.c.bf16 %v5872_v31, %v5872_v31  ;;  %v5911_v51 = vmax.f32 %v2186_v55, %v2226_v28  ;;  %v1176_v21 = vmax.f32 %v1096_v8, %v5758_v17  ;;  %v1177_v32 = vmax.f32 %v1097_v43, %v5764_v45  ;;  %v5924_v38 = vpop.eup %4505 }
 0x193   : > { %v1987_v24 = vld [vmem:[#allocation2 + $0x49] sm:$0xff]  ;;  %v1988_v41 = vld [vmem:[#allocation2 + $0x51] sm:$0xff]  ;;  %v1369_v36 = vmax.f32 %v5599_v34, %v5630_v12  ;;  %v1400_v23 = vmax.f32 %v1368_v39, %v5839_v16  ;;  %v5919_v5 = vunpack.c.l.b16 %v1495_v49  ;;  %v2333_v17 = vmax.f32 %v5579_v14, %v5899_v7 }
 0x194   : > { %v1948_v52 = vld [vmem:[#allocation2 + $0x50] sm:$0xff]  ;;  %v2027_v20 = vmax.f32 %v1947_v40, %v1987_v24  ;;  %v1256_v12 = vmax.f32 %v1176_v21, %v1216_v2  ;;  %v2334_v14 = vmax.f32 %v5582_v27, %v5911_v51 }
 0x195   : > { %v2028_v30 = vmax.f32 %v1948_v52, %v1988_v41  ;;  %v2147_v46 = vld [vmem:[#allocation2 + $0x4b] sm:$0xff]  ;;  %v2148_v56 = vld [vmem:[#allocation2 + $0x53] sm:$0xff]  ;;  %v1018_v10 = vld [vmem:[#allocation2 + $0xc0] sm:$0xff]  ;;  %v1401_v19 = vmax.f32 %v1369_v36, %v5843_v42  ;;  %v1257_v52 = vmax.f32 %v1177_v32, %v1217_v35  ;;  %v1432_v41 = vmax.f32 %v1400_v23, %v5856_v13 }
 0x196   : > { %v1949_v25 = vld [vmem:[#allocation2 + $0x60] sm:$0xff]  ;;  %v2107_v18 = vmax.f32 %v2027_v20, %v5850_v62  ;;  %v4508_v44 = vpop.eup %4507  ;;  %v2227_v26 = vld [vmem:[#allocation2 + $0x4c] sm:$0xff]  ;;  %v2228_v8 = vld [vmem:[#allocation2 + $0x54] sm:$0xff] }
 0x197   : > { %v1989_v50 = vld [vmem:[#allocation2 + $0x61] sm:$0xff]  ;;  %v2108_v37 = vmax.f32 %v2028_v30, %v5854_v58  ;;  %v1990_v45 = vld [vmem:[#allocation2 + $0x69] sm:$0xff]  ;;  %v1297_v36 = vld [vmem:[#allocation2 + $0xb4] sm:$0xff] }
 0x198   : > { %v2029_v11 = vmax.f32 %v1949_v25, %v1989_v50  ;;  %v1058_v22 = vld [vmem:[#allocation2 + $0xc1] sm:$0xff]  ;;  %v2187_v15 = vmax.f32 %v2107_v18, %v2147_v46  ;;  %v1059_v49 = vld [vmem:[#allocation2 + $0xc9] sm:$0xff]  ;;  %v1575_v50 = vunpack.c.l.b16 %v1494_v63  ;;  %v7394_v35 = vld [vmem:[#allocation28_spill] sm:$0xff] }
 0x199   : > { %v1950_v62 = vld [vmem:[#allocation2 + $0x68] sm:$0xff]  ;;  %v1098_v34 = vmax.f32 %v1018_v10, %v1058_v22  ;;  %v2188_v55 = vmax.f32 %v2108_v37, %v2148_v56  ;;  %v5945_v37 = vmax.f32 %v1257_v52, %v1297_v36 }
 0x19a   : > { %v2149_v0 = vld [vmem:[#allocation2 + $0x63] sm:$0xff]  ;;  %v2030_v6 = vmax.f32 %v1950_v62, %v1990_v45  ;;  %v2109_v58 = vmax.f32 %v2029_v11, %v5872_v31  ;;  %v5930_v43 = vmax.f32 %v2187_v15, %v2227_v26  ;;  %v1296_v30 = vld [vmem:[#allocation2 + $0xac] sm:$0xff]  ;;  %v1605_v10 = vpack.c.b16 %v5919_v5, %v1575_v50 }
 0x19b   : > { %v1019_v9 = vld [vmem:[#allocation2 + $0xc8] sm:$0xff]  ;;  %v1178_v40 = vmax.f32 %v1098_v34, %v5877_v33  ;;  %v5935_v28 = vmax.f32 %v2188_v55, %v2228_v8  ;;  %v5938_v25 = vmax.f32 %v1256_v12, %v1296_v30  ;;  %v1433_v33 = vmax.f32 %v1401_v19, %v5868_v60  ;;  %v7393_v8 = vld [vmem:[#allocation24_spill] sm:$0xff] }
 0x19c   : > { %v1218_v24 = vld [vmem:[#allocation2 + $0xc3] sm:$0xff]  ;;  %v2110_v20 = vmax.f32 %v2030_v6, %v5881_v29  ;;  %v2189_v31 = vmax.f32 %v2109_v58, %v2149_v0  ;;  %v1099_v39 = vmax.f32 %v1019_v9, %v1059_v49  ;;  %v2150_v46 = vld [vmem:[#allocation2 + $0x6b] sm:$0xff]  ;;  %v2365_v21 = vmax.f32 %v2333_v17, %v5930_v43 }
 0x19d   : > { %v2229_v27 = vld [vmem:[#allocation2 + $0x64] sm:$0xff]  ;;  %v1258_v2 = vmax.f32 %v1178_v40, %v1218_v24  ;;  %v2366_v29 = vmax.f32 %v2334_v14, %v5935_v28  ;;  %v2230_v23 = vld [vmem:[#allocation2 + $0x6c] sm:$0xff]  ;;  %v1434_v56 = vmax.f32 %v5902_v61, %v5938_v25  ;;  %v1464_v17 = vmax.f32 %v1432_v41, %v5938_v25 }
 0x19e   : > { %v2190_v18 = vmax.f32 %v2110_v20, %v2150_v46  ;;  %v5941_v32 = vmax.f32 %v2189_v31, %v2229_v27  ;;  %v1179_v11 = vmax.f32 %v1099_v39, %v5886_v57  ;;  %v1219_v62 = vld [vmem:[#allocation2 + $0xcb] sm:$0xff]  ;;  %v1435_v57 = vmax.f32 %v5905_v4, %v5945_v37 }
 0x19f   : > { %v1298_v45 = vld [vmem:[#allocation2 + $0xc4] sm:$0xff]  ;;  %v1465_v34 = vmax.f32 %v1433_v33, %v5945_v37  ;;  %1915 = vst [vmem:[#allocation2 + $0x7a] sm:$0xff] %v1464_v17  ;;  %v1299_v12 = vld [vmem:[#allocation2 + $0xcc] sm:$0xff]  ;;  %v5982_v14 = vmul.f32 %v5924_v38, %v7393_v8  ;;  %v5985_v9 = vmul.f32 %v4508_v44, %v7394_v35  ;;  %v2305_v38 = vmax.f32 %v5899_v7, %v5930_v43 }
 0x1a0   : > { %v5951_v22 = vmax.f32 %v2190_v18, %v2230_v23  ;;  %v5954_v63 = vmax.f32 %v2365_v21, %v5941_v32  ;;  %v1259_v0 = vmax.f32 %v1179_v11, %v1219_v62  ;;  %v5956_v15 = vmax.f32 %v1258_v2, %v1298_v45  ;;  %v7395_v20 = vld [vmem:[#allocation50_spill] sm:$0xff]  ;;  %v7396_v33 = vld [vmem:[#allocation51_spill] sm:$0xff] }
 0x1a1   : > { %1701 = vmatmul.bf16.gmra.mxu1 %v1605_v10  ;;  %1916 = vst [vmem:[#allocation2 + $0x82] sm:$0xff] %v1465_v34  ;;  %v1497_v52 = vpack.c.bf16 %v1465_v34, %v1465_v34  ;;  %v2303_v31 = vmax.f32 %v7395_v20, %v5899_v7  ;;  %v884_v39 = vpack.c.bf16 %v5985_v9, %v5982_v14 }
 0x1a2   : > { %v5962_v61 = vmax.f32 %v2366_v29, %v5951_v22  ;;  %v2429_v5 = vpack.c.bf16 %v5954_v63, %v5954_v63  ;;  %2743 = vst [vmem:[#allocation2 + $0x32] sm:$0xff] %v5954_v63  ;;  %v5967_v19 = vmax.f32 %v1259_v0, %v1299_v12  ;;  %v5970_v6 = vmax.f32 %v1434_v56, %v5956_v15 }
 0x1a3   : > { %984 = vst [vmem:[#allocation2 + $0xda] sm:$0xff] %v5982_v14  ;;  %v1496_v44 = vpack.c.bf16 %v1464_v17, %v1464_v17  ;;  %v2335_v46 = vmax.f32 %v2303_v31, %v5930_v43  ;;  %1863 = vmatmul.bf16.gmra.mxu2 %v884_v39  ;;  %v2304_v50 = vmax.f32 %v7396_v33, %v5911_v51  ;;  %v1578_v29 = vunpack.c.l.b16 %v1497_v52 }
 0x1a4   : > { %v2430_v4 = vpack.c.bf16 %v5962_v61, %v5962_v61  ;;  %2744 = vst [vmem:[#allocation2 + $0x3a] sm:$0xff] %v5962_v61  ;;  %v5976_v58 = vmax.f32 %v1435_v57, %v5967_v19  ;;  %v2510_v55 = vunpack.c.l.b16 %v2429_v5  ;;  %v2306_v18 = vmax.f32 %v5911_v51, %v5935_v28 }
 0x1a5   : > { %1917 = vst [vmem:[#allocation2 + $0x92] sm:$0xff] %v5970_v6  ;;  %v2337_v56 = vmax.f32 %v2305_v38, %v5941_v32  ;;  %v2336_v45 = vmax.f32 %v2304_v50, %v5935_v28  ;;  %v1577_v0 = vunpack.c.l.b16 %v1496_v44 }
 0x1a6   : > { %v2511_v26 = vunpack.c.l.b16 %v2430_v4  ;;  %1918 = vst [vmem:[#allocation2 + $0x9a] sm:$0xff] %v5976_v58  ;;  %v1951_v40 = vld [vmem:[#allocation2 + $0x78] sm:$0xff]  ;;  %v2338_v35 = vmax.f32 %v2306_v18, %v5951_v22 }
 0x1a7   : > { %v1991_v24 = vld [vmem:[#allocation2 + $0x79] sm:$0xff]  ;;  %985 = vst [vmem:[#allocation2 + $0xe2] sm:$0xff] %v5985_v9  ;;  %v2368_v38 = vmax.f32 %v2336_v45, %v5951_v22 }
 0x1a8   : > { %v2542_v49 = vpack.c.b16 %v2511_v26, %v2510_v55  ;;  %v2031_v41 = vmax.f32 %v1951_v40, %v1991_v24  ;;  %v1952_v27 = vld [vmem:[#allocation2 + $0x80] sm:$0xff]  ;;  %v2367_v55 = vmax.f32 %v2335_v46, %v5941_v32 }
 0x1a9   : > { %v1992_v21 = vld [vmem:[#allocation2 + $0x81] sm:$0xff] }
 0x1aa   : > { %2630 = vmatmul.bf16.vlgmr.msrb.gmra.mxu3 %v2542_v49  ;;  %v2111_v30 = vmax.f32 %v2031_v41, %v1464_v17  ;;  %v2151_v2 = vld [vmem:[#allocation2 + $0x7b] sm:$0xff]  ;;  %v2032_v23 = vmax.f32 %v1952_v27, %v1992_v21  ;;  %v2152_v26 = vld [vmem:[#allocation2 + $0x83] sm:$0xff]  ;;  %v1606_v49 = vpack.c.b16 %v1578_v29, %v1577_v0  ;;  %v1373_v29 = vmax.f32 %v5843_v42, %v5868_v60 }
 0x1ab   : > { %v2231_v4 = vld [vmem:[#allocation2 + $0x7c] sm:$0xff]  ;;  %v2232_v39 = vld [vmem:[#allocation2 + $0x84] sm:$0xff] }
 0x1ac   : > { %v1953_v36 = vld [vmem:[#allocation2 + $0x90] sm:$0xff]  ;;  %v2191_v11 = vmax.f32 %v2111_v30, %v2151_v2  ;;  %v2112_v5 = vmax.f32 %v2032_v23, %v1465_v34  ;;  %v1020_v41 = vld [vmem:[#allocation2 + $0xd8] sm:$0xff]  ;;  %v1372_v34 = vmax.f32 %v5839_v16, %v5856_v13 }
 0x1ad   : > { %v1993_v7 = vld [vmem:[#allocation2 + $0x91] sm:$0xff]  ;;  %v1994_v10 = vld [vmem:[#allocation2 + $0x99] sm:$0xff] }
 0x1ae   : > { %v1954_v17 = vld [vmem:[#allocation2 + $0x98] sm:$0xff]  ;;  %v2033_v62 = vmax.f32 %v1953_v36, %v1993_v7  ;;  %v6004_v8 = vmax.f32 %v2191_v11, %v2231_v4  ;;  %v2192_v52 = vmax.f32 %v2112_v5, %v2152_v26  ;;  %v1021_v44 = vld [vmem:[#allocation2 + $0xe0] sm:$0xff]  ;;  %v1405_v5 = vmax.f32 %v1373_v29, %v5945_v37 }
 0x1af   : > { %v2034_v57 = vmax.f32 %v1954_v17, %v1994_v10  ;;  %v2153_v12 = vld [vmem:[#allocation2 + $0x93] sm:$0xff]  ;;  %v2154_v24 = vld [vmem:[#allocation2 + $0x9b] sm:$0xff]  ;;  %v1375_v26 = vmax.f32 %v5868_v60, %v5945_v37  ;;  %v1377_v60 = vmax.f32 %v5945_v37, %v5967_v19 }
 0x1b0   : > { %v2113_v51 = vmax.f32 %v2033_v62, %v5970_v6  ;;  %v1060_v20 = vld [vmem:[#allocation2 + $0xd9] sm:$0xff]  ;;  %v1061_v30 = vld [vmem:[#allocation2 + $0xe1] sm:$0xff]  ;;  %v6011_v21 = vmax.f32 %v2192_v52, %v2232_v39  ;;  %v2369_v2 = vmax.f32 %v2337_v56, %v6004_v8  ;;  %v6015_v33 = vmax.f32 %v2367_v55, %v6004_v8 }
 0x1b1   : > { %v2114_v40 = vmax.f32 %v2034_v57, %v5976_v58  ;;  %1706 = vmatmul.bf16.gmra.mxu1 %v1606_v49  ;;  %v2233_v27 = vld [vmem:[#allocation2 + $0x94] sm:$0xff]  ;;  %v2234_v50 = vld [vmem:[#allocation2 + $0x9c] sm:$0xff]  ;;  %v1100_v16 = vmax.f32 %v1020_v41, %v1060_v20  ;;  %v1101_v23 = vmax.f32 %v1021_v44, %v1061_v30  ;;  %v1404_v56 = vmax.f32 %v1372_v34, %v5938_v25 }
 0x1b2   : > { %v2193_v31 = vmax.f32 %v2113_v51, %v2153_v12  ;;  %v2370_v7 = vmax.f32 %v2338_v35, %v6011_v21  ;;  %2745 = vst [vmem:[#allocation2 + $0x4a] sm:$0xff] %v6015_v33  ;;  %v6026_v11 = vmax.f32 %v2368_v38, %v6011_v21  ;;  %v1220_v10 = vld [vmem:[#allocation2 + $0xdb] sm:$0xff]  ;;  %v2431_v42 = vpack.c.bf16 %v6015_v33, %v6015_v33  ;;  %v4638_v4 = vld [vmem:[#allocation2 + $0xf2] sm:$0xff] }
 0x1b3   : > { %v2194_v46 = vmax.f32 %v2114_v40, %v2154_v24  ;;  %v1180_v0 = vmax.f32 %v1100_v16, %v5982_v14  ;;  %v1374_v57 = vmax.f32 %v5856_v13, %v5938_v25  ;;  %v1181_v12 = vmax.f32 %v1101_v23, %v5985_v9  ;;  %v4639_v55 = vld [vmem:[#allocation2 + $0xfa] sm:$0xff]  ;;  %v1221_v14 = vld [vmem:[#allocation2 + $0xe3] sm:$0xff] }
 0x1b4   : > { %v6017_v18 = vmax.f32 %v2193_v31, %v2233_v27  ;;  %v2432_v45 = vpack.c.bf16 %v6026_v11, %v6026_v11  ;;  %2746 = vst [vmem:[#allocation2 + $0x52] sm:$0xff] %v6026_v11  ;;  %v885_v51 = vpack.c.bf16 %v4639_v55, %v4638_v4  ;;  %v2512_v35 = vunpack.c.l.b16 %v2431_v42  ;;  %v1300_v41 = vld [vmem:[#allocation2 + $0xdc] sm:$0xff]  ;;  %v1301_v31 = vld [vmem:[#allocation2 + $0xe4] sm:$0xff] }
 0x1b5   : > { %v6021_v36 = vmax.f32 %v2194_v46, %v2234_v50  ;;  %v1260_v40 = vmax.f32 %v1180_v0, %v1220_v10  ;;  %v2307_v13 = vmax.f32 %v5930_v43, %v5941_v32  ;;  %v1376_v24 = vmax.f32 %v5938_v25, %v5956_v15  ;;  %v7397_v46 = vld [vmem:[#allocation31_spill] sm:$0xff]  ;;  %v7398_v16 = vld [vmem:[#allocation32_spill] sm:$0xff]  ;;  %v7399_v10 = vld [vmem:[#allocation38_spill] sm:$0xff] }
 0x1b6   : > { %v6030_v17 = vmax.f32 %v2369_v2, %v6017_v18  ;;  %v2513_v49 = vunpack.c.l.b16 %v2432_v45  ;;  %v1406_v9 = vmax.f32 %v1374_v57, %v5956_v15  ;;  %v1261_v52 = vmax.f32 %v1181_v12, %v1221_v14  ;;  %1868 = vmatmul.bf16.gmra.mxu2 %v885_v51  ;;  %v7400_v0 = vld [vmem:[#allocation39_spill] sm:$0xff]  ;;  %v7401_v4 = vld [vmem:[#allocation45_spill] sm:$0xff] }
 0x1b7   : > { %v6033_v62 = vmax.f32 %v2370_v7, %v6021_v36  ;;  %v1436_v20 = vmax.f32 %v1404_v56, %v5956_v15  ;;  %v1340_v39 = vmax.f32 %v1260_v40, %v1300_v41  ;;  %v1407_v38 = vmax.f32 %v1375_v26, %v5967_v19 }
 0x1b8   : > { %2747 = vst [vmem:[#allocation2 + $0x62] sm:$0xff] %v6030_v17  ;;  %v2543_v34 = vpack.c.b16 %v2513_v49, %v2512_v35  ;;  %v1437_v43 = vmax.f32 %v1405_v5, %v5967_v19  ;;  %v1341_v44 = vmax.f32 %v1261_v52, %v1301_v31  ;;  %v1498_v25 = vpack.c.bf16 %v5970_v6, %v5970_v6  ;;  %v7402_v49 = vld [vmem:[#allocation46_spill] sm:$0xff]  ;;  %v7405_v31 = vld [vmem:[#allocation13_spill] sm:$0xff] }
 0x1b9   : > { %2748 = vst [vmem:[#allocation2 + $0x6a] sm:$0xff] %v6033_v62  ;;  %v1378_v30 = vmax.f32 %v5956_v15, %v1340_v39  ;;  %v1380_v27 = vmax.f32 %v1340_v39, %v7397_v46  ;;  %v1408_v2 = vmax.f32 %v1376_v24, %v1340_v39  ;;  %v1438_v37 = vmax.f32 %v1406_v9, %v1340_v39 }
 0x1ba   : > { %2635 = vmatmul.bf16.gmra.mxu3 %v2543_v34  ;;  %v1379_v50 = vmax.f32 %v5967_v19, %v1341_v44  ;;  %v1381_v29 = vmax.f32 %v1341_v44, %v7398_v16  ;;  %v1409_v7 = vmax.f32 %v1377_v60, %v1341_v44  ;;  %v1439_v23 = vmax.f32 %v1407_v38, %v1341_v44 }
 0x1bb   : > { %v1410_v56 = vmax.f32 %v1378_v30, %v7397_v46  ;;  %v1412_v42 = vmax.f32 %v1380_v27, %v7399_v10  ;;  %v1440_v45 = vmax.f32 %v1408_v2, %v7397_v46  ;;  %v6068_v6 = vmax.f32 %v1436_v20, %v1340_v39 }
 0x1bc   : > { %v1411_v15 = vmax.f32 %v1379_v50, %v7398_v16  ;;  %v1413_v57 = vmax.f32 %v1381_v29, %v7400_v0  ;;  %v1441_v5 = vmax.f32 %v1409_v7, %v7398_v16  ;;  %v6073_v12 = vmax.f32 %v1437_v43, %v1341_v44  ;;  %v7407_v43 = vld [vmem:[#allocation18_spill] sm:$0xff]  ;;  %v4641_v7 = vld [vmem:[#allocation2 + $0x112] sm:$0xff] }
 0x1bd   : > { %v1442_v19 = vmax.f32 %v1410_v56, %v7399_v10  ;;  %v1444_v55 = vmax.f32 %v1412_v42, %v7401_v4  ;;  %v6078_v51 = vmax.f32 %v1438_v37, %v7397_v46  ;;  %v6081_v26 = vmax.f32 %v1439_v23, %v7398_v16  ;;  %1919 = vst [vmem:[#allocation2 + $0xaa] sm:$0xff] %v6068_v6  ;;  %v4640_v29 = vld [vmem:[#allocation2 + $0x10a] sm:$0xff] }
 0x1be   : > { %v1443_v35 = vmax.f32 %v1411_v15, %v7400_v0  ;;  %v1445_v14 = vmax.f32 %v1413_v57, %v7402_v49  ;;  %v6087_v40 = vmax.f32 %v1440_v45, %v7399_v10  ;;  %v6090_v24 = vmax.f32 %v1441_v5, %v7400_v0  ;;  %1920 = vst [vmem:[#allocation2 + $0xb2] sm:$0xff] %v6073_v12 }
 0x1bf   : > { %v2308_v9 = vmax.f32 %v5935_v28, %v5951_v22  ;;  %v6096_v52 = vmax.f32 %v1442_v19, %v7401_v4  ;;  %1921 = vst [vmem:[#allocation2 + $0xc2] sm:$0xff] %v6078_v51  ;;  %v1499_v41 = vpack.c.bf16 %v5976_v58, %v5976_v58  ;;  %v2309_v60 = vmax.f32 %v5941_v32, %v6004_v8 }
 0x1c0   : > { %v6104_v20 = vmax.f32 %v2307_v13, %v6004_v8  ;;  %v6107_v34 = vmax.f32 %v1443_v35, %v7402_v49  ;;  %1922 = vst [vmem:[#allocation2 + $0xca] sm:$0xff] %v6081_v26  ;;  %v1501_v28 = vpack.c.bf16 %v6073_v12, %v6073_v12  ;;  %v6113_v39 = vmax.f32 %v1444_v55, %v7405_v31 }
 0x1c1   : > { %7403 = vst [vmem:[#allocation15_spill] sm:$0xff] %v6096_v52  ;;  %v1579_v58 = vunpack.c.l.b16 %v1498_v25  ;;  %v1580_v38 = vunpack.c.l.b16 %v1499_v41  ;;  %v1503_v32 = vpack.c.bf16 %v6081_v26, %v6081_v26  ;;  %v2310_v13 = vmax.f32 %v5951_v22, %v6011_v21 }
 0x1c2   : > { %7404 = vst [vmem:[#allocation20_spill] sm:$0xff] %v6107_v34  ;;  %v6121_v44 = vmax.f32 %v1445_v14, %v7407_v43  ;;  %v1500_v30 = vpack.c.bf16 %v6068_v6, %v6068_v6  ;;  %v6129_v25 = vmax.f32 %v2308_v9, %v6011_v21  ;;  %v1502_v22 = vpack.c.bf16 %v6078_v51, %v6078_v51 }
 0x1c3   : > { %7406 = vst [vmem:[#allocation16_spill] sm:$0xff] %v6113_v39  ;;  %v1607_v27 = vpack.c.b16 %v1580_v38, %v1579_v58  ;;  %v6135_v2 = vmax.f32 %v2309_v60, %v6017_v18  ;;  %v6138_v16 = vunpack.c.l.b16 %v1501_v28  ;;  %v886_v23 = vpack.c.bf16 %v4641_v7, %v4640_v29 }
 0x1c4   : > { %1923 = vst [vmem:[#allocation2 + $0xda] sm:$0xff] %v6087_v40  ;;  %v1955_v37 = vld [vmem:[#allocation2 + $0xa8] sm:$0xff]  ;;  %v1504_v56 = vpack.c.bf16 %v6087_v40, %v6087_v40  ;;  %v6147_v57 = vunpack.c.l.b16 %v1503_v32  ;;  %v6150_v5 = vmax.f32 %v2310_v13, %v6021_v36  ;;  %v6153_v35 = vunpack.c.l.b16 %v1500_v30 }
 0x1c5   : > { %7408 = vst [vmem:[#allocation22_spill] sm:$0xff] %v6121_v44  ;;  %v1995_v50 = vld [vmem:[#allocation2 + $0xa9] sm:$0xff]  ;;  %v1996_v15 = vld [vmem:[#allocation2 + $0xb1] sm:$0xff]  ;;  %1711 = vmatmul.bf16.gmra.mxu1 %v1607_v27  ;;  %v1505_v49 = vpack.c.bf16 %v6090_v24, %v6090_v24  ;;  %v6160_v58 = vunpack.c.l.b16 %v1502_v22  ;;  %v2433_v22 = vpack.c.bf16 %v6030_v17, %v6030_v17 }
 0x1c6   : > { %1924 = vst [vmem:[#allocation2 + $0xe2] sm:$0xff] %v6090_v24  ;;  %v1956_v45 = vld [vmem:[#allocation2 + $0xb0] sm:$0xff]  ;;  %v2035_v0 = vmax.f32 %v1955_v37, %v1995_v50  ;;  %v1957_v19 = vld [vmem:[#allocation2 + $0xc0] sm:$0xff]  ;;  %1873 = vmatmul.bf16.gmra.mxu2 %v886_v23  ;;  %v6165_v37 = vunpack.c.l.b16 %v1504_v56 }
 0x1c7   : > { %1925 = vst [vmem:[#allocation2 + $0xf2] sm:$0xff] %v6096_v52  ;;  %v1997_v4 = vld [vmem:[#allocation2 + $0xc1] sm:$0xff]  ;;  %v2036_v55 = vmax.f32 %v1956_v45, %v1996_v15  ;;  %v1998_v41 = vld [vmem:[#allocation2 + $0xc9] sm:$0xff]  ;;  %v2156_v30 = vld [vmem:[#allocation2 + $0xb3] sm:$0xff]  ;;  %v6173_v56 = vunpack.c.l.b16 %v1505_v49 }
 0x1c8   : > { %1926 = vst [vmem:[#allocation2 + $0xfa] sm:$0xff] %v6107_v34  ;;  %v1958_v9 = vld [vmem:[#allocation2 + $0xc8] sm:$0xff]  ;;  %v2037_v60 = vmax.f32 %v1957_v19, %v1997_v4  ;;  %v2115_v28 = vmax.f32 %v2035_v0, %v6068_v6 }
 0x1c9   : > { %1927 = vst [vmem:[#allocation2 + $0x10a] sm:$0xff] %v6113_v39  ;;  %v2155_v31 = vld [vmem:[#allocation2 + $0xab] sm:$0xff]  ;;  %v2038_v13 = vmax.f32 %v1958_v9, %v1998_v41  ;;  %v2116_v43 = vmax.f32 %v2036_v55, %v6073_v12  ;;  %v2157_v6 = vld [vmem:[#allocation2 + $0xc3] sm:$0xff] }
 0x1ca   : > { %1928 = vst [vmem:[#allocation2 + $0x112] sm:$0xff] %v6121_v44  ;;  %v2117_v23 = vmax.f32 %v2037_v60, %v6078_v51 }
 0x1cb   : > { %v1959_v38 = vld [vmem:[#allocation2 + $0xd8] sm:$0xff]  ;;  %v2118_v19 = vmax.f32 %v2038_v13, %v6081_v26  ;;  %v2196_v14 = vmax.f32 %v2116_v43, %v2156_v30  ;;  %v2235_v30 = vld [vmem:[#allocation2 + $0xac] sm:$0xff] }
 0x1cc   : > { %v1999_v32 = vld [vmem:[#allocation2 + $0xd9] sm:$0xff]  ;;  %v2197_v13 = vmax.f32 %v2117_v23, %v2157_v6 }
 0x1cd   : > { %v1960_v50 = vld [vmem:[#allocation2 + $0xe0] sm:$0xff]  ;;  %v2039_v7 = vmax.f32 %v1959_v38, %v1999_v32  ;;  %v2158_v38 = vld [vmem:[#allocation2 + $0xcb] sm:$0xff]  ;;  %v2195_v32 = vmax.f32 %v2115_v28, %v2155_v31 }
 0x1ce   : > { %v2000_v29 = vld [vmem:[#allocation2 + $0xe1] sm:$0xff]  ;;  %v1961_v15 = vld [vmem:[#allocation2 + $0xf0] sm:$0xff]  ;;  %v2198_v49 = vmax.f32 %v2118_v19, %v2158_v38 }
 0x1cf   : > { %v2001_v12 = vld [vmem:[#allocation2 + $0xf1] sm:$0xff]  ;;  %v2040_v0 = vmax.f32 %v1960_v50, %v2000_v29  ;;  %v2159_v4 = vld [vmem:[#allocation2 + $0xdb] sm:$0xff]  ;;  %v2119_v60 = vmax.f32 %v2039_v7, %v6087_v40  ;;  %v2160_v48 = vld [vmem:[#allocation2 + $0xe3] sm:$0xff]  ;;  %v6186_v19 = vmax.f32 %v2195_v32, %v2235_v30 }
 0x1d0   : > { %v1962_v9 = vld [vmem:[#allocation2 + $0xf8] sm:$0xff]  ;;  %v2041_v41 = vmax.f32 %v1961_v15, %v2001_v12  ;;  %v1963_v45 = vld [vmem:[#allocation2 + $0x108] sm:$0xff]  ;;  %v6180_v12 = vunpack.c.l.b16 %v2433_v22 }
 0x1d1   : > { %v2002_v51 = vld [vmem:[#allocation2 + $0xf9] sm:$0xff]  ;;  %v2003_v42 = vld [vmem:[#allocation2 + $0x109] sm:$0xff]  ;;  %v2120_v50 = vmax.f32 %v2040_v0, %v6090_v24  ;;  %v2004_v27 = vld [vmem:[#allocation2 + $0x111] sm:$0xff]  ;;  %v2199_v15 = vmax.f32 %v2119_v60, %v2159_v4  ;;  %v2434_v24 = vpack.c.bf16 %v6033_v62, %v6033_v62 }
 0x1d2   : > { %v2042_v10 = vmax.f32 %v1962_v9, %v2002_v51  ;;  %v2161_v26 = vld [vmem:[#allocation2 + $0xf3] sm:$0xff]  ;;  %v2043_v46 = vmax.f32 %v1963_v45, %v2003_v42  ;;  %v2121_v55 = vmax.f32 %v2041_v41, %v6096_v52  ;;  %v2163_v31 = vld [vmem:[#allocation2 + $0x10b] sm:$0xff]  ;;  %v2162_v6 = vld [vmem:[#allocation2 + $0xfb] sm:$0xff] }
 0x1d3   : > { %v1964_v29 = vld [vmem:[#allocation2 + $0x110] sm:$0xff]  ;;  %v2200_v43 = vmax.f32 %v2120_v50, %v2160_v48  ;;  %v2237_v45 = vld [vmem:[#allocation2 + $0xc4] sm:$0xff]  ;;  %v2239_v4 = vld [vmem:[#allocation2 + $0xdc] sm:$0xff] }
 0x1d4   : > { %v2044_v40 = vmax.f32 %v1964_v29, %v2004_v27  ;;  %v2122_v28 = vmax.f32 %v2042_v10, %v6107_v34  ;;  %v2236_v7 = vld [vmem:[#allocation2 + $0xb4] sm:$0xff]  ;;  %v2123_v23 = vmax.f32 %v2043_v46, %v6113_v39  ;;  %v2201_v42 = vmax.f32 %v2121_v55, %v2161_v26  ;;  %v2238_v0 = vld [vmem:[#allocation2 + $0xcc] sm:$0xff]  ;;  %v2240_v48 = vld [vmem:[#allocation2 + $0xe4] sm:$0xff] }
 0x1d5   : > { %v6188_v22 = vmax.f32 %v2196_v14, %v2236_v7  ;;  %v2241_v9 = vld [vmem:[#allocation2 + $0xf4] sm:$0xff]  ;;  %v6191_v51 = vmax.f32 %v2197_v13, %v2237_v45  ;;  %v6193_v41 = vmax.f32 %v2198_v49, %v2238_v0  ;;  %v2242_v38 = vld [vmem:[#allocation2 + $0xfc] sm:$0xff]  ;;  %v6195_v55 = vmax.f32 %v2199_v15, %v2239_v4  ;;  %v2243_v26 = vld [vmem:[#allocation2 + $0x10c] sm:$0xff] }
 0x1d6   : > { %v2124_v27 = vmax.f32 %v2044_v40, %v6121_v44  ;;  %v2202_v10 = vmax.f32 %v2122_v28, %v2162_v6  ;;  %v2164_v60 = vld [vmem:[#allocation2 + $0x113] sm:$0xff]  ;;  %v2203_v46 = vmax.f32 %v2123_v23, %v2163_v31  ;;  %v6197_v50 = vmax.f32 %v2200_v43, %v2240_v48  ;;  %v7409_v45 = vld [vmem:[#allocation42_spill] sm:$0xff] }
 0x1d7   : > { %v6199_v32 = vmax.f32 %v2201_v42, %v2241_v9  ;;  %v2313_v40 = vmax.f32 %v6017_v18, %v6186_v19  ;;  %v2314_v13 = vmax.f32 %v6021_v36, %v6188_v22  ;;  %v2244_v49 = vld [vmem:[#allocation2 + $0x114] sm:$0xff]  ;;  %v2315_v15 = vmax.f32 %v6186_v19, %v6191_v51  ;;  %v2975_v39 = vld [vmem:[#allocation2 + $0x3] sm:$0xff]  ;;  %v2976_v52 = vld [vmem:[#allocation2 + $0xb] sm:$0xff] }
 0x1d8   : > { %v2204_v14 = vmax.f32 %v2124_v27, %v2164_v60  ;;  %v6201_v29 = vmax.f32 %v2202_v10, %v2242_v38  ;;  %v6207_v28 = vmax.f32 %v2203_v46, %v2243_v26  ;;  %v2316_v31 = vmax.f32 %v6188_v22, %v6193_v41  ;;  %v7412_v60 = vld [vmem:[#allocation37_spill] sm:$0xff] }
 0x1d9   : > { %v2317_v43 = vmax.f32 %v6191_v51, %v6195_v55  ;;  %v2318_v7 = vmax.f32 %v6193_v41, %v6197_v50  ;;  %v2319_v23 = vmax.f32 %v6195_v55, %v6199_v32  ;;  %v7410_v27 = vmax.f32 %v6004_v8, %v6017_v18 }
 0x1da   : > { %v6215_v30 = vmax.f32 %v2204_v14, %v2244_v49  ;;  %v2320_v6 = vmax.f32 %v6197_v50, %v6201_v29  ;;  %v2321_v42 = vmax.f32 %v6199_v32, %v6207_v28  ;;  %v2323_v0 = vmax.f32 %v6207_v28, %v7409_v45 }
 0x1db   : > { %v2343_v10 = vmax.f32 %v7410_v27, %v6186_v19  ;;  %v6231_v4 = vunpack.c.l.b16 %v2434_v24  ;;  %v7411_v48 = vpack.c.b16 %v6138_v16, %v6153_v35  ;;  %v7413_v38 = vmax.f32 %v6011_v21, %v6021_v36 }
 0x1dc   : > { %v2322_v9 = vmax.f32 %v6201_v29, %v6215_v30  ;;  %v2324_v46 = vmax.f32 %v6215_v30, %v7412_v60  ;;  %v2345_v8 = vmax.f32 %v2313_v40, %v6191_v51  ;;  %v2346_v24 = vmax.f32 %v2314_v13, %v6193_v41 }
 0x1dd   : > { %1716 = vmatmul.bf16.gmra.mxu1 %v7411_v48  ;;  %v2344_v14 = vmax.f32 %v7413_v38, %v6188_v22  ;;  %v2347_v26 = vmax.f32 %v2315_v15, %v6195_v55  ;;  %v2348_v16 = vmax.f32 %v2316_v31, %v6197_v50  ;;  %v2349_v35 = vmax.f32 %v2317_v43, %v6199_v32 }
 0x1de   : > { %v2350_v49 = vmax.f32 %v2318_v7, %v6201_v29  ;;  %v2351_v27 = vmax.f32 %v2319_v23, %v6207_v28  ;;  %v2352_v48 = vmax.f32 %v2320_v6, %v6215_v30  ;;  %v2353_v44 = vmax.f32 %v2321_v42, %v7409_v45 }
 0x1df   : > { %v2354_v21 = vmax.f32 %v2322_v9, %v7412_v60  ;;  %v2355_v40 = vmax.f32 %v2323_v0, %v5760_v1  ;;  %v6256_v13 = vmax.f32 %v2324_v46, %v5781_v59  ;;  %v2373_v15 = vmax.f32 %v6135_v2, %v6186_v19 }
 0x1e0   : > { %v2374_v31 = vmax.f32 %v6150_v5, %v6188_v22  ;;  %v2375_v43 = vmax.f32 %v2343_v10, %v6191_v51  ;;  %v2376_v7 = vmax.f32 %v2344_v14, %v6193_v41  ;;  %v2377_v23 = vmax.f32 %v2345_v8, %v6195_v55 }
 0x1e1   : > { %v2378_v6 = vmax.f32 %v2346_v24, %v6197_v50  ;;  %v2379_v42 = vmax.f32 %v2347_v26, %v6199_v32  ;;  %v2380_v0 = vmax.f32 %v2348_v16, %v6201_v29  ;;  %v2381_v9 = vmax.f32 %v2349_v35, %v6207_v28 }
 0x1e2   : > { %v2382_v46 = vmax.f32 %v2350_v49, %v6215_v30  ;;  %v2383_v2 = vmax.f32 %v2351_v27, %v7409_v45  ;;  %v2384_v5 = vmax.f32 %v2352_v48, %v7412_v60  ;;  %v2385_v10 = vmax.f32 %v2353_v44, %v5760_v1  ;;  %v6300_v48 = vld [vmem:[#allocation2 + $0x50] sm:$0xff] }
 0x1e3   : > { %v2386_v38 = vmax.f32 %v2354_v21, %v5781_v59  ;;  %v2387_v14 = vmax.f32 %v2355_v40, %v5774_v54  ;;  %v7414_v8 = vmax.f32 %v6104_v20, %v6017_v18  ;;  %v7415_v26 = vmax.f32 %v6129_v25, %v6021_v36  ;;  %v2779_v18 = vld [vmem:[#allocation2 + $0x30] sm:$0xff]  ;;  %v2780_v20 = vld [vmem:[#allocation2 + $0x38] sm:$0xff]  ;;  %v2815_v36 = vld [vmem:[#allocation2 + $0x1] sm:$0xff] }
 0x1e4   : > { %v6290_v44 = vmax.f32 %v2373_v15, %v6191_v51  ;;  %v6293_v49 = vmax.f32 %v2374_v31, %v6193_v41  ;;  %v6296_v27 = vmax.f32 %v2375_v43, %v6195_v55  ;;  %v2816_v25 = vld [vmem:[#allocation2 + $0x9] sm:$0xff]  ;;  %v6303_v21 = vmax.f32 %v2376_v7, %v6197_v50  ;;  %v2783_v40 = vld [vmem:[#allocation2 + $0x60] sm:$0xff]  ;;  %v2819_v43 = vld [vmem:[#allocation2 + $0x31] sm:$0xff] }
 0x1e5   : > { %v6279_v24 = vmax.f32 %v7414_v8, %v6186_v19  ;;  %v6285_v16 = vmax.f32 %v7415_v26, %v6188_v22  ;;  %v6298_v19 = vld [vmem:[#allocation2 + $0x48] sm:$0xff]  ;;  %v2817_v22 = vld [vmem:[#allocation2 + $0x19] sm:$0xff]  ;;  %v6306_v51 = vmax.f32 %v2377_v23, %v6199_v32  ;;  %v6309_v41 = vmax.f32 %v2378_v6, %v6201_v29  ;;  %v2822_v7 = vld [vmem:[#allocation2 + $0x51] sm:$0xff] }
 0x1e6   : > { %7416 = vst [vmem:[#allocation47_spill] sm:$0xff] %v6293_v49  ;;  %v6312_v55 = vmax.f32 %v2379_v42, %v6207_v28  ;;  %v2784_v15 = vld [vmem:[#allocation2 + $0x68] sm:$0xff]  ;;  %v2820_v8 = vld [vmem:[#allocation2 + $0x39] sm:$0xff]  ;;  %v6316_v26 = vmax.f32 %v2380_v0, %v6215_v30  ;;  %v6319_v50 = vmax.f32 %v2381_v9, %v7409_v45  ;;  %v6322_v32 = vmax.f32 %v2382_v46, %v7412_v60 }
 0x1e7   : > { %7417 = vst [vmem:[#allocation35_spill] sm:$0xff] %v6296_v27  ;;  %v2818_v31 = vld [vmem:[#allocation2 + $0x21] sm:$0xff]  ;;  %v6325_v29 = vmax.f32 %v2383_v2, %v5760_v1  ;;  %v2821_v28 = vld [vmem:[#allocation2 + $0x49] sm:$0xff]  ;;  %v6329_v6 = vmax.f32 %v2384_v5, %v5781_v59  ;;  %v6332_v30 = vmax.f32 %v2385_v10, %v5774_v54  ;;  %v6335_v45 = vmax.f32 %v2386_v38, %v5791_v3 }
 0x1e8   : > { %2749 = vst [vmem:[#allocation2 + $0x7a] sm:$0xff] %v6279_v24  ;;  %v2823_v23 = vld [vmem:[#allocation2 + $0x61] sm:$0xff]  ;;  %v6338_v60 = vmax.f32 %v2387_v14, %v5803_v47  ;;  %v2824_v1 = vld [vmem:[#allocation2 + $0x69] sm:$0xff]  ;;  %v2859_v38 = vmax.f32 %v2779_v18, %v2819_v43  ;;  %v2860_v35 = vmax.f32 %v2780_v20, %v2820_v8  ;;  %v2861_v47 = vmax.f32 %v6298_v19, %v2821_v28  ;;  %v2982_v8 = vld [vmem:[#allocation2 + $0x53] sm:$0xff] }
 0x1e9   : > { %2750 = vst [vmem:[#allocation2 + $0x82] sm:$0xff] %v6285_v16  ;;  %v2895_v42 = vld [vmem:[#allocation2 + $0x2] sm:$0xff]  ;;  %v2896_v0 = vld [vmem:[#allocation2 + $0xa] sm:$0xff]  ;;  %v2897_v54 = vld [vmem:[#allocation2 + $0x1a] sm:$0xff]  ;;  %v2862_v14 = vmax.f32 %v6300_v48, %v2822_v7  ;;  %v2863_v34 = vmax.f32 %v2783_v40, %v2823_v23 }
 0x1ea   : > { %2751 = vst [vmem:[#allocation2 + $0x92] sm:$0xff] %v6290_v44  ;;  %v4642_v9 = vld [vmem:[#allocation2] sm:$0xff]  ;;  %v2939_v20 = vmax.f32 %v2859_v38, %v5954_v63  ;;  %v2940_v19 = vmax.f32 %v2860_v35, %v5962_v61  ;;  %v2981_v43 = vld [vmem:[#allocation2 + $0x4b] sm:$0xff]  ;;  %v2941_v40 = vmax.f32 %v2861_v47, %v6015_v33  ;;  %v3062_v38 = vld [vmem:[#allocation2 + $0x54] sm:$0xff] }
 0x1eb   : > { %2752 = vst [vmem:[#allocation2 + $0x9a] sm:$0xff] %v6293_v49  ;;  %v2855_v46 = vmax.f32 %v4642_v9, %v2815_v36  ;;  %v2856_v59 = vmax.f32 %v4642_v9, %v2816_v25  ;;  %v2857_v2 = vmax.f32 %v4642_v9, %v2817_v22  ;;  %v2858_v5 = vmax.f32 %v4642_v9, %v2818_v31  ;;  %v2898_v10 = vld [vmem:[#allocation2 + $0x22] sm:$0xff]  ;;  %v2979_v9 = vld [vmem:[#allocation2 + $0x33] sm:$0xff]  ;;  %v2984_v63 = vld [vmem:[#allocation2 + $0x6b] sm:$0xff] }
 0x1ec   : > { %2753 = vst [vmem:[#allocation2 + $0xaa] sm:$0xff] %v6296_v27  ;;  %v2864_v49 = vmax.f32 %v2784_v15, %v2824_v1  ;;  %v2977_v22 = vld [vmem:[#allocation2 + $0x1b] sm:$0xff]  ;;  %v2978_v31 = vld [vmem:[#allocation2 + $0x23] sm:$0xff]  ;;  %v2942_v15 = vmax.f32 %v2862_v14, %v6026_v11  ;;  %v2943_v28 = vmax.f32 %v2863_v34, %v6030_v17  ;;  %v3019_v33 = vmax.f32 %v2939_v20, %v2979_v9 }
 0x1ed   : > { %2754 = vst [vmem:[#allocation2 + $0xb2] sm:$0xff] %v6303_v21  ;;  %v2935_v36 = vmax.f32 %v2855_v46, %v2895_v42  ;;  %v2936_v25 = vmax.f32 %v2856_v59, %v2896_v0  ;;  %v2937_v27 = vmax.f32 %v2857_v2, %v2897_v54  ;;  %v2938_v18 = vmax.f32 %v2858_v5, %v2898_v10  ;;  %v2980_v48 = vld [vmem:[#allocation2 + $0x3b] sm:$0xff]  ;;  %v2983_v23 = vld [vmem:[#allocation2 + $0x63] sm:$0xff]  ;;  %v3056_v42 = vld [vmem:[#allocation2 + $0xc] sm:$0xff] }
 0x1ee   : > { %2755 = vst [vmem:[#allocation2 + $0xc2] sm:$0xff] %v6306_v51  ;;  %v2944_v7 = vmax.f32 %v2864_v49, %v6033_v62  ;;  %v3055_v1 = vld [vmem:[#allocation2 + $0x4] sm:$0xff]  ;;  %v3057_v59 = vld [vmem:[#allocation2 + $0x1c] sm:$0xff]  ;;  %v3020_v11 = vmax.f32 %v2940_v19, %v2980_v48  ;;  %v3021_v5 = vmax.f32 %v2941_v40, %v2981_v43  ;;  %v3022_v17 = vmax.f32 %v2942_v15, %v2982_v8  ;;  %v3059_v34 = vld [vmem:[#allocation2 + $0x34] sm:$0xff] }
 0x1ef   : > { %2756 = vst [vmem:[#allocation2 + $0xca] sm:$0xff] %v6309_v41  ;;  %v3015_v61 = vmax.f32 %v2935_v36, %v2975_v39  ;;  %v3016_v35 = vmax.f32 %v2936_v25, %v2976_v52  ;;  %v3017_v0 = vmax.f32 %v2937_v27, %v2977_v22  ;;  %v3018_v46 = vmax.f32 %v2938_v18, %v2978_v31  ;;  %v3058_v2 = vld [vmem:[#allocation2 + $0x24] sm:$0xff]  ;;  %v3060_v62 = vld [vmem:[#allocation2 + $0x3c] sm:$0xff]  ;;  %v3061_v49 = vld [vmem:[#allocation2 + $0x4c] sm:$0xff] }
 0x1f0   : > { %2757 = vst [vmem:[#allocation2 + $0xda] sm:$0xff] %v6312_v55  ;;  %v3023_v54 = vmax.f32 %v2943_v28, %v2983_v23  ;;  %v3024_v10 = vmax.f32 %v2944_v7, %v2984_v63  ;;  %v2785_v27 = vld [vmem:[#allocation2 + $0x78] sm:$0xff]  ;;  %v3063_v14 = vld [vmem:[#allocation2 + $0x64] sm:$0xff]  ;;  %v6358_v22 = vmax.f32 %v3019_v33, %v3059_v34  ;;  %v6360_v31 = vmax.f32 %v3020_v11, %v3060_v62  ;;  %v3064_v40 = vld [vmem:[#allocation2 + $0x6c] sm:$0xff] }
 0x1f1   : > { %2758 = vst [vmem:[#allocation2 + $0xe2] sm:$0xff] %v6316_v26  ;;  %v3095_v39 = vmax.f32 %v3015_v61, %v3055_v1  ;;  %v3096_v52 = vmax.f32 %v3016_v35, %v3056_v42  ;;  %v2825_v47 = vld [vmem:[#allocation2 + $0x79] sm:$0xff]  ;;  %v3097_v36 = vmax.f32 %v3017_v0, %v3057_v59  ;;  %v3098_v25 = vmax.f32 %v3018_v46, %v3058_v2  ;;  %v2826_v18 = vld [vmem:[#allocation2 + $0x81] sm:$0xff]  ;;  %v2787_v2 = vld [vmem:[#allocation2 + $0x90] sm:$0xff] }
 0x1f2   : > { %2759 = vst [vmem:[#allocation2 + $0xf2] sm:$0xff] %v6319_v50  ;;  %v2786_v9 = vld [vmem:[#allocation2 + $0x80] sm:$0xff]  ;;  %v7418_v20 = vmax.f32 %v6256_v13, %v5791_v3  ;;  %v6369_v48 = vmax.f32 %v3021_v5, %v3061_v49  ;;  %v6371_v43 = vmax.f32 %v3022_v17, %v3062_v38  ;;  %v6373_v8 = vmax.f32 %v3023_v54, %v3063_v14  ;;  %v2827_v33 = vld [vmem:[#allocation2 + $0x91] sm:$0xff] }
 0x1f3   : > { %2760 = vst [vmem:[#allocation2 + $0xfa] sm:$0xff] %v6322_v32  ;;  %v3135_v15 = vmax.f32 %v3095_v39, %v3097_v36  ;;  %v3136_v28 = vmax.f32 %v3096_v52, %v3098_v25  ;;  %v2544_v7 = vpack.c.b16 %v6231_v4, %v6180_v12  ;;  %v2865_v23 = vmax.f32 %v2785_v27, %v2825_v47  ;;  %v2985_v13 = vld [vmem:[#allocation2 + $0x7b] sm:$0xff]  ;;  %v3066_v27 = vld [vmem:[#allocation2 + $0x84] sm:$0xff] }
 0x1f4   : > { %v6366_v19 = vmax.f32 %v7418_v20, %v5805_v53  ;;  %2761 = vst [vmem:[#allocation2 + $0x10a] sm:$0xff] %v6325_v29  ;;  %v6379_v3 = vmax.f32 %v3024_v10, %v3064_v40  ;;  %v2866_v53 = vmax.f32 %v2786_v9, %v2826_v18  ;;  %v3137_v1 = vmax.f32 %v3097_v36, %v6358_v22  ;;  %v2788_v17 = vld [vmem:[#allocation2 + $0x98] sm:$0xff] }
 0x1f5   : > { %2762 = vst [vmem:[#allocation2 + $0x112] sm:$0xff] %v6329_v6  ;;  %v3138_v42 = vmax.f32 %v3098_v25, %v6360_v31  ;;  %v3167_v63 = vmax.f32 %v3135_v15, %v6358_v22  ;;  %v3168_v61 = vmax.f32 %v3136_v28, %v6360_v31  ;;  %2640 = vmatmul.bf16.gmra.mxu3 %v2544_v7  ;;  %v2828_v34 = vld [vmem:[#allocation2 + $0x99] sm:$0xff] }
 0x1f6   : > { %2763 = vst [vmem:[#allocation2 + $0x122] sm:$0xff] %v6332_v30  ;;  %v2945_v12 = vmax.f32 %v2865_v23, %v6279_v24  ;;  %v7419_v4 = vpack.c.b16 %v6147_v57, %v6160_v58  ;;  %v2946_v35 = vmax.f32 %v2866_v53, %v6285_v16  ;;  %v3169_v0 = vmax.f32 %v3137_v1, %v6369_v48  ;;  %v2986_v58 = vld [vmem:[#allocation2 + $0x83] sm:$0xff]  ;;  %v2987_v18 = vld [vmem:[#allocation2 + $0x93] sm:$0xff] }
 0x1f7   : > { %2764 = vst [vmem:[#allocation2 + $0x12a] sm:$0xff] %v6335_v45  ;;  %v3170_v46 = vmax.f32 %v3138_v42, %v6371_v43  ;;  %v2436_v59 = vpack.c.bf16 %v6285_v16, %v6285_v16  ;;  %v3199_v11 = vmax.f32 %v3167_v63, %v6369_v48  ;;  %v3200_v57 = vmax.f32 %v3168_v61, %v6371_v43  ;;  %v3065_v54 = vld [vmem:[#allocation2 + $0x7c] sm:$0xff]  ;;  %v7420_v23 = vld [vmem:[#allocation47_spill] sm:$0xff] }
 0x1f8   : > { %1721 = vmatmul.bf16.gmra.mxu1 %v7419_v4  ;;  %2765 = vst [vmem:[#allocation2 + $0x13a] sm:$0xff] %v6338_v60  ;;  %v3025_v5 = vmax.f32 %v2945_v12, %v2985_v13  ;;  %v1610_v62 = vpack.c.b16 %v6173_v56, %v6165_v37  ;;  %v3026_v49 = vmax.f32 %v2946_v35, %v2986_v58  ;;  %v2988_v12 = vld [vmem:[#allocation2 + $0x9b] sm:$0xff] }
 0x1f9   : > { %2766 = vst [vmem:[#allocation2 + $0x142] sm:$0xff] %v6366_v19  ;;  %v3201_v10 = vmax.f32 %v3169_v0, %v6373_v8  ;;  %v3202_v16 = vmax.f32 %v3170_v46, %v6379_v3  ;;  %v2435_v38 = vpack.c.bf16 %v6279_v24, %v6279_v24  ;;  %v3231_v39 = vmax.f32 %v3199_v11, %v6373_v8  ;;  %v3067_v0 = vld [vmem:[#allocation2 + $0x94] sm:$0xff]  ;;  %v3068_v58 = vld [vmem:[#allocation2 + $0x9c] sm:$0xff] }
 0x1fa   : > { %v3232_v52 = vmax.f32 %v3200_v57, %v6379_v3  ;;  %v6407_v47 = vmax.f32 %v3025_v5, %v3065_v54  ;;  %v2867_v14 = vmax.f32 %v2787_v2, %v2827_v33  ;;  %v6409_v36 = vmax.f32 %v3026_v49, %v3066_v27  ;;  %v2789_v2 = vld [vmem:[#allocation2 + $0xa8] sm:$0xff]  ;;  %v2790_v5 = vld [vmem:[#allocation2 + $0xb0] sm:$0xff] }
 0x1fb   : > { %v2517_v25 = vunpack.c.l.b16 %v2436_v59  ;;  %v2868_v9 = vmax.f32 %v2788_v17, %v2828_v34  ;;  %v3139_v20 = vmax.f32 %v6358_v22, %v6369_v48  ;;  %v3263_v40 = vpack.c.bf16 %v3231_v39, %v3231_v39  ;;  %v2829_v33 = vld [vmem:[#allocation2 + $0xa9] sm:$0xff]  ;;  %v2830_v17 = vld [vmem:[#allocation2 + $0xb1] sm:$0xff] }
 0x1fc   : > { %v3264_v15 = vpack.c.bf16 %v3232_v52, %v3232_v52  ;;  %v3233_v24 = vmax.f32 %v3201_v10, %v6407_v47  ;;  %v2947_v28 = vmax.f32 %v2867_v14, %v6290_v44  ;;  %v3234_v7 = vmax.f32 %v3202_v16, %v6409_v36  ;;  %v7421_v34 = vld [vmem:[#allocation20_spill] sm:$0xff]  ;;  %v7422_v27 = vld [vmem:[#allocation26_spill] sm:$0xff] }
 0x1fd   : > { %v2948_v53 = vmax.f32 %v2868_v9, %v7420_v23  ;;  %v3140_v13 = vmax.f32 %v6360_v31, %v6371_v43  ;;  %v3171_v1 = vmax.f32 %v3139_v20, %v6373_v8  ;;  %v3344_v42 = vunpack.c.l.b16 %v3263_v40  ;;  %v7423_v14 = vld [vmem:[#allocation34_spill] sm:$0xff]  ;;  %v3070_v37 = vld [vmem:[#allocation2 + $0xb4] sm:$0xff] }
 0x1fe   : > { %v3345_v63 = vunpack.c.l.b16 %v3264_v15  ;;  %v3265_v61 = vpack.c.bf16 %v3233_v24, %v3233_v24  ;;  %v3027_v22 = vmax.f32 %v2947_v28, %v2987_v18  ;;  %v3266_v4 = vpack.c.bf16 %v3234_v7, %v3234_v7  ;;  %v2989_v28 = vld [vmem:[#allocation2 + $0xab] sm:$0xff] }
 0x1ff   : > { %v3028_v35 = vmax.f32 %v2948_v53, %v2988_v12  ;;  %v3172_v46 = vmax.f32 %v3140_v13, %v6379_v3  ;;  %v3203_v59 = vmax.f32 %v3171_v1, %v6407_v47  ;;  %v2516_v57 = vunpack.c.l.b16 %v2435_v38  ;;  %v7424_v53 = vld [vmem:[#allocation35_spill] sm:$0xff] }
 0x200   : > { %v3376_v11 = vpack.c.b16 %v3345_v63, %v3344_v42  ;;  %v6422_v31 = vmax.f32 %v3027_v22, %v3067_v0  ;;  %v1507_v49 = vpack.c.bf16 %v7421_v34, %v7421_v34  ;;  %v6426_v54 = vunpack.c.l.b16 %v3265_v61 }
 0x201   : > { %v6428_v10 = vunpack.c.l.b16 %v3266_v4  ;;  %v6430_v16 = vmax.f32 %v3028_v35, %v3068_v58  ;;  %v3204_v39 = vmax.f32 %v3172_v46, %v6409_v36  ;;  %v2545_v52 = vpack.c.b16 %v2517_v25, %v2516_v57  ;;  %v2831_v35 = vld [vmem:[#allocation2 + $0xc1] sm:$0xff]  ;;  %v2832_v57 = vld [vmem:[#allocation2 + $0xc9] sm:$0xff] }
 0x202   : > { %3464 = vmatmul.bf16.vlgmr.msrb.gmra.mxu0 %v3376_v11  ;;  %v3235_v38 = vmax.f32 %v3203_v59, %v6422_v31  ;;  %v887_v9 = vpack.c.bf16 %v7423_v14, %v7422_v27  ;;  %v2869_v18 = vmax.f32 %v2789_v2, %v2829_v33  ;;  %v2437_v15 = vpack.c.bf16 %v6290_v44, %v6290_v44  ;;  %v2990_v44 = vld [vmem:[#allocation2 + $0xb3] sm:$0xff]  ;;  %v2792_v11 = vld [vmem:[#allocation2 + $0xc8] sm:$0xff] }
 0x203   : > { %v3377_v20 = vpack.c.b16 %v6428_v10, %v6426_v54  ;;  %v3236_v40 = vmax.f32 %v3204_v39, %v6430_v16  ;;  %v2870_v24 = vmax.f32 %v2790_v5, %v2830_v17  ;;  %v3141_v13 = vmax.f32 %v6369_v48, %v6373_v8  ;;  %v2791_v48 = vld [vmem:[#allocation2 + $0xc0] sm:$0xff]  ;;  %v3069_v33 = vld [vmem:[#allocation2 + $0xac] sm:$0xff] }
 0x204   : > { %v3267_v7 = vpack.c.bf16 %v3235_v38, %v3235_v38  ;;  %1878 = vmatmul.bf16.gmra.mxu2 %v887_v9  ;;  %v2949_v25 = vmax.f32 %v2869_v18, %v7424_v53  ;;  %v3142_v1 = vmax.f32 %v6371_v43, %v6379_v3  ;;  %v2438_v63 = vpack.c.bf16 %v7420_v23, %v7420_v23  ;;  %v7425_v43 = vld [vmem:[#allocation15_spill] sm:$0xff]  ;;  %v2991_v14 = vld [vmem:[#allocation2 + $0xc3] sm:$0xff] }
 0x205   : > { %v3268_v42 = vpack.c.bf16 %v3236_v40, %v3236_v40  ;;  %v2950_v61 = vmax.f32 %v2870_v24, %v6303_v21  ;;  %2645 = vmatmul.bf16.gmra.mxu3 %v2545_v52  ;;  %v3173_v22 = vmax.f32 %v3141_v13, %v6407_v47  ;;  %v7426_v0 = vpack.c.bf16 %v7425_v43, %v7425_v43  ;;  %v7428_v24 = vld [vmem:[#allocation48_spill] sm:$0xff]  ;;  %v2795_v10 = vld [vmem:[#allocation2 + $0xf0] sm:$0xff] }
 0x206   : > { %v3029_v12 = vmax.f32 %v2949_v25, %v2989_v28  ;;  %v3174_v4 = vmax.f32 %v3142_v1, %v6409_v36  ;;  %v6459_v23 = vunpack.c.l.b16 %v3267_v7  ;;  %v6463_v58 = vunpack.c.l.b16 %v1507_v49 }
 0x207   : > { %v6457_v46 = vunpack.c.l.b16 %v7426_v0  ;;  %v6461_v59 = vunpack.c.l.b16 %v3268_v42  ;;  %v3030_v2 = vmax.f32 %v2950_v61, %v2990_v44  ;;  %v6465_v5 = vunpack.c.l.b16 %v2437_v15  ;;  %v7427_v15 = vld [vmem:[#allocation41_spill] sm:$0xff]  ;;  %v2992_v42 = vld [vmem:[#allocation2 + $0xcb] sm:$0xff]  ;;  %v2793_v61 = vld [vmem:[#allocation2 + $0xd8] sm:$0xff] }
 0x208   : > { %1726 = vmatmul.bf16.gmra.mxu1 %v1610_v62  ;;  %v6467_v56 = vmax.f32 %v3029_v12, %v3069_v33  ;;  %v3205_v62 = vmax.f32 %v3173_v22, %v6422_v31  ;;  %v3206_v17 = vmax.f32 %v3174_v4, %v6430_v16  ;;  %v6473_v39 = vunpack.c.l.b16 %v2438_v63  ;;  %v2794_v4 = vld [vmem:[#allocation2 + $0xe0] sm:$0xff] }
 0x209   : > { %v3378_v34 = vpack.c.b16 %v6461_v59, %v6459_v23  ;;  %v6475_v52 = vmax.f32 %v3030_v2, %v3070_v37  ;;  %v2871_v38 = vmax.f32 %v2791_v48, %v2831_v35  ;;  %v2872_v27 = vmax.f32 %v2792_v11, %v2832_v57  ;;  %v2833_v48 = vld [vmem:[#allocation2 + $0xd9] sm:$0xff]  ;;  %v2834_v35 = vld [vmem:[#allocation2 + $0xe1] sm:$0xff]  ;;  %v3072_v57 = vld [vmem:[#allocation2 + $0xcc] sm:$0xff] }
 0x20a   : > { %v3237_v49 = vmax.f32 %v3205_v62, %v6467_v56  ;;  %v3143_v9 = vmax.f32 %v6373_v8, %v6407_v47  ;;  %v3144_v18 = vmax.f32 %v6379_v3, %v6409_v36  ;;  %v888_v28 = vpack.c.bf16 %v7428_v24, %v7427_v15  ;;  %v3078_v59 = vld [vmem:[#allocation2 + $0x114] sm:$0xff] }
 0x20b   : > { %v3238_v40 = vmax.f32 %v3206_v17, %v6475_v52  ;;  %v2951_v7 = vmax.f32 %v2871_v38, %v6306_v51  ;;  %v1611_v25 = vpack.c.b16 %v6463_v58, %v6457_v46  ;;  %v2952_v1 = vmax.f32 %v2872_v27, %v6309_v41  ;;  %v3071_v46 = vld [vmem:[#allocation2 + $0xc4] sm:$0xff] }
 0x20c   : > { %v3269_v13 = vpack.c.bf16 %v3237_v49, %v3237_v49  ;;  %v3175_v63 = vmax.f32 %v3143_v9, %v6422_v31  ;;  %v3176_v8 = vmax.f32 %v3144_v18, %v6430_v16  ;;  %v2441_v12 = vpack.c.bf16 %v6306_v51, %v6306_v51  ;;  %v2993_v9 = vld [vmem:[#allocation2 + $0xdb] sm:$0xff] }
 0x20d   : > { %v3270_v3 = vpack.c.bf16 %v3238_v40, %v3238_v40  ;;  %v3031_v44 = vmax.f32 %v2951_v7, %v2991_v14  ;;  %v2442_v22 = vpack.c.bf16 %v6309_v41, %v6309_v41  ;;  %v3032_v0 = vmax.f32 %v2952_v1, %v2992_v42  ;;  %v6521_v40 = vpop.f32.mrf.mxu2  ;;  %v2994_v42 = vld [vmem:[#allocation2 + $0xe3] sm:$0xff] }
 0x20e   : > { %v6495_v43 = vunpack.c.l.b16 %v3269_v13  ;;  %v3207_v2 = vmax.f32 %v3175_v63, %v6467_v56  ;;  %v3208_v33 = vmax.f32 %v3176_v8, %v6475_v52  ;;  %v6503_v51 = vunpack.c.l.b16 %v2441_v12  ;;  %v2836_v12 = vld [vmem:[#allocation2 + $0xf9] sm:$0xff] }
 0x20f   : > { %v6499_v11 = vunpack.c.l.b16 %v3270_v3  ;;  %v6501_v58 = vmax.f32 %v3031_v44, %v3071_v46  ;;  %v6505_v37 = vunpack.c.l.b16 %v2442_v22  ;;  %v6507_v41 = vmax.f32 %v3032_v0, %v3072_v57  ;;  %v2796_v3 = vld [vmem:[#allocation2 + $0xf8] sm:$0xff]  ;;  %v3074_v22 = vld [vmem:[#allocation2 + $0xe4] sm:$0xff] }
 0x210   : > { %v2873_v62 = vmax.f32 %v2793_v61, %v2833_v48  ;;  %v2874_v17 = vmax.f32 %v2794_v4, %v2834_v35  ;;  %v3145_v38 = vmax.f32 %v6407_v47, %v6422_v31  ;;  %v3146_v18 = vmax.f32 %v6409_v36, %v6430_v16  ;;  %v2835_v44 = vld [vmem:[#allocation2 + $0xf1] sm:$0xff] }
 0x211   : > { %v3379_v49 = vpack.c.b16 %v6499_v11, %v6495_v43  ;;  %v3239_v27 = vmax.f32 %v3207_v2, %v6501_v58  ;;  %v2548_v14 = vpack.c.b16 %v6505_v37, %v6503_v51  ;;  %v3240_v47 = vmax.f32 %v3208_v33, %v6507_v41  ;;  %v3002_v43 = vld [vmem:[#allocation2 + $0x143] sm:$0xff] }
 0x212   : > { %3469 = vmatmul.bf16.gmra.mxu0 %v3377_v20  ;;  %v2953_v15 = vmax.f32 %v2873_v62, %v6312_v55  ;;  %v2954_v24 = vmax.f32 %v2874_v17, %v6316_v26  ;;  %v3177_v7 = vmax.f32 %v3145_v38, %v6467_v56  ;;  %v2546_v13 = vpack.c.b16 %v6473_v39, %v6465_v5  ;;  %v7429_v17 = vld [vmem:[#allocation16_spill] sm:$0xff] }
 0x213   : > { %v2440_v36 = vpack.c.bf16 %v6303_v21, %v6303_v21  ;;  %v3271_v1 = vpack.c.bf16 %v3239_v27, %v3239_v27  ;;  %v3178_v54 = vmax.f32 %v3146_v18, %v6475_v52  ;;  %v3272_v20 = vpack.c.bf16 %v3240_v47, %v3240_v47  ;;  %v3073_v21 = vld [vmem:[#allocation2 + $0xdc] sm:$0xff]  ;;  %v2995_v27 = vld [vmem:[#allocation2 + $0xf3] sm:$0xff] }
 0x214   : > { %1883 = vmatmul.bf16.gmra.mxu2 %v888_v28  ;;  %v3033_v63 = vmax.f32 %v2953_v15, %v2993_v9  ;;  %v3034_v8 = vmax.f32 %v2954_v24, %v2994_v42  ;;  %v3209_v61 = vmax.f32 %v3177_v7, %v6501_v58  ;;  %v2439_v5 = vpack.c.bf16 %v7424_v53, %v7424_v53  ;;  %v7430_v9 = vld [vmem:[#allocation22_spill] sm:$0xff] }
 0x215   : > { %v6535_v39 = vunpack.c.l.b16 %v3271_v1  ;;  %v3210_v4 = vmax.f32 %v3178_v54, %v6507_v41  ;;  %2650 = vmatmul.bf16.gmra.mxu3 %v2546_v13  ;;  %v6538_v48 = vunpack.c.l.b16 %v3272_v20  ;;  %v2443_v0 = vpack.c.bf16 %v6312_v55, %v6312_v55  ;;  %v2797_v54 = vld [vmem:[#allocation2 + $0x108] sm:$0xff]  ;;  %v6570_v20 = vpop.f32.mrf.mxu2 }
 0x216   : > { %v6540_v28 = vmax.f32 %v3033_v63, %v3073_v21  ;;  %v6542_v35 = vmax.f32 %v3034_v8, %v3074_v22  ;;  %v6546_v46 = vunpack.c.l.b16 %v2440_v36  ;;  %v2444_v53 = vpack.c.bf16 %v6316_v26, %v6316_v26  ;;  %v2996_v21 = vld [vmem:[#allocation2 + $0xfb] sm:$0xff] }
 0x217   : > { %v2875_v2 = vmax.f32 %v2795_v10, %v2835_v44  ;;  %v2876_v33 = vmax.f32 %v2796_v3, %v2836_v12  ;;  %v3380_v57 = vpack.c.b16 %v6538_v48, %v6535_v39  ;;  %v1508_v38 = vpack.c.bf16 %v7429_v17, %v7429_v17  ;;  %v2837_v10 = vld [vmem:[#allocation2 + $0x109] sm:$0xff]  ;;  %v2838_v44 = vld [vmem:[#allocation2 + $0x111] sm:$0xff] }
 0x218   : > { %1731 = vmatmul.bf16.gmra.mxu1 %v1611_v25  ;;  %v3241_v62 = vmax.f32 %v3209_v61, %v6540_v28  ;;  %v3242_v25 = vmax.f32 %v3210_v4, %v6542_v35  ;;  %v1509_v55 = vpack.c.bf16 %v7430_v9, %v7430_v9  ;;  %v6558_v18 = vunpack.c.l.b16 %v2443_v0  ;;  %v2798_v3 = vld [vmem:[#allocation2 + $0x110] sm:$0xff] }
 0x219   : > { %v6560_v47 = vunpack.c.l.b16 %v2444_v53  ;;  %v2955_v26 = vmax.f32 %v2875_v2, %v6319_v50  ;;  %v6563_v15 = vunpack.c.l.b16 %v2439_v5  ;;  %v2956_v13 = vmax.f32 %v2876_v33, %v6322_v32  ;;  %v3075_v53 = vld [vmem:[#allocation2 + $0xf4] sm:$0xff] }
 0x21a   : > { %v3273_v24 = vpack.c.bf16 %v3241_v62, %v3241_v62  ;;  %v3274_v7 = vpack.c.bf16 %v3242_v25, %v3242_v25  ;;  %v3147_v42 = vmax.f32 %v6422_v31, %v6467_v56  ;;  %v1589_v12 = vunpack.c.l.b16 %v1508_v38  ;;  %v2997_v38 = vld [vmem:[#allocation2 + $0x10b] sm:$0xff]  ;;  %v3086_v48 = vld [vmem:[#allocation2 + $0x174] sm:$0xff] }
 0x21b   : > { %v2549_v36 = vpack.c.b16 %v6560_v47, %v6558_v18  ;;  %v3035_v1 = vmax.f32 %v2955_v26, %v2995_v27  ;;  %v2547_v63 = vpack.c.b16 %v6546_v46, %v6563_v15  ;;  %v1590_v5 = vunpack.c.l.b16 %v1509_v55  ;;  %v7432_v26 = vld [vmem:[#allocation25_spill] sm:$0xff] }
 0x21c   : > { %v6574_v8 = vunpack.c.l.b16 %v3273_v24  ;;  %v6576_v61 = vunpack.c.l.b16 %v3274_v7  ;;  %v3179_v22 = vmax.f32 %v3147_v42, %v6501_v58  ;;  %v2445_v31 = vpack.c.bf16 %v6319_v50, %v6319_v50  ;;  %v2998_v42 = vld [vmem:[#allocation2 + $0x113] sm:$0xff] }
 0x21d   : > { %v3036_v0 = vmax.f32 %v2956_v13, %v2996_v21  ;;  %v2446_v46 = vpack.c.bf16 %v6322_v32, %v6322_v32  ;;  %v2877_v2 = vmax.f32 %v2797_v54, %v2837_v10  ;;  %v6585_v33 = vmax.f32 %v3035_v1, %v3075_v53  ;;  %v7431_v32 = vld [vmem:[#allocation23_spill] sm:$0xff]  ;;  %v3076_v13 = vld [vmem:[#allocation2 + $0xfc] sm:$0xff] }
 0x21e   : > { %v3381_v4 = vpack.c.b16 %v6576_v61, %v6574_v8  ;;  %v3148_v62 = vmax.f32 %v6430_v16, %v6475_v52  ;;  %v3211_v25 = vmax.f32 %v3179_v22, %v6540_v28  ;;  %v2878_v17 = vmax.f32 %v2798_v3, %v2838_v44  ;;  %v7443_v8 = vld [vmem:[#allocation49_spill] sm:$0xff]  ;;  %v7444_v61 = vld [vmem:[#allocation40_spill] sm:$0xff] }
 0x21f   : > { %v6590_v27 = vunpack.c.l.b16 %v2445_v31  ;;  %v6592_v50 = vunpack.c.l.b16 %v2446_v46  ;;  %v2957_v9 = vmax.f32 %v2877_v2, %v6325_v29  ;;  %v3149_v55 = vmax.f32 %v6467_v56, %v6501_v58  ;;  %v3077_v31 = vld [vmem:[#allocation2 + $0x10c] sm:$0xff]  ;;  %v2799_v2 = vld [vmem:[#allocation2 + $0x120] sm:$0xff] }
 0x220   : > { %v889_v15 = vpack.c.bf16 %v7432_v26, %v7431_v32  ;;  %v3180_v24 = vmax.f32 %v3148_v62, %v6507_v41  ;;  %v3243_v16 = vmax.f32 %v3211_v25, %v6585_v33  ;;  %v2958_v7 = vmax.f32 %v2878_v17, %v6329_v6 }
 0x221   : > { %v2550_v1 = vpack.c.b16 %v6592_v50, %v6590_v27  ;;  %v3037_v54 = vmax.f32 %v2957_v9, %v2997_v38  ;;  %v3150_v56 = vmax.f32 %v6475_v52, %v6507_v41  ;;  %v3181_v10 = vmax.f32 %v3149_v55, %v6540_v28  ;;  %v2839_v52 = vld [vmem:[#allocation2 + $0x121] sm:$0xff]  ;;  %v2840_v9 = vld [vmem:[#allocation2 + $0x129] sm:$0xff]  ;;  %v6622_v55 = vpop.f32.mrf.mxu2 }
 0x222   : > { %3474 = vmatmul.bf16.gmra.mxu0 %v3378_v34  ;;  %v6610_v3 = vmax.f32 %v3036_v0, %v3076_v13  ;;  %v3212_v44 = vmax.f32 %v3180_v24, %v6542_v35  ;;  %v3275_v21 = vpack.c.bf16 %v3243_v16, %v3243_v16  ;;  %v3038_v22 = vmax.f32 %v2958_v7, %v2998_v42  ;;  %v7433_v0 = vld [vmem:[#allocation14_spill] sm:$0xff] }
 0x223   : > { %v1612_v23 = vpack.c.b16 %v1590_v5, %v1589_v12  ;;  %v6613_v34 = vmax.f32 %v3037_v54, %v3077_v31  ;;  %v3182_v53 = vmax.f32 %v3150_v56, %v6542_v35  ;;  %v3213_v46 = vmax.f32 %v3181_v10, %v6585_v33  ;;  %v2800_v38 = vld [vmem:[#allocation2 + $0x128] sm:$0xff] }
 0x224   : > { %1888 = vmatmul.bf16.gmra.mxu2 %v889_v15  ;;  %v3244_v62 = vmax.f32 %v3212_v44, %v6610_v3  ;;  %v1510_v25 = vpack.c.bf16 %v7433_v0, %v7433_v0  ;;  %v6620_v17 = vmax.f32 %v3038_v22, %v3078_v59  ;;  %v2447_v32 = vpack.c.bf16 %v6325_v29, %v6325_v29  ;;  %v2999_v54 = vld [vmem:[#allocation2 + $0x123] sm:$0xff] }
 0x225   : > { %2655 = vmatmul.bf16.gmra.mxu3 %v2547_v63  ;;  %v3214_v12 = vmax.f32 %v3182_v53, %v6610_v3  ;;  %v3245_v5 = vmax.f32 %v3213_v46, %v6613_v34  ;;  %v6628_v15 = vunpack.c.l.b16 %v3275_v21  ;;  %v2448_v24 = vpack.c.bf16 %v6329_v6, %v6329_v6  ;;  %v7434_v21 = vld [vmem:[#allocation33_spill] sm:$0xff] }
 0x226   : > { %v3276_v26 = vpack.c.bf16 %v3244_v62, %v3244_v62  ;;  %v2879_v16 = vmax.f32 %v2799_v2, %v2839_v52  ;;  %v6633_v42 = vunpack.c.l.b16 %v2447_v32  ;;  %v2880_v63 = vmax.f32 %v2800_v38, %v2840_v9  ;;  %v3000_v2 = vld [vmem:[#allocation2 + $0x12b] sm:$0xff] }
 0x227   : > { %v3246_v7 = vmax.f32 %v3214_v12, %v6620_v17  ;;  %v3277_v13 = vpack.c.bf16 %v3245_v5, %v3245_v5  ;;  %v6637_v10 = vunpack.c.l.b16 %v2448_v24  ;;  %v3151_v44 = vmax.f32 %v6501_v58, %v6540_v28  ;;  %v3079_v0 = vld [vmem:[#allocation2 + $0x124] sm:$0xff]  ;;  %v2801_v12 = vld [vmem:[#allocation2 + $0x138] sm:$0xff]  ;;  %v3080_v5 = vld [vmem:[#allocation2 + $0x12c] sm:$0xff] }
 0x228   : > { %1736 = vmatmul.bf16.gmra.mxu1 %v1612_v23  ;;  %v6635_v56 = vunpack.c.l.b16 %v3276_v26  ;;  %v2959_v29 = vmax.f32 %v2879_v16, %v6332_v30  ;;  %v1511_v6 = vpack.c.bf16 %v7434_v21, %v7434_v21  ;;  %v2960_v31 = vmax.f32 %v2880_v63, %v6335_v45  ;;  %v2802_v24 = vld [vmem:[#allocation2 + $0x140] sm:$0xff] }
 0x229   : > { %v3278_v22 = vpack.c.bf16 %v3246_v7, %v3246_v7  ;;  %v3152_v23 = vmax.f32 %v6507_v41, %v6542_v35  ;;  %v6649_v53 = vunpack.c.l.b16 %v3277_v13  ;;  %v3183_v38 = vmax.f32 %v3151_v44, %v6585_v33  ;;  %v2841_v41 = vld [vmem:[#allocation2 + $0x139] sm:$0xff]  ;;  %v2842_v16 = vld [vmem:[#allocation2 + $0x141] sm:$0xff] }
 0x22a   : > { %v3382_v59 = vpack.c.b16 %v6635_v56, %v6628_v15  ;;  %v3039_v52 = vmax.f32 %v2959_v29, %v2999_v54  ;;  %v3040_v62 = vmax.f32 %v2960_v31, %v3000_v2  ;;  %v2449_v26 = vpack.c.bf16 %v6332_v30, %v6332_v30  ;;  %v3084_v7 = vld [vmem:[#allocation2 + $0x15c] sm:$0xff] }
 0x22b   : > { %v6653_v58 = vunpack.c.l.b16 %v3278_v22  ;;  %v3184_v9 = vmax.f32 %v3152_v23, %v6610_v3  ;;  %v3215_v63 = vmax.f32 %v3183_v38, %v6613_v34  ;;  %v1591_v29 = vunpack.c.l.b16 %v1510_v25  ;;  %v6669_v22 = vpop.f32.mrf.mxu2  ;;  %v3001_v38 = vld [vmem:[#allocation2 + $0x13b] sm:$0xff] }
 0x22c   : > { %v6657_v32 = vmax.f32 %v3039_v52, %v3079_v0  ;;  %v6663_v13 = vmax.f32 %v3040_v62, %v3080_v5  ;;  %v1592_v44 = vunpack.c.l.b16 %v1511_v6  ;;  %v2450_v21 = vpack.c.bf16 %v6335_v45, %v6335_v45  ;;  %v2921_v0 = vld [vmem:[#allocation2 + $0x13a] sm:$0xff]  ;;  %v7435_v6 = vld [vmem:[#allocation27_spill] sm:$0xff] }
 0x22d   : > { %v3216_v54 = vmax.f32 %v3184_v9, %v6620_v17  ;;  %v2881_v23 = vmax.f32 %v2801_v12, %v2841_v41  ;;  %v2882_v2 = vmax.f32 %v2802_v24, %v2842_v16  ;;  %v6673_v52 = vunpack.c.l.b16 %v2449_v26  ;;  %v7436_v9 = vld [vmem:[#allocation29_spill] sm:$0xff]  ;;  %v2631_v27 = vpop.f32.mrf.mxu3 }
 0x22e   : > { %v3247_v30 = vmax.f32 %v3215_v63, %v6657_v32  ;;  %v6675_v62 = vunpack.c.l.b16 %v2450_v21  ;;  %v3153_v25 = vmax.f32 %v6540_v28, %v6585_v33  ;;  %v3154_v45 = vmax.f32 %v6542_v35, %v6610_v3  ;;  %v2922_v26 = vld [vmem:[#allocation2 + $0x142] sm:$0xff] }
 0x22f   : > { %v3248_v31 = vmax.f32 %v3216_v54, %v6663_v13  ;;  %v890_v12 = vpack.c.bf16 %v7436_v9, %v7435_v6  ;;  %v2961_v24 = vmax.f32 %v2881_v23, %v2921_v0  ;;  %v1613_v16 = vpack.c.b16 %v1592_v44, %v1591_v29  ;;  %v2804_v44 = vld [vmem:[#allocation2 + $0x158] sm:$0xff] }
 0x230   : > { %v3279_v41 = vpack.c.bf16 %v3247_v30, %v3247_v30  ;;  %v2962_v54 = vmax.f32 %v2882_v2, %v2922_v26  ;;  %v3185_v28 = vmax.f32 %v3153_v25, %v6613_v34  ;;  %v3186_v30 = vmax.f32 %v3154_v45, %v6620_v17  ;;  %v2843_v23 = vld [vmem:[#allocation2 + $0x151] sm:$0xff]  ;;  %v2844_v0 = vld [vmem:[#allocation2 + $0x159] sm:$0xff]  ;;  %v3082_v25 = vld [vmem:[#allocation2 + $0x144] sm:$0xff] }
 0x231   : > { %v3280_v5 = vpack.c.bf16 %v3248_v31, %v3248_v31  ;;  %v3041_v11 = vmax.f32 %v2961_v24, %v3001_v38  ;;  %v2803_v31 = vld [vmem:[#allocation2 + $0x150] sm:$0xff]  ;;  %v2452_v51 = vpack.c.bf16 %v6366_v19, %v6366_v19  ;;  %v7450_v56 = vpack.c.b16 %v6653_v58, %v6649_v53 }
 0x232   : > { %3479 = vmatmul.bf16.gmra.mxu0 %v3379_v49  ;;  %v6689_v35 = vunpack.c.l.b16 %v3279_v41  ;;  %v3081_v49 = vld [vmem:[#allocation2 + $0x13c] sm:$0xff]  ;;  %v3042_v6 = vmax.f32 %v2962_v54, %v3002_v43  ;;  %v3217_v29 = vmax.f32 %v3185_v28, %v6657_v32  ;;  %v3218_v45 = vmax.f32 %v3186_v30, %v6663_v13  ;;  %v2923_v54 = vld [vmem:[#allocation2 + $0x152] sm:$0xff]  ;;  %v2925_v2 = vld [vmem:[#allocation2 + $0x16a] sm:$0xff] }
 0x233   : > { %v6691_v21 = vunpack.c.l.b16 %v3280_v5  ;;  %v6700_v38 = vmax.f32 %v3041_v11, %v3081_v49  ;;  %v2883_v37 = vmax.f32 %v2803_v31, %v2843_v23  ;;  %v7437_v5 = vld [vmem:[#allocation19_spill] sm:$0xff]  ;;  %v2924_v28 = vld [vmem:[#allocation2 + $0x15a] sm:$0xff]  ;;  %v6717_v11 = vpop.f32.mrf.mxu2  ;;  %v6719_v30 = vunpack.c.l.b16 %v2452_v51 }
 0x234   : > { %1893 = vmatmul.bf16.gmra.mxu2 %v890_v12  ;;  %v6703_v9 = vmax.f32 %v3042_v6, %v3082_v25  ;;  %v2451_v12 = vpack.c.bf16 %v6338_v60, %v6338_v60  ;;  %v1512_v26 = vpack.c.bf16 %v7437_v5, %v7437_v5  ;;  %v3003_v43 = vld [vmem:[#allocation2 + $0x153] sm:$0xff]  ;;  %v3155_v60 = vmax.f32 %v6585_v33, %v6613_v34  ;;  %v6721_v6 = vpop.f32.mrf.mxu1  ;;  %v2805_v25 = vld [vmem:[#allocation2 + $0x168] sm:$0xff] }
 0x235   : > { %2660 = vmatmul.bf16.gmra.mxu3 %v2548_v14  ;;  %v3249_v41 = vmax.f32 %v3217_v29, %v6700_v38  ;;  %v2884_v14 = vmax.f32 %v2804_v44, %v2844_v0  ;;  %v2963_v19 = vmax.f32 %v2883_v37, %v2923_v54  ;;  %v3004_v44 = vld [vmem:[#allocation2 + $0x15b] sm:$0xff]  ;;  %v3156_v23 = vmax.f32 %v6610_v3, %v6620_v17  ;;  %v2846_v5 = vld [vmem:[#allocation2 + $0x171] sm:$0xff] }
 0x236   : > { %v3250_v24 = vmax.f32 %v3218_v45, %v6703_v9  ;;  %v3187_v0 = vmax.f32 %v3155_v60, %v6657_v32  ;;  %v2845_v45 = vld [vmem:[#allocation2 + $0x169] sm:$0xff]  ;;  %v1593_v63 = vunpack.c.l.b16 %v1512_v26  ;;  %v3157_v26 = vmax.f32 %v6613_v34, %v6657_v32 }
 0x237   : > { %v3281_v49 = vpack.c.bf16 %v3249_v41, %v3249_v41  ;;  %v2964_v31 = vmax.f32 %v2884_v14, %v2924_v28  ;;  %v3043_v51 = vmax.f32 %v2963_v19, %v3003_v43  ;;  %v2806_v14 = vld [vmem:[#allocation2 + $0x170] sm:$0xff]  ;;  %v3188_v3 = vmax.f32 %v3156_v23, %v6663_v13 }
 0x238   : > { %1741 = vmatmul.bf16.gmra.mxu1 %v1613_v16  ;;  %v6713_v16 = vunpack.c.l.b16 %v2451_v12  ;;  %v3282_v29 = vpack.c.bf16 %v3250_v24, %v3250_v24  ;;  %v7438_v12 = vld [vmem:[#allocation53_spill] sm:$0xff]  ;;  %v3083_v28 = vld [vmem:[#allocation2 + $0x154] sm:$0xff]  ;;  %v3219_v60 = vmax.f32 %v3187_v0, %v6700_v38  ;;  %v2885_v46 = vmax.f32 %v2805_v25, %v2845_v45 }
 0x239   : > { %v1513_v33 = vpack.c.bf16 %v7438_v12, %v7438_v12  ;;  %v3044_v37 = vmax.f32 %v2964_v31, %v3004_v44  ;;  %v6730_v54 = vunpack.c.l.b16 %v3281_v49  ;;  %v6736_v12 = vmax.f32 %v3043_v51, %v3083_v28  ;;  %v2926_v41 = vld [vmem:[#allocation2 + $0x172] sm:$0xff] }
 0x23a   : > { %v6732_v24 = vunpack.c.l.b16 %v3282_v29  ;;  %v3220_v49 = vmax.f32 %v3188_v3, %v6703_v9  ;;  %v2886_v31 = vmax.f32 %v2806_v14, %v2846_v5  ;;  %v3005_v29 = vld [vmem:[#allocation2 + $0x16b] sm:$0xff]  ;;  %v2965_v0 = vmax.f32 %v2885_v46, %v2925_v2  ;;  %v7440_v45 = vld [vmem:[#allocation44_spill] sm:$0xff] }
 0x23b   : > { %v6740_v19 = vmax.f32 %v3044_v37, %v3084_v7  ;;  %v1594_v44 = vunpack.c.l.b16 %v1513_v33  ;;  %v3251_v23 = vmax.f32 %v3219_v60, %v6736_v12  ;;  %v7439_v7 = vld [vmem:[#allocation36_spill] sm:$0xff]  ;;  %v6752_v3 = vpop.f32.mrf.mxu2  ;;  %v3085_v60 = vld [vmem:[#allocation2 + $0x16c] sm:$0xff] }
 0x23c   : > { %v3385_v43 = vpack.c.b16 %v6732_v24, %v6730_v54  ;;  %v2966_v25 = vmax.f32 %v2886_v31, %v2926_v41  ;;  %v891_v37 = vpack.c.bf16 %v7440_v45, %v7439_v7  ;;  %v3045_v5 = vmax.f32 %v2965_v0, %v3005_v29  ;;  %v3006_v28 = vld [vmem:[#allocation2 + $0x173] sm:$0xff]  ;;  %v2807_v41 = vld [vmem:[#allocation2 + $0x180] sm:$0xff]  ;;  %v6756_v31 = vpop.f32.mrf.mxu1  ;;  %v2808_v0 = vld [vmem:[#allocation2 + $0x188] sm:$0xff] }
 0x23d   : > { %v3252_v51 = vmax.f32 %v3220_v49, %v6740_v19  ;;  %v3283_v14 = vpack.c.bf16 %v3251_v23, %v3251_v23  ;;  %v1614_v46 = vpack.c.b16 %v1594_v44, %v1593_v63  ;;  %v2847_v49 = vld [vmem:[#allocation2 + $0x181] sm:$0xff]  ;;  %v3158_v29 = vmax.f32 %v6620_v17, %v6663_v13  ;;  %v2848_v63 = vld [vmem:[#allocation2 + $0x189] sm:$0xff] }
 0x23e   : > { %v3046_v34 = vmax.f32 %v2966_v25, %v3006_v28  ;;  %v3189_v23 = vmax.f32 %v3157_v26, %v6700_v38  ;;  %v2887_v17 = vmax.f32 %v2807_v41, %v2847_v49  ;;  %v2888_v26 = vmax.f32 %v2808_v0, %v2848_v63  ;;  %v7441_v41 = vld [vmem:[#allocation52_spill] sm:$0xff]  ;;  %v7442_v0 = vld [vmem:[#allocation54_spill] sm:$0xff] }
 0x23f   : > { %v3284_v33 = vpack.c.bf16 %v3252_v51, %v3252_v51  ;;  %v6754_v2 = vunpack.c.l.b16 %v3283_v14  ;;  %v2927_v51 = vld [vmem:[#allocation2 + $0x182] sm:$0xff]  ;;  %v3190_v7 = vmax.f32 %v3158_v29, %v6703_v9  ;;  %v3160_v28 = vmax.f32 %v6663_v13, %v6703_v9 }
 0x240   : > { %v6768_v44 = vmax.f32 %v3046_v34, %v3086_v48  ;;  %v3221_v45 = vmax.f32 %v3189_v23, %v6736_v12  ;;  %v3007_v14 = vld [vmem:[#allocation2 + $0x183] sm:$0xff]  ;;  %v1514_v49 = vpack.c.bf16 %v7441_v41, %v7441_v41  ;;  %v3088_v23 = vld [vmem:[#allocation2 + $0x18c] sm:$0xff]  ;;  %v1515_v63 = vpack.c.bf16 %v7442_v0, %v7442_v0 }
 0x241   : > { %v6758_v39 = vunpack.c.l.b16 %v3284_v33  ;;  %v3222_v18 = vmax.f32 %v3190_v7, %v6740_v19  ;;  %v3008_v33 = vld [vmem:[#allocation2 + $0x18b] sm:$0xff]  ;;  %v3192_v7 = vmax.f32 %v3160_v28, %v6740_v19 }
 0x242   : > { %3484 = vmatmul.bf16.gmra.mxu0 %v3380_v57  ;;  %v6760_v57 = vmax.f32 %v3045_v5, %v3085_v60  ;;  %v3159_v5 = vmax.f32 %v6657_v32, %v6700_v38  ;;  %v3087_v34 = vld [vmem:[#allocation2 + $0x184] sm:$0xff]  ;;  %v7445_v0 = vld [vmem:[#allocation55_spill] sm:$0xff] }
 0x243   : > { %v3386_v25 = vpack.c.b16 %v6758_v39, %v6754_v2  ;;  %v3254_v48 = vmax.f32 %v3222_v18, %v6768_v44  ;;  %v6806_v41 = vpop.f32.mrf.mxu2 }
 0x244   : > { %1898 = vmatmul.bf16.gmra.mxu2 %v891_v37  ;;  %v2928_v37 = vld [vmem:[#allocation2 + $0x18a] sm:$0xff]  ;;  %v3253_v47 = vmax.f32 %v3221_v45, %v6760_v57  ;;  %v3191_v60 = vmax.f32 %v3159_v5, %v6736_v12  ;;  %v6793_v5 = vpop.f32.mrf.mxu1 }
 0x245   : > { %2665 = vmatmul.bf16.gmra.mxu3 %v2549_v36  ;;  %v2967_v36 = vmax.f32 %v2887_v17, %v2927_v51  ;;  %v3286_v45 = vpack.c.bf16 %v3254_v48, %v3254_v48 }
 0x246   : > { %v3285_v29 = vpack.c.bf16 %v3253_v47, %v3253_v47  ;;  %v3223_v13 = vmax.f32 %v3191_v60, %v6760_v57 }
 0x247   : > { %v3047_v32 = vmax.f32 %v2967_v36, %v3007_v14  ;;  %v6797_v14 = vunpack.c.l.b16 %v3286_v45  ;;  %v1595_v36 = vunpack.c.l.b16 %v1514_v49 }
 0x248   : > { %1746 = vmatmul.bf16.gmra.mxu1 %v1614_v46  ;;  %v2968_v46 = vmax.f32 %v2888_v26, %v2928_v37  ;;  %v3224_v26 = vmax.f32 %v3192_v7, %v6768_v44  ;;  %v6795_v18 = vunpack.c.l.b16 %v3285_v29 }
 0x249   : > { %v6788_v17 = vmax.f32 %v3047_v32, %v3087_v34 }
 0x24a   : > { %v3048_v51 = vmax.f32 %v2968_v46, %v3008_v33  ;;  %v1596_v33 = vunpack.c.l.b16 %v1515_v63  ;;  %v3387_v46 = vpack.c.b16 %v6797_v14, %v6795_v18  ;;  %v1516_v63 = vpack.c.bf16 %v7445_v0, %v7445_v0  ;;  %v7452_v0 = vld [vmem:[#allocation58_spill] sm:$0xff] }
 0x24b   : > { %v3255_v47 = vmax.f32 %v3223_v13, %v6788_v17  ;;  %v6825_v13 = vpop.f32.mrf.mxu2 }
 0x24c   : > { %v6790_v37 = vmax.f32 %v3048_v51, %v3088_v23  ;;  %v1615_v48 = vpack.c.b16 %v1596_v33, %v1595_v36  ;;  %v6817_v23 = vpop.f32.mrf.mxu1  ;;  %v7446_v51 = vld [vmem:[#allocation57_spill] sm:$0xff]  ;;  %v1597_v50 = vunpack.c.l.b16 %v1516_v63  ;;  %v2633_v36 = vpop.f32.mrf.mxu3  ;;  %v7448_v33 = vld [vmem:[#allocation56_spill] sm:$0xff]  ;;  %v1520_v63 = vpack.c.bf16 %v7452_v0, %v7452_v0 }
 0x24d   : > { %v3287_v34 = vpack.c.bf16 %v3255_v47, %v3255_v47  ;;  %v1517_v7 = vpack.c.bf16 %v7446_v51, %v7446_v51  ;;  %v7447_v47 = vpack.c.b16 %v6637_v10, %v6633_v42  ;;  %v7451_v42 = vpack.c.b16 %v6675_v62, %v6673_v52  ;;  %v7453_v51 = vld [vmem:[#allocation60_spill] sm:$0xff] }
 0x24e   : > { %v3256_v28 = vmax.f32 %v3224_v26, %v6790_v37  ;;  %v4643_v0 = vld [vmem:[#allocation2 + $0x15a] sm:$0xff] }
 0x24f   : > { %v6808_v29 = vunpack.c.l.b16 %v3287_v34  ;;  %v7449_v34 = vld [vmem:[#allocation59_spill] sm:$0xff] }
 0x250   : > { %v3288_v60 = vpack.c.bf16 %v3256_v28, %v3256_v28  ;;  %v1518_v28 = vpack.c.bf16 %v7448_v33, %v7448_v33  ;;  %v1832_v33 = vadd.f32 %v6570_v20, %v6756_v31  ;;  %v1835_v20 = vadd.f32 %v6622_v55, %v6793_v5 }
 0x252   : > { %3489 = vmatmul.bf16.gmra.mxu0 %v3381_v4  ;;  %v6810_v32 = vunpack.c.l.b16 %v3288_v60  ;;  %v892_v4 = vpack.c.bf16 %v7444_v61, %v7443_v8  ;;  %v1519_v60 = vpack.c.bf16 %v7449_v34, %v7449_v34  ;;  %v1599_v8 = vunpack.c.l.b16 %v1518_v28 }
 0x253   : > { %v6882_v31 = vpop.f32.mrf.mxu2 }
 0x254   : > { %v3388_v49 = vpack.c.b16 %v6810_v32, %v6808_v29  ;;  %1903 = vmatmul.bf16.gmra.mxu2 %v892_v4  ;;  %v6830_v45 = vpop.f32.mrf.mxu1  ;;  %v1600_v15 = vunpack.c.l.b16 %v1519_v60  ;;  %v1830_v4 = vadd.f32 %v6521_v40, %v6721_v6  ;;  %v1601_v40 = vunpack.c.l.b16 %v1520_v63 }
 0x255   : > { %2670 = vmatmul.bf16.gmra.mxu3 %v2550_v1  ;;  %v1598_v1 = vunpack.c.l.b16 %v1517_v7  ;;  %v1521_v7 = vpack.c.bf16 %v7453_v51, %v7453_v51  ;;  %v2454_v63 = vpack.c.bf16 %v4643_v0, %v4643_v0  ;;  %v1840_v0 = vadd.f32 %v6717_v11, %v6830_v45 }
 0x256   : > { %v1617_v61 = vpack.c.b16 %v1600_v15, %v1599_v8  ;;  %v2711_v58 = vadd.f32 %v2631_v27, %v1830_v4  ;;  %v7454_v27 = vpack.c.b16 %v6691_v21, %v6689_v35  ;;  %v2712_v8 = vadd.f32 %v2633_v36, %v1832_v33 }
 0x257   : > { %v1616_v26 = vpack.c.b16 %v1598_v1, %v1597_v50  ;;  %v6858_v50 = vld [vmem:[%s7220_s5] ss:$0 sm:$0xff]  ;;  %v1602_v6 = vunpack.c.l.b16 %v1521_v7  ;;  %v4644_v7 = vld [vmem:[#allocation2 + $0x152] sm:$0xff] }
 0x258   : > { %1751 = vmatmul.bf16.gmra.mxu1 %v1615_v48  ;;  %v6863_v1 = vld [vmem:[%s7221_s6] ss:$0 sm:$0xff] }
 0x259   : > { %v1618_v34 = vpack.c.b16 %v1602_v6, %v1601_v40 }
 0x25c   : > { %v6839_v48 = vpop.f32.mrf.mxu1 }
 0x262   : > { %3494 = vmatmul.bf16.gmra.mxu0 %v3382_v59  ;;  %v2636_v59 = vpop.f32.mrf.mxu3 }
 0x264   : > { %v6847_v10 = vpop.f32.mrf.mxu1 }
 0x265   : > { %2675 = vmatmul.bf16.gmra.mxu3 %v7447_v47 }
 0x268   : > { %1756 = vmatmul.bf16.gmra.mxu1 %v1616_v26 }
 0x26a   : > { %v2638_v53 = vpop.f32.mrf.mxu3 }
 0x26c   : > { %v6865_v26 = vpop.f32.mrf.mxu1 }
 0x272   : > { %3499 = vmatmul.bf16.gmra.mxu0 %v7450_v56  ;;  %v7455_v56 = vpack.c.b16 %v6719_v30, %v6713_v16  ;;  %v2713_v30 = vadd.f32 %v2636_v59, %v1835_v20  ;;  %v1837_v59 = vadd.f32 %v6669_v22, %v6817_v23 }
 0x274   : > { %v6878_v21 = vpop.f32.mrf.mxu1 }
 0x275   : > { %2680 = vmatmul.bf16.gmra.mxu3 %v7451_v42 }
 0x278   : > { %1761 = vmatmul.bf16.gmra.mxu1 %v1617_v61  ;;  %v2641_v60 = vpop.f32.mrf.mxu3 }
 0x27f   : > { %v3465_v52 = vpop.f32.mrf.mxu0 }
 0x280   : > { %v3545_v62 = vadd.f32 %v3465_v52, %v2711_v58  ;;  %v6885_v16 = vpop.f32.mrf.mxu3  ;;  %v2453_v58 = vpack.c.bf16 %v4644_v7, %v4644_v7 }
 0x282   : > { %v3581_v47 = vmul.f32 %v6858_v50, %v3545_v62  ;;  %3504 = vmatmul.bf16.gmra.mxu0 %v7454_v27  ;;  %v2534_v5 = vunpack.c.l.b16 %v2453_v58 }
 0x284   : > { %v3617_v28 = vadd.f32 %v6863_v1, %v3581_v47  ;;  %v2535_v47 = vunpack.c.l.b16 %v2454_v63  ;;  %v4645_v63 = vld [vmem:[#allocation2 + $0x16a] sm:$0xff] }
 0x285   : > { %2685 = vmatmul.bf16.gmra.mxu3 %v7455_v56  ;;  %v6898_v56 = vpop.f32.mrf.mxu2 }
 0x286   : > { %v3649_v15 = vsub.f32 0.0, %v3617_v28 }
 0x287   : > { %v3467_v61 = vpop.f32.mrf.mxu0 }
 0x288   : > { %1766 = vmatmul.bf16.gmra.mxu1 %v1618_v34  ;;  %v3681_v42 = vmul.f32 1.442695, %v3649_v15  ;;  %v3546_v4 = vadd.f32 %v3467_v61, %v2712_v8  ;;  %v2554_v34 = vpack.c.b16 %v2535_v47, %v2534_v5  ;;  %v6894_v8 = vpop.f32.mrf.mxu1  ;;  %v6896_v15 = vpop.f32.mrf.mxu3  ;;  %v2714_v61 = vadd.f32 %v2638_v53, %v1837_v59 }
 0x28a   : > { %4509 = vpow2.f32 %v3681_v42  ;;  %v3582_v35 = vmul.f32 %v6858_v50, %v3546_v4 }
 0x28c   : > { %v3618_v36 = vadd.f32 %v6863_v1, %v3582_v35 }
 0x28d   : > { %v6912_v11 = vpop.f32.mrf.mxu2 }
 0x28e   : > { %v3650_v51 = vsub.f32 0.0, %v3618_v36 }
 0x28f   : > { %v3470_v52 = vpop.f32.mrf.mxu0 }
 0x290   : > { %v4510_v62 = vpop.eup %4509  ;;  %v3683_v40 = vmul.f32 1.442695, %v3650_v51  ;;  %v3547_v6 = vadd.f32 %v3470_v52, %v2713_v30  ;;  %v2455_v30 = vpack.c.bf16 %v4645_v63, %v4645_v63  ;;  %v4646_v51 = vld [vmem:[#allocation2 + $0x172] sm:$0xff]  ;;  %v6908_v58 = vpop.f32.mrf.mxu3  ;;  %v4647_v63 = vld [vmem:[#allocation2 + $0x182] sm:$0xff] }
 0x291   : > { %v3745_v27 = vadd.f32 1.0, %v4510_v62  ;;  %v2456_v7 = vpack.c.bf16 %v4646_v51, %v4646_v51  ;;  %v6910_v62 = vpop.f32.mrf.mxu1  ;;  %v4648_v51 = vld [vmem:[#allocation2 + $0x18a] sm:$0xff] }
 0x292   : > { %4511 = vpow2.f32 %v3683_v40  ;;  %v3583_v55 = vmul.f32 %v6858_v50, %v3547_v6  ;;  %3509 = vmatmul.bf16.gmra.mxu0 %v3385_v43 }
 0x293   : > { %4513 = vrcp.f32 %v3745_v27  ;;  %v2536_v27 = vunpack.c.l.b16 %v2455_v30  ;;  %v2457_v30 = vpack.c.bf16 %v4647_v63, %v4647_v63 }
 0x294   : > { %v3619_v33 = vadd.f32 %v6863_v1, %v3583_v55  ;;  %v2537_v55 = vunpack.c.l.b16 %v2456_v7  ;;  %v2458_v7 = vpack.c.bf16 %v4648_v51, %v4648_v51 }
 0x295   : > { %2690 = vmatmul.bf16.gmra.mxu3 %v2554_v34 }
 0x296   : > { %v3651_v42 = vsub.f32 0.0, %v3619_v33 }
 0x297   : > { %v3472_v54 = vpop.f32.mrf.mxu0 }
 0x298   : > { %v4512_v24 = vpop.eup %4511  ;;  %v3685_v43 = vmul.f32 1.442695, %v3651_v42  ;;  %v3548_v4 = vadd.f32 %v3472_v54, %v2714_v61  ;;  %v2555_v54 = vpack.c.b16 %v2537_v55, %v2536_v27 }
 0x299   : > { %v4514_v35 = vpop.eup %4513  ;;  %v3746_v20 = vadd.f32 1.0, %v4512_v24  ;;  %v6924_v24 = vpop.f32.mrf.mxu3 }
 0x29a   : > { %v3809_v22 = vmul.f32 %v4514_v35, %v3617_v28  ;;  %4515 = vpow2.f32 %v3685_v43  ;;  %v3584_v23 = vmul.f32 %v6858_v50, %v3548_v4  ;;  %v2715_v28 = vadd.f32 %v2641_v60, %v1840_v0 }
 0x29b   : > { %4517 = vrcp.f32 %v3746_v20  ;;  %v1842_v60 = vadd.f32 %v6752_v3, %v6839_v48  ;;  %v6928_v3 = vpop.f32.mrf.mxu1  ;;  %v6930_v48 = vpop.f32.mrf.mxu2 }
 0x29c   : > { %3841 = vst [vmem:[%s6904_s11] sm:$0xff] %v3809_v22  ;;  %v3620_v53 = vadd.f32 %v6863_v1, %v3584_v23 }
 0x29e   : > { %v3652_v52 = vsub.f32 0.0, %v3620_v53 }
 0x29f   : > { %v3475_v40 = vpop.f32.mrf.mxu0 }
 0x2a0   : > { %v4516_v6 = vpop.eup %4515  ;;  %v3687_v45 = vmul.f32 1.442695, %v3652_v52  ;;  %v3549_v47 = vadd.f32 %v3475_v40, %v2715_v28 }
 0x2a1   : > { %v4518_v5 = vpop.eup %4517  ;;  %v3747_v59 = vadd.f32 1.0, %v4516_v6  ;;  %v6939_v28 = vpop.f32.mrf.mxu3 }
 0x2a2   : > { %v3810_v34 = vmul.f32 %v4518_v5, %v3618_v36  ;;  %4519 = vpow2.f32 %v3687_v45  ;;  %v3585_v61 = vmul.f32 %v6858_v50, %v3549_v47  ;;  %3514 = vmatmul.bf16.gmra.mxu0 %v3386_v25  ;;  %v2716_v36 = vadd.f32 %v6885_v16, %v1842_v60 }
 0x2a3   : > { %4521 = vrcp.f32 %v3747_v59  ;;  %v1845_v16 = vadd.f32 %v6806_v41, %v6847_v10  ;;  %v2538_v41 = vunpack.c.l.b16 %v2457_v30  ;;  %v2539_v10 = vunpack.c.l.b16 %v2458_v7  ;;  %v6949_v60 = vpop.f32.mrf.mxu2 }
 0x2a4   : > { %3842 = vst [vmem:[%s6904_s11 + $0x8] sm:$0xff] %v3810_v34  ;;  %v6922_v42 = vadd.f32 %v6863_v1, %v3585_v61  ;;  %v2810_v34 = vld [vmem:[#allocation2 + $0x1a0] sm:$0xff] }
 0x2a5   : > { %2695 = vmatmul.bf16.gmra.mxu3 %v2555_v54  ;;  %v2717_v52 = vadd.f32 %v6896_v15, %v1845_v16  ;;  %v6947_v15 = vpop.f32.mrf.mxu1  ;;  %v2850_v61 = vld [vmem:[#allocation2 + $0x1a1] sm:$0xff]  ;;  %v1847_v54 = vadd.f32 %v6825_v13, %v6865_v26  ;;  %v3162_v13 = vmax.f32 %v6703_v9, %v6740_v19 }
 0x2a6   : > { %v3653_v43 = vsub.f32 0.0, %v6922_v42 }
 0x2a7   : > { %v3477_v4 = vpop.f32.mrf.mxu0  ;;  %v2718_v18 = vadd.f32 %v6908_v58, %v1847_v54  ;;  %v3161_v58 = vmax.f32 %v6700_v38, %v6736_v12  ;;  %v3194_v9 = vmax.f32 %v3162_v13, %v6768_v44  ;;  %v4649_v38 = vld [vmem:[#allocation2 + $0x19a] sm:$0xff]  ;;  %v3090_v54 = vld [vmem:[#allocation2 + $0x1a4] sm:$0xff] }
 0x2a8   : > { %v4520_v2 = vpop.eup %4519  ;;  %v3689_v39 = vmul.f32 1.442695, %v3653_v43  ;;  %v3550_v25 = vadd.f32 %v3477_v4, %v2716_v36  ;;  %v2556_v36 = vpack.c.b16 %v2539_v10, %v2538_v41  ;;  %v2809_v43 = vld [vmem:[#allocation2 + $0x198] sm:$0xff] }
 0x2a9   : > { %v4522_v35 = vpop.eup %4521  ;;  %v3748_v20 = vadd.f32 1.0, %v4520_v2  ;;  %v2849_v4 = vld [vmem:[#allocation2 + $0x199] sm:$0xff]  ;;  %v6957_v2 = vpop.f32.mrf.mxu3 }
 0x2aa   : > { %v3811_v22 = vmul.f32 %v4522_v35, %v3619_v33  ;;  %4523 = vpow2.f32 %v3689_v39  ;;  %v3586_v23 = vmul.f32 %v6858_v50, %v3550_v25  ;;  %v2889_v25 = vmax.f32 %v2809_v43, %v2849_v4  ;;  %v2930_v35 = vld [vmem:[#allocation2 + $0x1a2] sm:$0xff] }
 0x2ab   : > { %4525 = vrcp.f32 %v3748_v20 }
 0x2ac   : > { %3843 = vst [vmem:[%s6904_s11 + $0x10] sm:$0xff] %v3811_v22  ;;  %v6937_v0 = vadd.f32 %v6863_v1, %v3586_v23  ;;  %v2929_v23 = vld [vmem:[#allocation2 + $0x19a] sm:$0xff] }
 0x2ad   : > { %v6974_v10 = vpop.f32.mrf.mxu1 }
 0x2ae   : > { %v3654_v33 = vsub.f32 0.0, %v6937_v0 }
 0x2af   : > { %v3480_v40 = vpop.f32.mrf.mxu0 }
 0x2b0   : > { %v4524_v6 = vpop.eup %4523  ;;  %v3691_v45 = vmul.f32 1.442695, %v3654_v33  ;;  %v3551_v47 = vadd.f32 %v3480_v40, %v2717_v52  ;;  %v2969_v52 = vmax.f32 %v2889_v25, %v2929_v23  ;;  %v3010_v33 = vld [vmem:[#allocation2 + $0x1a3] sm:$0xff]  ;;  %v1850_v40 = vadd.f32 %v6882_v31, %v6878_v21  ;;  %v2852_v23 = vld [vmem:[#allocation2 + $0x1b9] sm:$0xff] }
 0x2b1   : > { %v4526_v27 = vpop.eup %4525  ;;  %v3749_v55 = vadd.f32 1.0, %v4524_v6 }
 0x2b2   : > { %v3812_v5 = vmul.f32 %v4526_v27, %v3620_v53  ;;  %4527 = vpow2.f32 %v3691_v45  ;;  %v3587_v59 = vmul.f32 %v6858_v50, %v3551_v47  ;;  %3519 = vmatmul.bf16.gmra.mxu0 %v3387_v46  ;;  %v2890_v46 = vmax.f32 %v2810_v34, %v2850_v61  ;;  %v3009_v45 = vld [vmem:[#allocation2 + $0x19b] sm:$0xff]  ;;  %v6976_v27 = vpop.f32.mrf.mxu3 }
 0x2b3   : > { %4529 = vrcp.f32 %v3749_v55  ;;  %v2459_v47 = vpack.c.bf16 %v4649_v38, %v4649_v38  ;;  %v3193_v55 = vmax.f32 %v3161_v58, %v6760_v57  ;;  %v3049_v61 = vmax.f32 %v2969_v52, %v3009_v45 }
 0x2b4   : > { %3844 = vst [vmem:[%s6904_s11 + $0x18] sm:$0xff] %v3812_v5  ;;  %v6955_v53 = vadd.f32 %v6863_v1, %v3587_v59  ;;  %v2970_v7 = vmax.f32 %v2890_v46, %v2930_v35  ;;  %v6979_v5 = vpop.f32.mrf.mxu2  ;;  %v2719_v59 = vadd.f32 %v6924_v24, %v1850_v40 }
 0x2b5   : > { %2700 = vmatmul.bf16.gmra.mxu3 %v2556_v36  ;;  %v3226_v36 = vmax.f32 %v3194_v9, %v6790_v37  ;;  %v2540_v46 = vunpack.c.l.b16 %v2459_v47  ;;  %v3225_v13 = vmax.f32 %v3193_v55, %v6788_v17  ;;  %v2932_v9 = vld [vmem:[#allocation2 + $0x1ba] sm:$0xff] }
 0x2b6   : > { %v3655_v14 = vsub.f32 0.0, %v6955_v53  ;;  %v3050_v31 = vmax.f32 %v2970_v7, %v3010_v33  ;;  %v7006_v7 = vld [vmem:[#allocation2] sm:$0xff] }
 0x2b7   : > { %v3482_v39 = vpop.f32.mrf.mxu0 }
 0x2b8   : > { %v4528_v26 = vpop.eup %4527  ;;  %v3693_v20 = vmul.f32 1.442695, %v3655_v14  ;;  %v3552_v22 = vadd.f32 %v3482_v39, %v2718_v18  ;;  %v3089_v14 = vld [vmem:[#allocation2 + $0x19c] sm:$0xff] }
 0x2b9   : > { %v4530_v16 = vpop.eup %4529  ;;  %v3750_v63 = vadd.f32 1.0, %v4528_v26 }
 0x2ba   : > { %v3813_v30 = vmul.f32 %v4530_v16, %v6922_v42  ;;  %4531 = vpow2.f32 %v3693_v20  ;;  %v3588_v51 = vmul.f32 %v6858_v50, %v3552_v22  ;;  %v4650_v42 = vld [vmem:[#allocation2 + $0x1a2] sm:$0xff]  ;;  %v6990_v20 = vmax.f32 %v3050_v31, %v3090_v54 }
 0x2bb   : > { %4533 = vrcp.f32 %v3750_v63  ;;  %v2460_v41 = vpack.c.bf16 %v4650_v42, %v4650_v42  ;;  %v6992_v22 = vmax.f32 %v3049_v61, %v3089_v14  ;;  %v1852_v16 = vadd.f32 %v6898_v56, %v6894_v8  ;;  %v7009_v56 = vpop.f32.mrf.mxu1  ;;  %v2931_v42 = vld [vmem:[#allocation2 + $0x1b2] sm:$0xff] }
 0x2bc   : > { %3845 = vst [vmem:[%s6904_s11 + $0x20] sm:$0xff] %v3813_v30  ;;  %v6972_v6 = vadd.f32 %v6863_v1, %v3588_v51  ;;  %v2851_v30 = vld [vmem:[#allocation2 + $0x1b1] sm:$0xff]  ;;  %v7001_v51 = vpop.f32.mrf.mxu3  ;;  %v2892_v8 = vmax.f32 %v7006_v7, %v2852_v23  ;;  %v7012_v45 = vpop.f32.mrf.mxu2  ;;  %v3163_v31 = vmax.f32 %v6736_v12, %v6760_v57 }
 0x2bd   : > { %v2541_v39 = vunpack.c.l.b16 %v2460_v41  ;;  %v3257_v29 = vmax.f32 %v3225_v13, %v6992_v22  ;;  %v2720_v32 = vadd.f32 %v6939_v28, %v1852_v16  ;;  %v2891_v33 = vmax.f32 %v7006_v7, %v2851_v30  ;;  %v3011_v14 = vld [vmem:[#allocation2 + $0x1b3] sm:$0xff] }
 0x2be   : > { %v3656_v21 = vsub.f32 0.0, %v6972_v6  ;;  %v3164_v41 = vmax.f32 %v6740_v19, %v6768_v44  ;;  %v2972_v54 = vmax.f32 %v2892_v8, %v2932_v9  ;;  %v2854_v8 = vld [vmem:[#allocation2 + $0x1d1] sm:$0xff] }
 0x2bf   : > { %v3485_v34 = vpop.f32.mrf.mxu0  ;;  %v2557_v58 = vpack.c.b16 %v2541_v39, %v2540_v46 }
 0x2c0   : > { %v4532_v43 = vpop.eup %4531  ;;  %v3695_v4 = vmul.f32 1.442695, %v3656_v21  ;;  %v3553_v18 = vadd.f32 %v3485_v34, %v2719_v59  ;;  %v3289_v21 = vpack.c.bf16 %v3257_v29, %v3257_v29  ;;  %v3196_v12 = vmax.f32 %v3164_v41, %v6790_v37 }
 0x2c1   : > { %v4534_v25 = vpop.eup %4533  ;;  %v3751_v35 = vadd.f32 1.0, %v4532_v43  ;;  %v3012_v43 = vld [vmem:[#allocation2 + $0x1bb] sm:$0xff] }
 0x2c2   : > { %v3814_v24 = vmul.f32 %v4534_v25, %v6937_v0  ;;  %4535 = vpow2.f32 %v3695_v4  ;;  %v3589_v26 = vmul.f32 %v6858_v50, %v3553_v18  ;;  %3524 = vmatmul.bf16.gmra.mxu0 %v3388_v49  ;;  %v3258_v0 = vmax.f32 %v3226_v36, %v6990_v20 }
 0x2c3   : > { %4537 = vrcp.f32 %v3751_v35  ;;  %v2971_v36 = vmax.f32 %v2891_v33, %v2931_v42  ;;  %v1855_v4 = vadd.f32 %v6912_v11, %v6910_v62  ;;  %v3370_v35 = vunpack.c.l.b16 %v3289_v21  ;;  %v3092_v11 = vld [vmem:[#allocation2 + $0x1bc] sm:$0xff]  ;;  %v2934_v21 = vld [vmem:[#allocation2 + $0x1d2] sm:$0xff] }
 0x2c4   : > { %3846 = vst [vmem:[%s6904_s11 + $0x28] sm:$0xff] %v3814_v24  ;;  %v6998_v63 = vadd.f32 %v6863_v1, %v3589_v26  ;;  %v3290_v28 = vpack.c.bf16 %v3258_v0, %v3258_v0  ;;  %v7027_v46 = vpop.f32.mrf.mxu3  ;;  %v3052_v13 = vmax.f32 %v2972_v54, %v3012_v43  ;;  %v3228_v30 = vmax.f32 %v3196_v12, %v6990_v20 }
 0x2c5   : > { %2705 = vmatmul.bf16.gmra.mxu3 %v2557_v58  ;;  %v2721_v39 = vadd.f32 %v6957_v2, %v1855_v4  ;;  %v3051_v62 = vmax.f32 %v2971_v36, %v3011_v14  ;;  %v3091_v58 = vld [vmem:[#allocation2 + $0x1b4] sm:$0xff]  ;;  %v3166_v54 = vmax.f32 %v6768_v44, %v6790_v37  ;;  %v3013_v44 = vld [vmem:[#allocation2 + $0x1cb] sm:$0xff] }
 0x2c6   : > { %v3657_v49 = vsub.f32 0.0, %v6998_v63  ;;  %v3371_v18 = vunpack.c.l.b16 %v3290_v28  ;;  %v1857_v28 = vadd.f32 %v6930_v48, %v6928_v3  ;;  %v2933_v3 = vld [vmem:[#allocation2 + $0x1ca] sm:$0xff] }
 0x2c7   : > { %v3487_v52 = vpop.f32.mrf.mxu0 }
 0x2c8   : > { %v4536_v40 = vpop.eup %4535  ;;  %v3697_v38 = vmul.f32 1.442695, %v3657_v49  ;;  %v3554_v47 = vadd.f32 %v3487_v52, %v2720_v32  ;;  %v3389_v0 = vpack.c.b16 %v3371_v18, %v3370_v35  ;;  %v7033_v32 = vpop.f32.mrf.mxu1 }
 0x2c9   : > { %v4538_v55 = vpop.eup %4537  ;;  %v3752_v59 = vadd.f32 1.0, %v4536_v40  ;;  %v7036_v52 = vpop.f32.mrf.mxu2  ;;  %v7040_v40 = vmax.f32 %v3052_v13, %v3092_v11  ;;  %v1860_v11 = vadd.f32 %v6949_v60, %v6947_v15 }
 0x2ca   : > { %v3815_v34 = vmul.f32 %v4538_v55, %v6955_v53  ;;  %4539 = vpow2.f32 %v3697_v38  ;;  %v3590_v61 = vmul.f32 %v6858_v50, %v3554_v47  ;;  %v3195_v53 = vmax.f32 %v3163_v31, %v6788_v17  ;;  %v2853_v38 = vld [vmem:[#allocation2 + $0x1c9] sm:$0xff] }
 0x2cb   : > { %4541 = vrcp.f32 %v3752_v59  ;;  %v7042_v47 = vmax.f32 %v3051_v62, %v3091_v58  ;;  %v3260_v41 = vmax.f32 %v3228_v30, %v7040_v40  ;;  %v2893_v59 = vmax.f32 %v7006_v7, %v2853_v38  ;;  %v3093_v30 = vld [vmem:[#allocation2 + $0x1cc] sm:$0xff] }
 0x2cc   : > { %3847 = vst [vmem:[%s6904_s11 + $0x30] sm:$0xff] %v3815_v34  ;;  %v7024_v19 = vadd.f32 %v6863_v1, %v3590_v61  ;;  %v3227_v2 = vmax.f32 %v3195_v53, %v6992_v22  ;;  %v7052_v55 = vpop.f32.mrf.mxu3  ;;  %v2722_v31 = vadd.f32 %v6976_v27, %v1857_v28  ;;  %v3165_v27 = vmax.f32 %v6760_v57, %v6788_v17 }
 0x2cd   : > { %v3292_v18 = vpack.c.bf16 %v3260_v41, %v3260_v41  ;;  %v2973_v53 = vmax.f32 %v2893_v59, %v2933_v3 }
 0x2ce   : > { %v3658_v25 = vsub.f32 0.0, %v7024_v19  ;;  %v3259_v61 = vmax.f32 %v3227_v2, %v7042_v47 }
 0x2cf   : > { %v3490_v24 = vpop.f32.mrf.mxu0  ;;  %v3373_v17 = vunpack.c.l.b16 %v3292_v18 }
 0x2d0   : > { %v4540_v26 = vpop.eup %4539  ;;  %v3699_v23 = vmul.f32 1.442695, %v3658_v25  ;;  %v3555_v16 = vadd.f32 %v3490_v24, %v2721_v39  ;;  %v3014_v39 = vld [vmem:[#allocation2 + $0x1d3] sm:$0xff]  ;;  %v3291_v13 = vpack.c.bf16 %v3259_v61, %v3259_v61  ;;  %v7064_v37 = vpop.f32.mrf.mxu1  ;;  %v3198_v24 = vmax.f32 %v3166_v54, %v6990_v20 }
 0x2d1   : > { %v4542_v29 = vpop.eup %4541  ;;  %v3753_v49 = vadd.f32 1.0, %v4540_v26  ;;  %v7067_v62 = vpop.f32.mrf.mxu2 }
 0x2d2   : > { %v3816_v33 = vmul.f32 %v4542_v29, %v6972_v6  ;;  %4543 = vpow2.f32 %v3699_v23  ;;  %v3591_v9 = vmul.f32 %v6858_v50, %v3555_v16  ;;  %3529 = vmatmul.bf16.gmra.mxu0 %v3389_v0  ;;  %v2894_v6 = vmax.f32 %v7006_v7, %v2854_v8  ;;  %v3094_v16 = vld [vmem:[#allocation2 + $0x1d4] sm:$0xff] }
 0x2d3   : > { %4545 = vrcp.f32 %v3753_v49  ;;  %v3053_v23 = vmax.f32 %v2973_v53, %v3013_v44  ;;  %v2723_v0 = vadd.f32 %v7001_v51, %v1860_v11  ;;  %v3372_v20 = vunpack.c.l.b16 %v3291_v13 }
 0x2d4   : > { %3848 = vst [vmem:[%s6904_s11 + $0x38] sm:$0xff] %v3816_v33  ;;  %v7048_v42 = vadd.f32 %v6863_v1, %v3591_v9  ;;  %v2974_v14 = vmax.f32 %v2894_v6, %v2934_v21  ;;  %v7075_v26 = vpop.f32.mrf.mxu3  ;;  %v3197_v29 = vmax.f32 %v3165_v27, %v6992_v22  ;;  %v3230_v15 = vmax.f32 %v3198_v24, %v7040_v40 }
 0x2d5   : > { %v3390_v33 = vpack.c.b16 %v3373_v17, %v3372_v20  ;;  %v3133_v41 = vmax.f32 %v3053_v23, %v3093_v30  ;;  %v1862_v40 = vadd.f32 %v6979_v5, %v6974_v10 }
 0x2d6   : > { %v3659_v34 = vsub.f32 0.0, %v7048_v42  ;;  %v3229_v22 = vmax.f32 %v3197_v29, %v7042_v47 }
 0x2d7   : > { %v3492_v48 = vpop.f32.mrf.mxu0 }
 0x2d8   : > { %v4544_v36 = vpop.eup %4543  ;;  %v3701_v43 = vmul.f32 1.442695, %v3659_v34  ;;  %v3556_v4 = vadd.f32 %v3492_v48, %v2722_v31  ;;  %v7088_v31 = vpop.f32.mrf.mxu1  ;;  %v3261_v48 = vmax.f32 %v3229_v22, %v3133_v41 }
 0x2d9   : > { %v4546_v12 = vpop.eup %4545  ;;  %v3754_v7 = vadd.f32 1.0, %v4544_v36  ;;  %v7090_v61 = vpop.f32.mrf.mxu2 }
 0x2da   : > { %v3817_v25 = vmul.f32 %v4546_v12, %v6998_v63  ;;  %4547 = vpow2.f32 %v3701_v43  ;;  %v3592_v35 = vmul.f32 %v6858_v50, %v3556_v4  ;;  %v3054_v63 = vmax.f32 %v2974_v14, %v3014_v39 }
 0x2db   : > { %4549 = vrcp.f32 %v3754_v7  ;;  %v3293_v12 = vpack.c.bf16 %v3261_v48, %v3261_v48 }
 0x2dc   : > { %3849 = vst [vmem:[%s6904_s11 + $0x40] sm:$0xff] %v3817_v25  ;;  %v7073_v57 = vadd.f32 %v6863_v1, %v3592_v35  ;;  %v3134_v9 = vmax.f32 %v3054_v63, %v3094_v16  ;;  %v2671_v34 = vpop.f32.mrf.mxu3 }
 0x2dd   : > { %v3374_v35 = vunpack.c.l.b16 %v3293_v12 }
 0x2de   : > { %v3660_v58 = vsub.f32 0.0, %v7073_v57  ;;  %v3262_v21 = vmax.f32 %v3230_v15, %v3134_v9 }
 0x2df   : > { %v3495_v49 = vpop.f32.mrf.mxu0 }
 0x2e0   : > { %v4548_v60 = vpop.eup %4547  ;;  %v3703_v2 = vmul.f32 1.442695, %v3660_v58  ;;  %v3557_v8 = vadd.f32 %v3495_v49, %v2723_v0  ;;  %v3294_v4 = vpack.c.bf16 %v3262_v21, %v3262_v21  ;;  %v7100_v13 = vpop.f32.mrf.mxu1 }
 0x2e1   : > { %v4550_v38 = vpop.eup %4549  ;;  %v3755_v28 = vadd.f32 1.0, %v4548_v60  ;;  %v7102_v24 = vpop.f32.mrf.mxu2 }
 0x2e2   : > { %v3818_v51 = vmul.f32 %v4550_v38, %v7024_v19  ;;  %4551 = vpow2.f32 %v3703_v2  ;;  %v3593_v6 = vmul.f32 %v6858_v50, %v3557_v8  ;;  %3534 = vmatmul.bf16.gmra.mxu0 %v3390_v33  ;;  %v2724_v19 = vadd.f32 %v7027_v46, %v1862_v40 }
 0x2e3   : > { %4553 = vrcp.f32 %v3755_v28  ;;  %v1865_v46 = vadd.f32 %v7012_v45, %v7009_v56  ;;  %v3375_v53 = vunpack.c.l.b16 %v3294_v4 }
 0x2e4   : > { %3850 = vst [vmem:[%s6904_s11 + $0x48] sm:$0xff] %v3818_v51  ;;  %v3629_v59 = vadd.f32 %v6863_v1, %v3593_v6  ;;  %v2673_v39 = vpop.f32.mrf.mxu3 }
 0x2e5   : > { %v2725_v27 = vadd.f32 %v7052_v55, %v1865_v46  ;;  %v3391_v63 = vpack.c.b16 %v3375_v53, %v3374_v35  ;;  %v1867_v55 = vadd.f32 %v7036_v52, %v7033_v32  ;;  %v1870_v52 = vadd.f32 %v7067_v62, %v7064_v37 }
 0x2e6   : > { %v3661_v3 = vsub.f32 0.0, %v3629_v59  ;;  %v1872_v62 = vadd.f32 %v7090_v61, %v7088_v31  ;;  %v1875_v31 = vadd.f32 %v7102_v24, %v7100_v13 }
 0x2e7   : > { %v3497_v54 = vpop.f32.mrf.mxu0  ;;  %v2726_v20 = vadd.f32 %v7075_v26, %v1867_v55  ;;  %v2727_v28 = vadd.f32 %v2671_v34, %v1870_v52 }
 0x2e8   : > { %v4552_v47 = vpop.eup %4551  ;;  %v3705_v36 = vmul.f32 1.442695, %v3661_v3  ;;  %v3558_v43 = vadd.f32 %v3497_v54, %v2724_v19  ;;  %v1739_v2 = vpop.f32.mrf.mxu1 }
 0x2e9   : > { %v4554_v10 = vpop.eup %4553  ;;  %v3756_v5 = vadd.f32 1.0, %v4552_v47  ;;  %v1876_v33 = vpop.f32.mrf.mxu2  ;;  %v2728_v47 = vadd.f32 %v2673_v39, %v1872_v62 }
 0x2ea   : > { %v3819_v18 = vmul.f32 %v4554_v10, %v7048_v42  ;;  %4555 = vpow2.f32 %v3705_v36  ;;  %v3594_v14 = vmul.f32 %v6858_v50, %v3558_v43  ;;  %v1877_v13 = vadd.f32 %v1876_v33, %v1739_v2 }
 0x2eb   : > { %4557 = vrcp.f32 %v3756_v5 }
 0x2ec   : > { %3851 = vst [vmem:[%s6904_s11 + $0x50] sm:$0xff] %v3819_v18  ;;  %v3630_v7 = vadd.f32 %v6863_v1, %v3594_v14  ;;  %v2676_v58 = vpop.f32.mrf.mxu3 }
 0x2ed   : > { %v2729_v39 = vadd.f32 %v2676_v58, %v1875_v31 }
 0x2ee   : > { %v3662_v25 = vsub.f32 0.0, %v3630_v7 }
 0x2ef   : > { %v3500_v42 = vpop.f32.mrf.mxu0 }
 0x2f0   : > { %v4556_v44 = vpop.eup %4555  ;;  %v3707_v11 = vmul.f32 1.442695, %v3662_v25  ;;  %v3559_v17 = vadd.f32 %v3500_v42, %v2725_v27  ;;  %v1742_v48 = vpop.f32.mrf.mxu1 }
 0x2f1   : > { %v4558_v56 = vpop.eup %4557  ;;  %v3757_v45 = vadd.f32 1.0, %v4556_v44  ;;  %v1879_v37 = vpop.f32.mrf.mxu2 }
 0x2f2   : > { %v3820_v23 = vmul.f32 %v4558_v56, %v7073_v57  ;;  %4559 = vpow2.f32 %v3707_v11  ;;  %v3595_v16 = vmul.f32 %v6858_v50, %v3559_v17  ;;  %3539 = vmatmul.bf16.gmra.mxu0 %v3391_v63  ;;  %v1880_v2 = vadd.f32 %v1879_v37, %v1742_v48 }
 0x2f3   : > { %4561 = vrcp.f32 %v3757_v45 }
 0x2f4   : > { %3852 = vst [vmem:[%s6904_s11 + $0x58] sm:$0xff] %v3820_v23  ;;  %v3631_v0 = vadd.f32 %v6863_v1, %v3595_v16  ;;  %v2678_v38 = vpop.f32.mrf.mxu3 }
 0x2f5   : > { %v2730_v23 = vadd.f32 %v2678_v38, %v1877_v13 }
 0x2f6   : > { %v3663_v30 = vsub.f32 0.0, %v3631_v0 }
 0x2f7   : > { %v3502_v29 = vpop.f32.mrf.mxu0 }
 0x2f8   : > { %v4560_v49 = vpop.eup %4559  ;;  %v3709_v15 = vmul.f32 1.442695, %v3663_v30  ;;  %v3560_v57 = vadd.f32 %v3502_v29, %v2726_v20 }
 0x2f9   : > { %v4562_v60 = vpop.eup %4561  ;;  %v3758_v8 = vadd.f32 1.0, %v4560_v49  ;;  %v1881_v53 = vpop.f32.mrf.mxu2 }
 0x2fa   : > { %v3821_v9 = vmul.f32 %v4562_v60, %v3629_v59  ;;  %4563 = vpow2.f32 %v3709_v15  ;;  %v3596_v32 = vmul.f32 %v6858_v50, %v3560_v57 }
 0x2fb   : > { %4565 = vrcp.f32 %v3758_v8 }
 0x2fc   : > { %3853 = vst [vmem:[%s6904_s11 + $0x60] sm:$0xff] %v3821_v9  ;;  %v3632_v26 = vadd.f32 %v6863_v1, %v3596_v32  ;;  %v2681_v54 = vpop.f32.mrf.mxu3 }
 0x2fd   : > { %v2731_v9 = vadd.f32 %v2681_v54, %v1880_v2 }
 0x2fe   : > { %v3664_v41 = vsub.f32 0.0, %v3632_v26 }
 0x2ff   : > { %v3505_v51 = vpop.f32.mrf.mxu0 }
 0x300   : > { %v4564_v6 = vpop.eup %4563  ;;  %v3711_v22 = vmul.f32 1.442695, %v3664_v41  ;;  %v3561_v40 = vadd.f32 %v3505_v51, %v2727_v28 }
 0x301   : > { %v4566_v21 = vpop.eup %4565  ;;  %v3759_v59 = vadd.f32 1.0, %v4564_v6  ;;  %v1884_v20 = vpop.f32.mrf.mxu2 }
 0x302   : > { %v3822_v19 = vmul.f32 %v4566_v21, %v3630_v7  ;;  %4567 = vpow2.f32 %v3711_v22  ;;  %v3597_v3 = vmul.f32 %v6858_v50, %v3561_v40  ;;  %v1744_v7 = vpop.f32.mrf.mxu1 }
 0x303   : > { %4569 = vrcp.f32 %v3759_v59 }
 0x304   : > { %3854 = vst [vmem:[%s6904_s11 + $0x68] sm:$0xff] %v3822_v19  ;;  %v3633_v34 = vadd.f32 %v6863_v1, %v3597_v3  ;;  %v2683_v35 = vpop.f32.mrf.mxu3  ;;  %v1882_v19 = vadd.f32 %v1881_v53, %v1744_v7 }
 0x306   : > { %v3665_v36 = vsub.f32 0.0, %v3633_v34  ;;  %v2732_v48 = vadd.f32 %v2683_v35, %v1882_v19 }
 0x307   : > { %v3507_v43 = vpop.f32.mrf.mxu0 }
 0x308   : > { %v4568_v4 = vpop.eup %4567  ;;  %v3713_v10 = vmul.f32 1.442695, %v3665_v36  ;;  %v3562_v5 = vadd.f32 %v3507_v43, %v2728_v47 }
 0x309   : > { %v4570_v18 = vpop.eup %4569  ;;  %v3760_v14 = vadd.f32 1.0, %v4568_v4  ;;  %v1886_v22 = vpop.f32.mrf.mxu2 }
 0x30a   : > { %v3823_v12 = vmul.f32 %v4570_v18, %v3631_v0  ;;  %4571 = vpow2.f32 %v3713_v10  ;;  %v3598_v46 = vmul.f32 %v6858_v50, %v3562_v5  ;;  %v1747_v55 = vpop.f32.mrf.mxu1 }
 0x30b   : > { %4573 = vrcp.f32 %v3760_v14  ;;  %v1885_v14 = vadd.f32 %v1884_v20, %v1747_v55 }
 0x30c   : > { %3855 = vst [vmem:[%s6904_s11 + $0x70] sm:$0xff] %v3823_v12  ;;  %v3634_v61 = vadd.f32 %v6863_v1, %v3598_v46  ;;  %v2686_v57 = vpop.f32.mrf.mxu3 }
 0x30d   : > { %v2733_v31 = vadd.f32 %v2686_v57, %v1885_v14 }
 0x30e   : > { %v3666_v27 = vsub.f32 0.0, %v3634_v61 }
 0x30f   : > { %v3510_v25 = vpop.f32.mrf.mxu0 }
 0x310   : > { %v4572_v42 = vpop.eup %4571  ;;  %v3715_v44 = vmul.f32 1.442695, %v3666_v27  ;;  %v3563_v11 = vadd.f32 %v3510_v25, %v2729_v39 }
 0x311   : > { %v4574_v17 = vpop.eup %4573  ;;  %v3761_v63 = vadd.f32 1.0, %v4572_v42  ;;  %v1889_v18 = vpop.f32.mrf.mxu2 }
 0x312   : > { %v3824_v56 = vmul.f32 %v4574_v17, %v3632_v26  ;;  %4575 = vpow2.f32 %v3715_v44  ;;  %v3599_v45 = vmul.f32 %v6858_v50, %v3563_v11  ;;  %v1749_v51 = vpop.f32.mrf.mxu1 }
 0x313   : > { %4577 = vrcp.f32 %v3761_v63  ;;  %v1887_v11 = vadd.f32 %v1886_v22, %v1749_v51 }
 0x314   : > { %3856 = vst [vmem:[%s6904_s11 + $0x78] sm:$0xff] %v3824_v56  ;;  %v3635_v24 = vadd.f32 %v6863_v1, %v3599_v45  ;;  %v2688_v59 = vpop.f32.mrf.mxu3 }
 0x315   : > { %v2734_v45 = vadd.f32 %v2688_v59, %v1887_v11 }
 0x316   : > { %v3667_v16 = vsub.f32 0.0, %v3635_v24 }
 0x317   : > { %v3512_v0 = vpop.f32.mrf.mxu0 }
 0x318   : > { %v4576_v58 = vpop.eup %4575  ;;  %v3717_v30 = vmul.f32 1.442695, %v3667_v16  ;;  %v3564_v29 = vadd.f32 %v3512_v0, %v2730_v23 }
 0x319   : > { %v4578_v49 = vpop.eup %4577  ;;  %v3762_v15 = vadd.f32 1.0, %v4576_v58  ;;  %v1891_v56 = vpop.f32.mrf.mxu2 }
 0x31a   : > { %v3825_v60 = vmul.f32 %v4578_v49, %v3633_v34  ;;  %4579 = vpow2.f32 %v3717_v30  ;;  %v3600_v8 = vmul.f32 %v6858_v50, %v3564_v29  ;;  %v1752_v5 = vpop.f32.mrf.mxu1  ;;  %v7151_v49 = vld [vmem:[%s7221_s6] ss:$0 sm:$0xff] }
 0x31b   : > { %4581 = vrcp.f32 %v3762_v15  ;;  %v1890_v29 = vadd.f32 %v1889_v18, %v1752_v5 }
 0x31c   : > { %3857 = vst [vmem:[%s6904_s11 + $0x80] sm:$0xff] %v3825_v60  ;;  %v3636_v33 = vadd.f32 %v6863_v1, %v3600_v8  ;;  %v2691_v46 = vpop.f32.mrf.mxu3 }
 0x31d   : > { %v2735_v57 = vadd.f32 %v2691_v46, %v1890_v29 }
 0x31e   : > { %v3668_v32 = vsub.f32 0.0, %v3636_v33 }
 0x31f   : > { %v3515_v52 = vpop.f32.mrf.mxu0 }
 0x320   : > { %v4580_v26 = vpop.eup %4579  ;;  %v3719_v38 = vmul.f32 1.442695, %v3668_v32  ;;  %v3565_v28 = vadd.f32 %v3515_v52, %v2731_v9 }
 0x321   : > { %v4582_v41 = vpop.eup %4581  ;;  %v3763_v6 = vadd.f32 1.0, %v4580_v26  ;;  %v1894_v9 = vpop.f32.mrf.mxu2 }
 0x322   : > { %v3826_v40 = vmul.f32 %v4582_v41, %v3634_v61  ;;  %4583 = vpow2.f32 %v3719_v38  ;;  %v3601_v21 = vmul.f32 %v6858_v50, %v3565_v28  ;;  %v1754_v63 = vpop.f32.mrf.mxu1 }
 0x323   : > { %4585 = vrcp.f32 %v3763_v6  ;;  %v1892_v6 = vadd.f32 %v1891_v56, %v1754_v63 }
 0x324   : > { %3858 = vst [vmem:[%s6904_s11 + $0x88] sm:$0xff] %v3826_v40  ;;  %v3637_v3 = vadd.f32 %v6863_v1, %v3601_v21 }
 0x326   : > { %v3669_v37 = vsub.f32 0.0, %v3637_v3 }
 0x327   : > { %v3517_v62 = vpop.f32.mrf.mxu0 }
 0x328   : > { %v4584_v34 = vpop.eup %4583  ;;  %v3721_v54 = vmul.f32 1.442695, %v3669_v37  ;;  %v3566_v47 = vadd.f32 %v3517_v62, %v2732_v48 }
 0x329   : > { %v4586_v36 = vpop.eup %4585  ;;  %v3764_v43 = vadd.f32 1.0, %v4584_v34 }
 0x32a   : > { %v3827_v4 = vmul.f32 %v4586_v36, %v3635_v24  ;;  %4587 = vpow2.f32 %v3721_v54  ;;  %v3602_v10 = vmul.f32 %v6858_v50, %v3566_v47  ;;  %v2693_v24 = vpop.f32.mrf.mxu3  ;;  %v1757_v8 = vpop.f32.mrf.mxu1 }
 0x32b   : > { %4589 = vrcp.f32 %v3764_v43  ;;  %v2736_v40 = vadd.f32 %v2693_v24, %v1892_v6  ;;  %v1896_v54 = vpop.f32.mrf.mxu2 }
 0x32c   : > { %3859 = vst [vmem:[%s6904_s11 + $0x90] sm:$0xff] %v3827_v4  ;;  %v3638_v12 = vadd.f32 %v6863_v1, %v3602_v10  ;;  %v1895_v4 = vadd.f32 %v1894_v9, %v1757_v8 }
 0x32e   : > { %v3670_v61 = vsub.f32 0.0, %v3638_v12 }
 0x32f   : > { %v3520_v7 = vpop.f32.mrf.mxu0 }
 0x330   : > { %v4588_v53 = vpop.eup %4587  ;;  %v3723_v39 = vmul.f32 1.442695, %v3670_v61  ;;  %v3567_v27 = vadd.f32 %v3520_v7, %v2733_v31 }
 0x331   : > { %v4590_v25 = vpop.eup %4589  ;;  %v3765_v35 = vadd.f32 1.0, %v4588_v53 }
 0x332   : > { %v3828_v42 = vmul.f32 %v4590_v25, %v3636_v33  ;;  %4591 = vpow2.f32 %v3723_v39  ;;  %v3603_v44 = vmul.f32 %v6858_v50, %v3567_v27  ;;  %v7144_v50 = vld [vmem:[%s7220_s5] ss:$0 sm:$0xff]  ;;  %v2696_v28 = vpop.f32.mrf.mxu3  ;;  %v1759_v62 = vpop.f32.mrf.mxu1 }
 0x333   : > { %4593 = vrcp.f32 %v3765_v35  ;;  %v2737_v5 = vadd.f32 %v2696_v28, %v1895_v4  ;;  %v1899_v25 = vpop.f32.mrf.mxu2  ;;  %v1897_v35 = vadd.f32 %v1896_v54, %v1759_v62 }
 0x334   : > { %3860 = vst [vmem:[%s6904_s11 + $0x98] sm:$0xff] %v3828_v42  ;;  %v3639_v17 = vadd.f32 %v6863_v1, %v3603_v44 }
 0x336   : > { %v3671_v13 = vsub.f32 0.0, %v3639_v17 }
 0x337   : > { %v3522_v23 = vpop.f32.mrf.mxu0 }
 0x338   : > { %v4592_v16 = vpop.eup %4591  ;;  %v3725_v55 = vmul.f32 1.442695, %v3671_v13  ;;  %v3568_v0 = vadd.f32 %v3522_v23, %v2734_v45 }
 0x339   : > { %v4594_v58 = vpop.eup %4593  ;;  %v3766_v20 = vadd.f32 1.0, %v4592_v16 }
 0x33a   : > { %v3829_v30 = vmul.f32 %v4594_v58, %v3637_v3  ;;  %4595 = vpow2.f32 %v3725_v55  ;;  %v3604_v1 = vmul.f32 %v7144_v50, %v3568_v0  ;;  %v2698_v43 = vpop.f32.mrf.mxu3  ;;  %v1762_v27 = vpop.f32.mrf.mxu1 }
 0x33b   : > { %4597 = vrcp.f32 %v3766_v20  ;;  %v2738_v11 = vadd.f32 %v2698_v43, %v1897_v35  ;;  %v1900_v0 = vadd.f32 %v1899_v25, %v1762_v27 }
 0x33c   : > { %3861 = vst [vmem:[%s6904_s11 + $0xa0] sm:$0xff] %v3829_v30  ;;  %v3640_v15 = vadd.f32 %v7151_v49, %v3604_v1  ;;  %v1901_v30 = vpop.f32.mrf.mxu2 }
 0x33e   : > { %v3672_v60 = vsub.f32 0.0, %v3640_v15 }
 0x33f   : > { %v3525_v2 = vpop.f32.mrf.mxu0 }
 0x340   : > { %v4596_v33 = vpop.eup %4595  ;;  %v3727_v32 = vmul.f32 1.442695, %v3672_v60  ;;  %v3569_v52 = vadd.f32 %v3525_v2, %v2735_v57 }
 0x341   : > { %v4598_v26 = vpop.eup %4597  ;;  %v3767_v38 = vadd.f32 1.0, %v4596_v33 }
 0x342   : > { %v3830_v41 = vmul.f32 %v4598_v26, %v3638_v12  ;;  %4599 = vpow2.f32 %v3727_v32  ;;  %v3605_v51 = vmul.f32 %v7144_v50, %v3569_v52  ;;  %v2701_v44 = vpop.f32.mrf.mxu3  ;;  %v1764_v20 = vpop.f32.mrf.mxu1 }
 0x343   : > { %4601 = vrcp.f32 %v3767_v38  ;;  %v2739_v1 = vadd.f32 %v2701_v44, %v1900_v0  ;;  %v1902_v26 = vadd.f32 %v1901_v30, %v1764_v20 }
 0x344   : > { %3862 = vst [vmem:[%s6904_s11 + $0xa8] sm:$0xff] %v3830_v41  ;;  %v3641_v22 = vadd.f32 %v7151_v49, %v3605_v51 }
 0x346   : > { %v3673_v21 = vsub.f32 0.0, %v3641_v22 }
 0x347   : > { %v3527_v59 = vpop.f32.mrf.mxu0 }
 0x348   : > { %v4600_v19 = vpop.eup %4599  ;;  %v3729_v3 = vmul.f32 1.442695, %v3673_v21  ;;  %v3570_v48 = vadd.f32 %v3527_v59, %v2736_v40 }
 0x349   : > { %v4602_v37 = vpop.eup %4601  ;;  %v3768_v34 = vadd.f32 1.0, %v4600_v19  ;;  %v1904_v19 = vpop.f32.mrf.mxu2 }
 0x34a   : > { %v3831_v47 = vmul.f32 %v4602_v37, %v3639_v17  ;;  %4603 = vpow2.f32 %v3729_v3  ;;  %v3606_v36 = vmul.f32 %v7144_v50, %v3570_v48  ;;  %v1767_v51 = vpop.f32.mrf.mxu1 }
 0x34b   : > { %4605 = vrcp.f32 %v3768_v34  ;;  %v1905_v34 = vadd.f32 %v1904_v19, %v1767_v51 }
 0x34c   : > { %3863 = vst [vmem:[%s6904_s11 + $0xb0] sm:$0xff] %v3831_v47  ;;  %v3642_v10 = vadd.f32 %v7151_v49, %v3606_v36 }
 0x34e   : > { %v3674_v18 = vsub.f32 0.0, %v3642_v10 }
 0x34f   : > { %v3530_v14 = vpop.f32.mrf.mxu0 }
 0x350   : > { %v4604_v12 = vpop.eup %4603  ;;  %v3731_v46 = vmul.f32 1.442695, %v3674_v18  ;;  %v3571_v31 = vadd.f32 %v3530_v14, %v2737_v5 }
 0x351   : > { %v4606_v61 = vpop.eup %4605  ;;  %v3769_v7 = vadd.f32 1.0, %v4604_v12 }
 0x352   : > { %v3832_v53 = vmul.f32 %v4606_v61, %v3640_v15  ;;  %4607 = vpow2.f32 %v3731_v46  ;;  %v3607_v39 = vmul.f32 %v7144_v50, %v3571_v31  ;;  %v2703_v15 = vpop.f32.mrf.mxu3  ;;  %v1769_v14 = vpop.f32.mrf.mxu1 }
 0x353   : > { %4609 = vrcp.f32 %v3769_v7  ;;  %v2740_v28 = vadd.f32 %v2703_v15, %v1902_v26  ;;  %v1906_v61 = vpop.f32.mrf.mxu2 }
 0x354   : > { %3864 = vst [vmem:[%s6904_s11 + $0xb8] sm:$0xff] %v3832_v53  ;;  %v3643_v42 = vadd.f32 %v7151_v49, %v3607_v39  ;;  %v1907_v53 = vadd.f32 %v1906_v61, %v1769_v14 }
 0x356   : > { %v3675_v17 = vsub.f32 0.0, %v3643_v42 }
 0x357   : > { %v3532_v63 = vpop.f32.mrf.mxu0 }
 0x358   : > { %v4608_v56 = vpop.eup %4607  ;;  %v3733_v45 = vmul.f32 1.442695, %v3675_v17  ;;  %v3572_v13 = vadd.f32 %v3532_v63, %v2738_v11 }
 0x359   : > { %v4610_v24 = vpop.eup %4609  ;;  %v3770_v23 = vadd.f32 1.0, %v4608_v56 }
 0x35a   : > { %v3833_v16 = vmul.f32 %v4610_v24, %v3641_v22  ;;  %4611 = vpow2.f32 %v3733_v45  ;;  %v3608_v55 = vmul.f32 %v7144_v50, %v3572_v13  ;;  %v2706_v48 = vpop.f32.mrf.mxu3 }
 0x35b   : > { %4613 = vrcp.f32 %v3770_v23  ;;  %v2741_v47 = vadd.f32 %v2706_v48, %v1905_v34 }
 0x35c   : > { %3865 = vst [vmem:[%s6904_s11 + $0xc0] sm:$0xff] %v3833_v16  ;;  %v3644_v58 = vadd.f32 %v7151_v49, %v3608_v55 }
 0x35e   : > { %v3676_v29 = vsub.f32 0.0, %v3644_v58 }
 0x35f   : > { %v3535_v57 = vpop.f32.mrf.mxu0 }
 0x360   : > { %v4612_v60 = vpop.eup %4611  ;;  %v3735_v8 = vmul.f32 1.442695, %v3676_v29  ;;  %v3573_v2 = vadd.f32 %v3535_v57, %v2739_v1 }
 0x361   : > { %v4614_v33 = vpop.eup %4613  ;;  %v3771_v9 = vadd.f32 1.0, %v4612_v60 }
 0x362   : > { %v3834_v32 = vmul.f32 %v4614_v33, %v3642_v10  ;;  %4615 = vpow2.f32 %v3735_v8  ;;  %v3609_v52 = vmul.f32 %v7144_v50, %v3573_v2  ;;  %v2708_v7 = vpop.f32.mrf.mxu3 }
 0x363   : > { %4617 = vrcp.f32 %v3771_v9  ;;  %v2742_v27 = vadd.f32 %v2708_v7, %v1907_v53 }
 0x364   : > { %3866 = vst [vmem:[%s6904_s11 + $0xc8] sm:$0xff] %v3834_v32  ;;  %v3645_v38 = vadd.f32 %v7151_v49, %v3609_v52 }
 0x366   : > { %v3677_v41 = vsub.f32 0.0, %v3645_v38 }
 0x367   : > { %v3537_v6 = vpop.f32.mrf.mxu0 }
 0x368   : > { %v4616_v22 = vpop.eup %4615  ;;  %v3737_v40 = vmul.f32 1.442695, %v3677_v41  ;;  %v3574_v21 = vadd.f32 %v3537_v6, %v2740_v28 }
 0x369   : > { %v4618_v59 = vpop.eup %4617  ;;  %v3772_v3 = vadd.f32 1.0, %v4616_v22 }
 0x36a   : > { %v3835_v37 = vmul.f32 %v4618_v59, %v3643_v42  ;;  %4619 = vpow2.f32 %v3737_v40  ;;  %v3610_v62 = vmul.f32 %v7144_v50, %v3574_v21 }
 0x36b   : > { %4621 = vrcp.f32 %v3772_v3 }
 0x36c   : > { %3867 = vst [vmem:[%s6904_s11 + $0xd0] sm:$0xff] %v3835_v37  ;;  %v3646_v54 = vadd.f32 %v7151_v49, %v3610_v62 }
 0x36e   : > { %v3678_v36 = vsub.f32 0.0, %v3646_v54 }
 0x36f   : > { %v3540_v43 = vpop.f32.mrf.mxu0 }
 0x370   : > { %v4620_v4 = vpop.eup %4619  ;;  %v3739_v10 = vmul.f32 1.442695, %v3678_v36  ;;  %v3575_v5 = vadd.f32 %v3540_v43, %v2741_v47 }
 0x371   : > { %v4622_v18 = vpop.eup %4621  ;;  %v3773_v12 = vadd.f32 1.0, %v4620_v4 }
 0x372   : > { %v3836_v46 = vmul.f32 %v4622_v18, %v3644_v58  ;;  %4623 = vpow2.f32 %v3739_v10  ;;  %v3611_v31 = vmul.f32 %v7144_v50, %v3575_v5 }
 0x373   : > { %4625 = vrcp.f32 %v3773_v12 }
 0x374   : > { %3868 = vst [vmem:[%s6904_s11 + $0xd8] sm:$0xff] %v3836_v46  ;;  %v3647_v39 = vadd.f32 %v7151_v49, %v3611_v31 }
 0x376   : > { %v3679_v25 = vsub.f32 0.0, %v3647_v39 }
 0x377   : > { %v3542_v35 = vpop.f32.mrf.mxu0 }
 0x378   : > { %v4624_v42 = vpop.eup %4623  ;;  %v3741_v44 = vmul.f32 1.442695, %v3679_v25  ;;  %v3576_v11 = vadd.f32 %v3542_v35, %v2742_v27 }
 0x379   : > { %v4626_v17 = vpop.eup %4625  ;;  %v3774_v63 = vadd.f32 1.0, %v4624_v42 }
 0x37a   : > { %v3837_v56 = vmul.f32 %v4626_v17, %v3645_v38  ;;  %4627 = vpow2.f32 %v3741_v44  ;;  %v3612_v45 = vmul.f32 %v7144_v50, %v3576_v11 }
 0x37b   : > { %4629 = vrcp.f32 %v3774_v63 }
 0x37c   : > { %3869 = vst [vmem:[%s6904_s11 + $0xe0] sm:$0xff] %v3837_v56  ;;  %v3648_v13 = vadd.f32 %v7151_v49, %v3612_v45 }
 0x37e   : > { %v3680_v24 = vsub.f32 0.0, %v3648_v13 }
 0x380   : > { %v4628_v23 = vpop.eup %4627  ;;  %v3743_v16 = vmul.f32 1.442695, %v3680_v24 }
 0x381   : > { %v4630_v55 = vpop.eup %4629  ;;  %v3775_v0 = vadd.f32 1.0, %v4628_v23 }
 0x382   : > { %v3838_v58 = vmul.f32 %v4630_v55, %v3646_v54  ;;  %4631 = vpow2.f32 %v3743_v16 }
 0x383   : > { %4633 = vrcp.f32 %v3775_v0 }
 0x384   : > { %3870 = vst [vmem:[%s6904_s11 + $0xe8] sm:$0xff] %v3838_v58 }
 0x388   : > { %v4632_v20 = vpop.eup %4631 }
 0x389   : > { %v4634_v50 = vpop.eup %4633  ;;  %v3776_v30 = vadd.f32 1.0, %v4632_v20 }
 0x38a   : > { %v3839_v1 = vmul.f32 %v4634_v50, %v3647_v39 }
 0x38b   : > { %4635 = vrcp.f32 %v3776_v30 }
 0x38c   : > { %3871 = vst [vmem:[%s6904_s11 + $0xf0] sm:$0xff] %v3839_v1 }
 0x391   : > { %v4636_v49 = vpop.eup %4635 }
 0x392   : > { %v3840_v29 = vmul.f32 %v4636_v49, %v3648_v13 }
 0x394   : > { %3872 = vst [vmem:[%s6904_s11 + $0xf8] sm:$0xff] %v3840_v29 }
 0x395   : > { %4771 = shalt.err (!%p4768_p10)
}
 0x396   : > { %s4821_s14 = smov 128   ;;  %s4822_s11 = smov 8  }
 0x397   : > { %4315 = dma.vmem_to_hbm [thread:$0]  (%p4935_p3), %s3887_s29, 4096, %s3889_s23, %s3874_s15, %s4821_s14, %s4821_s14, %s4822_s11  }
 0x398 PF: > { %s3903_s30 = sand.u32 1, %s4802_s24   ;;  %p7456_p12 = scmp.ge.s32.totalorder %s4814_s27, 2 }
 0x399   : > { %s3904_s12 = scalar_lea.sflag [#allocation5], %s3903_s30 }
 0x39a   : > { %p4329_p13 = pnand %p7456_p12, %p4898_p6 }
 0x39c   : > { %p4330_p0 = pneg %p4329_p13 }
 0x39e   : > { %4797 = dma.done.wait (%p4330_p0), %s3904_s12, 4096  }
 0x39f   : > { %4799 = vsyncadd (%p4330_p0), %s3904_s12, 4294963200  ;;  %p21_p5 = scmp.ge.s32.totalorder %s4925_s22, 4   ;;  %s7457_s24 = smov %s4806_s25 }
 0x3a0   : > { %s7458_s25 = smov %s4810_s26  ;;  %s7459_s26 = smov %s4941_s10 }
 0x3a1   : > { %s7460_s27 = smov %s4925_s22  ;;  %23 = sbr.rel (!%p21_p5) target bundleno = 8 (0x8), region = 105 }
 0x3a6   :  { %3910 = vsyncpa [#allocation4], 1 }
 0x3a7   :  { %3912 = vsyncpa [#allocation4 + $0x1], 1 }
 0x3a8   :  { %3913 = vsyncpa [#allocation7], 1 }
 0x3a9   :  { %3914 = vsyncpa [#allocation5], 1 }
 0x3aa   :  { %3916 = vsyncpa [#allocation5 + $0x1], 1 }

</bundles_post_ra>
